<compile_context>
chip_gen: v7x
topology: tpu7x:2x2x1
jax: 0.10.0
libtpu: 0.0.40
codegen_flags: <defaults>
</compile_context>

<pallas_src>
import numpy as np

import jax
import jax.numpy as jnp
from jax import lax
from jax.experimental import pallas as pl
from jax.experimental.pallas import tpu as pltpu


# ------------------------------ Pallas kernel -------------------------------

def _make_kernel(conv_couts):
    """Builds the fused kernel.  Activation layout inside the kernel:
    rows = sample*H + h (B_TILE samples stacked), lanes = w*C + c."""

    def _bf16(a):
        return a.astype(jnp.bfloat16)

    def layer(src, cout, cb_ref, cbias_ref, lsel_ref, ssel_ref):
        # src: (B*H, W*Cin) ref (layer 1) or f32 value (layers 2..4).
        m = src.shape[0] - 2                      # conv-output slab rows
        # conv3x3 ('valid') = 3 row-shifted matmuls vs banded weight matrices.
        acc = jnp.dot(_bf16(src[0:m, :]), cb_ref[0],
                      preferred_element_type=jnp.float32)
        acc = acc + jnp.dot(_bf16(src[1:m + 1, :]), cb_ref[1],
                            preferred_element_type=jnp.float32)
        acc = acc + jnp.dot(_bf16(src[2:m + 2, :]), cb_ref[2],
                            preferred_element_type=jnp.float32)
        y = jnp.maximum(acc + cbias_ref[...], 0.0)          # bias + ReLU (f32)

        # 2x2 max-pool, vertical: row-pair max on the VPU (shift-by-one-row
        # slices), then ONE block-diagonal 0/1 row-selection matmul that also
        # drops the rows straddling two samples.
        tv = jnp.maximum(y[0:m - 1, :], y[1:m, :])
        v = jnp.dot(lsel_ref[...], _bf16(tv),
                    preferred_element_type=jnp.float32)      # (B*hp, wc*cout)

        # 2x2 max-pool, horizontal: lane-pair max on the VPU (shift-by-cout
        # lane slices), then ONE 0/1 column-selection matmul.
        n = v.shape[1]
        th = jnp.maximum(v[:, 0:n - cout], v[:, cout:n])
        return jnp.dot(_bf16(th), ssel_ref[...],
                       preferred_element_type=jnp.float32)   # (B*hp, wp*cout)

    def kernel(x_ref, mask_ref,
               cb1, cbias1, lsel1, ssel1,
               cb2, cbias2, lsel2, ssel2,
               cb3, cbias3, lsel3, ssel3,
               cb4, cbias4, lsel4, ssel4,
               w1t, fb1, w2t, fb2,
               out_ref):
        a = layer(x_ref, conv_couts[0], cb1, cbias1, lsel1, ssel1)
        a = layer(a, conv_couts[1], cb2, cbias2, lsel2, ssel2)
        a = layer(a, conv_couts[2], cb3, cbias3, lsel3, ssel3)
        feat = layer(a, conv_couts[3], cb4, cbias4, lsel4, ssel4)  # (B, 8*init_f)

        # fc1 -> ReLU -> dropout -> fc2 -> log_softmax (whole tile at once).
        h = jnp.dot(_bf16(feat), w1t[...],
                    preferred_element_type=jnp.float32) + fb1[...]
        h = jnp.maximum(h, 0.0) * mask_ref[...]     # keep-mask pre-scaled by 1/(1-p)
        logits = jnp.dot(_bf16(h), w2t[...],
                         preferred_element_type=jnp.float32) + fb2[...]
        mx = jnp.max(logits, axis=-1, keepdims=True)
        lse = jnp.log(jnp.sum(jnp.exp(logits - mx), axis=-1, keepdims=True)) + mx
        out_ref[...] = logits - lse

    return kernel


# ------------------------ one-time parameter preprocessing ------------------

def _const_spec(a):
    zeros = (0,) * a.ndim
    return pl.BlockSpec(a.shape, lambda i, _z=zeros: _z)


def _prepare_constants(params, shape_in, b_tile):
    """Host-side construction of banded conv matrices (bf16), pool selectors
    (bf16) and transposed fc weights (bf16); biases stay f32."""
    Cin, Hin, Win = shape_in
    consts = []
    h, w, cin = Hin, Win, Cin

    for (wt, bias) in params['convs']:
        wt_np = np.asarray(wt, dtype=np.float32)          # (cout, cin, 3, 3) OIHW
        b_np = np.asarray(bias, dtype=np.float32)
        cout = wt_np.shape[0]
        hc, wc = h - 2, w - 2                             # conv 'valid' extents
        hp, wp = hc // 2, wc // 2                         # floor pool (PyTorch)

        # Banded matrices: Bm[kh, w'*cin+ci, c*cout+co] = W[co, ci, kh, w'-c].
        Bm = np.zeros((3, w * cin, wc * cout), np.float32)
        for kh in range(3):
            for kw in range(3):
                blk = wt_np[:, :, kh, kw].T               # (cin, cout)
                for c in range(wc):
                    Bm[kh, (c + kw) * cin:(c + kw + 1) * cin,
                           c * cout:(c + 1) * cout] = blk
        bias_row = np.tile(b_np, wc).reshape(1, wc * cout)

        # Vertical pool selector: block-diagonal over samples, picks the even
        # conv rows of the row-pair max (and skips cross-sample garbage rows).
        m = b_tile * h - 2                                # conv-output slab rows
        L = np.zeros((b_tile * hp, m - 1), np.float32)
        rows = np.arange(hp)
        for b in range(b_tile):
            L[b * hp + rows, b * h + 2 * rows] = 1.0

        # Horizontal pool selector: picks the even w-blocks of the lane-pair max.
        S = np.zeros(((wc - 1) * cout, wp * cout), np.float32)
        ch = np.arange(cout)
        for j in range(wp):
            S[2 * j * cout + ch, j * cout + ch] = 1.0

        consts += [jnp.asarray(Bm, jnp.bfloat16),
                   jnp.asarray(bias_row, jnp.float32),
                   jnp.asarray(L, jnp.bfloat16),
                   jnp.asarray(S, jnp.bfloat16)]
        h, w, cin = hp, wp, cout

    (w1, b1), (w2, b2) = params['fc1'], params['fc2']
    consts += [jnp.asarray(np.asarray(w1, np.float32).T, jnp.bfloat16),
               jnp.asarray(np.asarray(b1, np.float32).reshape(1, -1), jnp.float32),
               jnp.asarray(np.asarray(w2, np.float32).T, jnp.bfloat16),
               jnp.asarray(np.asarray(b2, np.float32).reshape(1, -1), jnp.float32)]

    specs = [_const_spec(c) for c in consts]
    return consts, specs


def _cost_estimate(shape_in, couts, num_fc1, num_classes, b_tile, n_tiles, consts):
    cin, h, w = shape_in
    flops = 0
    for cout in couts:
        hc, wc = h - 2, w - 2
        hp, wp = hc // 2, wc // 2
        m = b_tile * h - 2
        flops += 3 * 2 * m * (w * cin) * (wc * cout)                 # conv matmuls
        flops += 2 * (b_tile * hp) * (m - 1) * (wc * cout)           # vertical select
        flops += 2 * (b_tile * hp) * ((wc - 1) * cout) * (wp * cout)  # horizontal select
        cin, h, w = cout, hp, wp
    num_flatten = cin * h * w
    flops += 2 * b_tile * num_flatten * num_fc1
    flops += 2 * b_tile * num_fc1 * num_classes
    transcendentals = b_tile * (num_classes + 1)                     # exp + log rows
    const_bytes = sum(int(np.prod(c.shape)) * c.dtype.itemsize for c in consts)
    cin0, hin, win = shape_in
    bytes_per_tile = (b_tile * hin * win * cin0 * 4
                      + b_tile * num_fc1 * 4
                      + b_tile * num_classes * 4
                      + const_bytes)
    return pl.CostEstimate(flops=int(flops) * n_tiles,
                           transcendentals=int(transcendentals) * n_tiles,
                           bytes_accessed=int(bytes_per_tile) * n_tiles)


def build_forward(params, shape_in, batch, num_fc1, num_classes, b_tile=8):
    Cin, Hin, Win = shape_in
    n_pad = ((batch + b_tile - 1) // b_tile) * b_tile
    n_tiles = n_pad // b_tile

    consts, const_specs = _prepare_constants(params, shape_in, b_tile)
    couts = tuple(int(np.asarray(wt).shape[0]) for (wt, _b) in params['convs'])
    kernel = _make_kernel(couts)

    x_spec = pl.BlockSpec((b_tile * Hin, Win * Cin), lambda i: (i, 0))
    mask_spec = pl.BlockSpec((b_tile, num_fc1), lambda i: (i, 0))
    out_spec = pl.BlockSpec((b_tile, num_classes), lambda i: (i, 0))

    cost = _cost_estimate(shape_in, couts, num_fc1, num_classes,
                          b_tile, n_tiles, consts)

    # VMEM budget (per grid step, double-buffered): ~0.8 MiB input slab +
    # ~1.3 MiB bf16 constants + a few MiB of compiler-managed intermediates,
    # comfortably below the 32 MiB limit set here (fits v7x's 32 MiB scoped
    # default / 64 MiB physical as well as v5e/v6e).
    fwd_call = pl.pallas_call(
        kernel,
        grid=(n_tiles,),
        in_specs=[x_spec, mask_spec] + const_specs,
        out_specs=out_spec,
        out_shape=jax.ShapeDtypeStruct((n_pad, num_classes), jnp.float32),
        compiler_params=pltpu.CompilerParams(
            dimension_semantics=("parallel",),
            vmem_limit_bytes=32 * 1024 * 1024),
        cost_estimate=cost,
    )

    @jax.jit
    def forward(x_nchw, drop_mask):
        x = x_nchw.astype(jnp.float32)
        mask = drop_mask.astype(jnp.float32)
        if n_pad != batch:
            x = jnp.pad(x, ((0, n_pad - batch), (0, 0), (0, 0), (0, 0)))
            mask = jnp.pad(mask, ((0, n_pad - batch), (0, 0)))
        # NCHW -> lane-dense slab: row = sample*Hin + h, lane = w*Cin + c.
        x2d = jnp.transpose(x, (0, 2, 3, 1)).reshape(n_pad * Hin, Win * Cin)
        out = fwd_call(x2d, mask, *consts)
        return out[:batch]

    return forward


# --------------------------- pure-JAX references ----------------------------

def reference_forward(x_nchw, params, drop_mask):
    """f32 reference (HIGHEST precision)."""
    hi = lax.Precision.HIGHEST
    x = x_nchw.astype(jnp.float32)
    for (w, b) in params['convs']:
        x = lax.conv_general_dilated(x, w.astype(jnp.float32), (1, 1), 'VALID',
                                     dimension_numbers=('NCHW', 'OIHW', 'NCHW'),
                                     precision=hi)
        x = jax.nn.relu(x + b[None, :, None, None])
        x = lax.reduce_window(x, -jnp.inf, lax.max,
                              (1, 1, 2, 2), (1, 1, 2, 2), 'VALID')
    x = x.reshape(x.shape[0], -1)
    w1, b1 = params['fc1']
    w2, b2 = params['fc2']
    x = jax.nn.relu(jnp.dot(x, w1.T, precision=hi) + b1)
    x = x * drop_mask
    x = jnp.dot(x, w2.T, precision=hi) + b2
    return jax.nn.log_softmax(x, axis=1)


def reference_forward_bf16(x_nchw, params, drop_mask):
    """Reference with the kernel's bf16 rounding points (weights, network
    input, post-ReLU conv outputs, post-dropout fc1 output); f32 accumulation."""
    hi = lax.Precision.HIGHEST

    def r(a):
        return a.astype(jnp.bfloat16).astype(jnp.float32)

    x = r(x_nchw.astype(jnp.float32))
    for (w, b) in params['convs']:
        x = lax.conv_general_dilated(x, r(w), (1, 1), 'VALID',
                                     dimension_numbers=('NCHW', 'OIHW', 'NCHW'),
                                     precision=hi)
        x = jax.nn.relu(x + b[None, :, None, None])
        x = r(x)
        x = lax.reduce_window(x, -jnp.inf, lax.max,
                              (1, 1, 2, 2), (1, 1, 2, 2), 'VALID')
    x = x.reshape(x.shape[0], -1)
    w1, b1 = params['fc1']
    w2, b2 = params['fc2']
    x = jax.nn.relu(jnp.dot(x, r(w1).T, precision=hi) + b1)
    x = r(x * drop_mask)
    x = jnp.dot(x, r(w2).T, precision=hi) + b2
    return jax.nn.log_softmax(x, axis=1)


# ----------------------------------- main -----------------------------------

if __name__ == "__main__":
    # Equivalent of the PyTorch module's __init__.
    Cin, Hin, Win = 3, 50, 50
    init_f, num_fc1, num_classes = 4, 32, 2
    dropout_rate = 0.25
    N = 16
    B_TILE = 8            # samples per grid step -> grid=(2,), both TCs busy on v7x

    key = jax.random.PRNGKey(0)
    keys = jax.random.split(key, 14)

    def winit(k, shape, scale=0.1):
        return (scale * jax.random.normal(k, shape)).astype(jnp.float32)

    convs = []
    cin = Cin
    for li, cout in enumerate([init_f, 2 * init_f, 4 * init_f, 8 * init_f]):
        convs.append((winit(keys[2 * li], (cout, cin, 3, 3)),
                      winit(keys[2 * li + 1], (cout,))))
        cin = cout

    # spatial chain: 50 ->48->24 ->22->11 ->9->4 ->2->1  => num_flatten = 8*init_f
    num_flatten = 1 * 1 * 8 * init_f
    fc1 = (winit(keys[8], (num_fc1, num_flatten)), winit(keys[9], (num_fc1,)))
    fc2 = (winit(keys[10], (num_classes, num_fc1)), winit(keys[11], (num_classes,)))
    params = {'convs': convs, 'fc1': fc1, 'fc2': fc2}

    x = jax.random.normal(keys[12], (N, Cin, Hin, Win), jnp.float32)

    # F.dropout(p, training=True) semantics with a deterministic keep mask.
    keep = jax.random.bernoulli(keys[13], 1.0 - dropout_rate, (N, num_fc1))
    drop_mask = keep.astype(jnp.float32) / (1.0 - dropout_rate)

    forward = build_forward(params, (Cin, Hin, Win), N, num_fc1, num_classes,
                            b_tile=B_TILE)
    out = jax.block_until_ready(forward(x, drop_mask))
    assert out.shape == (N, num_classes)

    ref_bf16 = reference_forward_bf16(x, params, drop_mask)   # matches kernel rounding
    ref_f32 = reference_forward(x, params, drop_mask)         # full-precision sanity
    err_vs_bf16 = float(jnp.max(jnp.abs(out - ref_bf16)))
    err_vs_f32 = float(jnp.max(jnp.abs(out - ref_f32)))
    assert err_vs_bf16 < 2e-3, f"mismatch vs bf16-matched reference: {err_vs_bf16}"
    assert err_vs_f32 < 1e-1, f"mismatch vs f32 reference: {err_vs_f32}"

    print("KERNEL_OK")
</pallas_src>

<mosaic_0001>
module attributes {stable_mosaic.version = 11 : i64} {
  func.func @kernel(%arg0: i32, %arg1: memref<400x150xf32, #tpu.memory_space<vmem>>, %arg2: memref<8x32xf32, #tpu.memory_space<vmem>>, %arg3: memref<3x150x192xbf16, #tpu.memory_space<vmem>>, %arg4: memref<1x192xf32, #tpu.memory_space<vmem>>, %arg5: memref<192x397xbf16, #tpu.memory_space<vmem>>, %arg6: memref<188x96xbf16, #tpu.memory_space<vmem>>, %arg7: memref<3x96x176xbf16, #tpu.memory_space<vmem>>, %arg8: memref<1x176xf32, #tpu.memory_space<vmem>>, %arg9: memref<88x189xbf16, #tpu.memory_space<vmem>>, %arg10: memref<168x88xbf16, #tpu.memory_space<vmem>>, %arg11: memref<3x88x144xbf16, #tpu.memory_space<vmem>>, %arg12: memref<1x144xf32, #tpu.memory_space<vmem>>, %arg13: memref<32x85xbf16, #tpu.memory_space<vmem>>, %arg14: memref<128x64xbf16, #tpu.memory_space<vmem>>, %arg15: memref<3x64x64xbf16, #tpu.memory_space<vmem>>, %arg16: memref<1x64xf32, #tpu.memory_space<vmem>>, %arg17: memref<8x29xbf16, #tpu.memory_space<vmem>>, %arg18: memref<32x32xbf16, #tpu.memory_space<vmem>>, %arg19: memref<32x32xbf16, #tpu.memory_space<vmem>>, %arg20: memref<1x32xf32, #tpu.memory_space<vmem>>, %arg21: memref<32x2xbf16, #tpu.memory_space<vmem>>, %arg22: memref<1x2xf32, #tpu.memory_space<vmem>>, %arg23: memref<8x2xf32, #tpu.memory_space<vmem>>) attributes {dimension_semantics = [#tpu.dimension_semantics<parallel>], iteration_bounds = array<i64: 2>, scalar_prefetch = 0 : i64, scratch_operands = 0 : i64, tpu.core_type = #tpu.core_type<tc>, window_params = [{transform_indices = @transform_0, window_bounds = array<i64: 400, 150>}, {transform_indices = @transform_1, window_bounds = array<i64: 8, 32>}, {pipeline_mode = #tpu.pipeline_mode<synchronous>, transform_indices = @transform_2, window_bounds = array<i64: 3, 150, 192>}, {pipeline_mode = #tpu.pipeline_mode<synchronous>, transform_indices = @transform_3, window_bounds = array<i64: 1, 192>}, {pipeline_mode = #tpu.pipeline_mode<synchronous>, transform_indices = @transform_4, window_bounds = array<i64: 192, 397>}, {pipeline_mode = #tpu.pipeline_mode<synchronous>, transform_indices = @transform_5, window_bounds = array<i64: 188, 96>}, {pipeline_mode = #tpu.pipeline_mode<synchronous>, transform_indices = @transform_6, window_bounds = array<i64: 3, 96, 176>}, {pipeline_mode = #tpu.pipeline_mode<synchronous>, transform_indices = @transform_7, window_bounds = array<i64: 1, 176>}, {pipeline_mode = #tpu.pipeline_mode<synchronous>, transform_indices = @transform_8, window_bounds = array<i64: 88, 189>}, {pipeline_mode = #tpu.pipeline_mode<synchronous>, transform_indices = @transform_9, window_bounds = array<i64: 168, 88>}, {pipeline_mode = #tpu.pipeline_mode<synchronous>, transform_indices = @transform_10, window_bounds = array<i64: 3, 88, 144>}, {pipeline_mode = #tpu.pipeline_mode<synchronous>, transform_indices = @transform_11, window_bounds = array<i64: 1, 144>}, {pipeline_mode = #tpu.pipeline_mode<synchronous>, transform_indices = @transform_12, window_bounds = array<i64: 32, 85>}, {pipeline_mode = #tpu.pipeline_mode<synchronous>, transform_indices = @transform_13, window_bounds = array<i64: 128, 64>}, {pipeline_mode = #tpu.pipeline_mode<synchronous>, transform_indices = @transform_14, window_bounds = array<i64: 3, 64, 64>}, {pipeline_mode = #tpu.pipeline_mode<synchronous>, transform_indices = @transform_15, window_bounds = array<i64: 1, 64>}, {pipeline_mode = #tpu.pipeline_mode<synchronous>, transform_indices = @transform_16, window_bounds = array<i64: 8, 29>}, {pipeline_mode = #tpu.pipeline_mode<synchronous>, transform_indices = @transform_17, window_bounds = array<i64: 32, 32>}, {pipeline_mode = #tpu.pipeline_mode<synchronous>, transform_indices = @transform_18, window_bounds = array<i64: 32, 32>}, {pipeline_mode = #tpu.pipeline_mode<synchronous>, transform_indices = @transform_19, window_bounds = array<i64: 1, 32>}, {pipeline_mode = #tpu.pipeline_mode<synchronous>, transform_indices = @transform_20, window_bounds = array<i64: 32, 2>}, {pipeline_mode = #tpu.pipeline_mode<synchronous>, transform_indices = @transform_21, window_bounds = array<i64: 1, 2>}, {transform_indices = @transform_22, window_bounds = array<i64: 8, 2>}]} {
    %c0 = arith.constant 0 : index
    %c0_0 = arith.constant 0 : index
    %0 = vector.load %arg1[%c0, %c0_0] : memref<400x150xf32, #tpu.memory_space<vmem>>, vector<398x150xf32>
    %1 = arith.truncf %0 : vector<398x150xf32> to vector<398x150xbf16>
    %c0_1 = arith.constant 0 : index
    %c0_2 = arith.constant 0 : index
    %c0_3 = arith.constant 0 : index
    %2 = vector.load %arg3[%c0_1, %c0_2, %c0_3] : memref<3x150x192xbf16, #tpu.memory_space<vmem>>, vector<1x150x192xbf16>
    %3 = vector.shape_cast %2 : vector<1x150x192xbf16> to vector<150x192xbf16>
    %cst = arith.constant dense<0.000000e+00> : vector<398x192xf32>
    %4 = tpu.matmul %1, %3, %cst {dimension_numbers = #tpu.dot_dimension_numbers<[1], [0], [0], [1], [0, 0, 1, 1], [], []>} : vector<398x150xbf16>, vector<150x192xbf16>, vector<398x192xf32> -> vector<398x192xf32>
    %c1 = arith.constant 1 : index
    %c0_4 = arith.constant 0 : index
    %5 = vector.load %arg1[%c1, %c0_4] : memref<400x150xf32, #tpu.memory_space<vmem>>, vector<398x150xf32>
    %6 = arith.truncf %5 : vector<398x150xf32> to vector<398x150xbf16>
    %c1_5 = arith.constant 1 : index
    %c0_6 = arith.constant 0 : index
    %c0_7 = arith.constant 0 : index
    %7 = vector.load %arg3[%c1_5, %c0_6, %c0_7] : memref<3x150x192xbf16, #tpu.memory_space<vmem>>, vector<1x150x192xbf16>
    %8 = vector.shape_cast %7 : vector<1x150x192xbf16> to vector<150x192xbf16>
    %cst_8 = arith.constant dense<0.000000e+00> : vector<398x192xf32>
    %9 = tpu.matmul %6, %8, %cst_8 {dimension_numbers = #tpu.dot_dimension_numbers<[1], [0], [0], [1], [0, 0, 1, 1], [], []>} : vector<398x150xbf16>, vector<150x192xbf16>, vector<398x192xf32> -> vector<398x192xf32>
    %10 = arith.addf %4, %9 : vector<398x192xf32>
    %c2 = arith.constant 2 : index
    %c0_9 = arith.constant 0 : index
    %11 = vector.load %arg1[%c2, %c0_9] : memref<400x150xf32, #tpu.memory_space<vmem>>, vector<398x150xf32>
    %12 = arith.truncf %11 : vector<398x150xf32> to vector<398x150xbf16>
    %c2_10 = arith.constant 2 : index
    %c0_11 = arith.constant 0 : index
    %c0_12 = arith.constant 0 : index
    %13 = vector.load %arg3[%c2_10, %c0_11, %c0_12] : memref<3x150x192xbf16, #tpu.memory_space<vmem>>, vector<1x150x192xbf16>
    %14 = vector.shape_cast %13 : vector<1x150x192xbf16> to vector<150x192xbf16>
    %cst_13 = arith.constant dense<0.000000e+00> : vector<398x192xf32>
    %15 = tpu.matmul %12, %14, %cst_13 {dimension_numbers = #tpu.dot_dimension_numbers<[1], [0], [0], [1], [0, 0, 1, 1], [], []>} : vector<398x150xbf16>, vector<150x192xbf16>, vector<398x192xf32> -> vector<398x192xf32>
    %16 = arith.addf %10, %15 : vector<398x192xf32>
    %c0_14 = arith.constant 0 : index
    %c0_15 = arith.constant 0 : index
    %17 = vector.load %arg4[%c0_14, %c0_15] : memref<1x192xf32, #tpu.memory_space<vmem>>, vector<1x192xf32>
    %18 = vector.broadcast %17 : vector<1x192xf32> to vector<398x192xf32>
    %19 = arith.addf %16, %18 : vector<398x192xf32>
    %cst_16 = arith.constant 0.000000e+00 : f32
    %20 = vector.broadcast %cst_16 : f32 to vector<398x192xf32>
    %21 = arith.maximumf %19, %20 : vector<398x192xf32>
    %22 = vector.extract_strided_slice %21 {offsets = [0, 0], sizes = [397, 192], strides = [1, 1]} : vector<398x192xf32> to vector<397x192xf32>
    %23 = vector.extract_strided_slice %21 {offsets = [1, 0], sizes = [397, 192], strides = [1, 1]} : vector<398x192xf32> to vector<397x192xf32>
    %24 = arith.maximumf %22, %23 : vector<397x192xf32>
    %c0_17 = arith.constant 0 : index
    %c0_18 = arith.constant 0 : index
    %25 = vector.load %arg5[%c0_17, %c0_18] : memref<192x397xbf16, #tpu.memory_space<vmem>>, vector<192x397xbf16>
    %26 = arith.truncf %24 : vector<397x192xf32> to vector<397x192xbf16>
    %cst_19 = arith.constant dense<0.000000e+00> : vector<192x192xf32>
    %27 = tpu.matmul %25, %26, %cst_19 {dimension_numbers = #tpu.dot_dimension_numbers<[1], [0], [0], [1], [0, 0, 1, 1], [], []>} : vector<192x397xbf16>, vector<397x192xbf16>, vector<192x192xf32> -> vector<192x192xf32>
    %28 = vector.extract_strided_slice %27 {offsets = [0, 0], sizes = [192, 188], strides = [1, 1]} : vector<192x192xf32> to vector<192x188xf32>
    %29 = vector.extract_strided_slice %27 {offsets = [0, 4], sizes = [192, 188], strides = [1, 1]} : vector<192x192xf32> to vector<192x188xf32>
    %30 = arith.maximumf %28, %29 : vector<192x188xf32>
    %31 = arith.truncf %30 : vector<192x188xf32> to vector<192x188xbf16>
    %c0_20 = arith.constant 0 : index
    %c0_21 = arith.constant 0 : index
    %32 = vector.load %arg6[%c0_20, %c0_21] : memref<188x96xbf16, #tpu.memory_space<vmem>>, vector<188x96xbf16>
    %cst_22 = arith.constant dense<0.000000e+00> : vector<192x96xf32>
    %33 = tpu.matmul %31, %32, %cst_22 {dimension_numbers = #tpu.dot_dimension_numbers<[1], [0], [0], [1], [0, 0, 1, 1], [], []>} : vector<192x188xbf16>, vector<188x96xbf16>, vector<192x96xf32> -> vector<192x96xf32>
    %34 = vector.extract_strided_slice %33 {offsets = [0, 0], sizes = [190, 96], strides = [1, 1]} : vector<192x96xf32> to vector<190x96xf32>
    %35 = arith.truncf %34 : vector<190x96xf32> to vector<190x96xbf16>
    %c0_23 = arith.constant 0 : index
    %c0_24 = arith.constant 0 : index
    %c0_25 = arith.constant 0 : index
    %36 = vector.load %arg7[%c0_23, %c0_24, %c0_25] : memref<3x96x176xbf16, #tpu.memory_space<vmem>>, vector<1x96x176xbf16>
    %37 = vector.shape_cast %36 : vector<1x96x176xbf16> to vector<96x176xbf16>
    %cst_26 = arith.constant dense<0.000000e+00> : vector<190x176xf32>
    %38 = tpu.matmul %35, %37, %cst_26 {dimension_numbers = #tpu.dot_dimension_numbers<[1], [0], [0], [1], [0, 0, 1, 1], [], []>} : vector<190x96xbf16>, vector<96x176xbf16>, vector<190x176xf32> -> vector<190x176xf32>
    %39 = vector.extract_strided_slice %33 {offsets = [1, 0], sizes = [190, 96], strides = [1, 1]} : vector<192x96xf32> to vector<190x96xf32>
    %40 = arith.truncf %39 : vector<190x96xf32> to vector<190x96xbf16>
    %c1_27 = arith.constant 1 : index
    %c0_28 = arith.constant 0 : index
    %c0_29 = arith.constant 0 : index
    %41 = vector.load %arg7[%c1_27, %c0_28, %c0_29] : memref<3x96x176xbf16, #tpu.memory_space<vmem>>, vector<1x96x176xbf16>
    %42 = vector.shape_cast %41 : vector<1x96x176xbf16> to vector<96x176xbf16>
    %cst_30 = arith.constant dense<0.000000e+00> : vector<190x176xf32>
    %43 = tpu.matmul %40, %42, %cst_30 {dimension_numbers = #tpu.dot_dimension_numbers<[1], [0], [0], [1], [0, 0, 1, 1], [], []>} : vector<190x96xbf16>, vector<96x176xbf16>, vector<190x176xf32> -> vector<190x176xf32>
    %44 = arith.addf %38, %43 : vector<190x176xf32>
    %45 = vector.extract_strided_slice %33 {offsets = [2, 0], sizes = [190, 96], strides = [1, 1]} : vector<192x96xf32> to vector<190x96xf32>
    %46 = arith.truncf %45 : vector<190x96xf32> to vector<190x96xbf16>
    %c2_31 = arith.constant 2 : index
    %c0_32 = arith.constant 0 : index
    %c0_33 = arith.constant 0 : index
    %47 = vector.load %arg7[%c2_31, %c0_32, %c0_33] : memref<3x96x176xbf16, #tpu.memory_space<vmem>>, vector<1x96x176xbf16>
    %48 = vector.shape_cast %47 : vector<1x96x176xbf16> to vector<96x176xbf16>
    %cst_34 = arith.constant dense<0.000000e+00> : vector<190x176xf32>
    %49 = tpu.matmul %46, %48, %cst_34 {dimension_numbers = #tpu.dot_dimension_numbers<[1], [0], [0], [1], [0, 0, 1, 1], [], []>} : vector<190x96xbf16>, vector<96x176xbf16>, vector<190x176xf32> -> vector<190x176xf32>
    %50 = arith.addf %44, %49 : vector<190x176xf32>
    %c0_35 = arith.constant 0 : index
    %c0_36 = arith.constant 0 : index
    %51 = vector.load %arg8[%c0_35, %c0_36] : memref<1x176xf32, #tpu.memory_space<vmem>>, vector<1x176xf32>
    %52 = vector.broadcast %51 : vector<1x176xf32> to vector<190x176xf32>
    %53 = arith.addf %50, %52 : vector<190x176xf32>
    %cst_37 = arith.constant 0.000000e+00 : f32
    %54 = vector.broadcast %cst_37 : f32 to vector<190x176xf32>
    %55 = arith.maximumf %53, %54 : vector<190x176xf32>
    %56 = vector.extract_strided_slice %55 {offsets = [0, 0], sizes = [189, 176], strides = [1, 1]} : vector<190x176xf32> to vector<189x176xf32>
    %57 = vector.extract_strided_slice %55 {offsets = [1, 0], sizes = [189, 176], strides = [1, 1]} : vector<190x176xf32> to vector<189x176xf32>
    %58 = arith.maximumf %56, %57 : vector<189x176xf32>
    %c0_38 = arith.constant 0 : index
    %c0_39 = arith.constant 0 : index
    %59 = vector.load %arg9[%c0_38, %c0_39] : memref<88x189xbf16, #tpu.memory_space<vmem>>, vector<88x189xbf16>
    %60 = arith.truncf %58 : vector<189x176xf32> to vector<189x176xbf16>
    %cst_40 = arith.constant dense<0.000000e+00> : vector<88x176xf32>
    %61 = tpu.matmul %59, %60, %cst_40 {dimension_numbers = #tpu.dot_dimension_numbers<[1], [0], [0], [1], [0, 0, 1, 1], [], []>} : vector<88x189xbf16>, vector<189x176xbf16>, vector<88x176xf32> -> vector<88x176xf32>
    %62 = vector.extract_strided_slice %61 {offsets = [0, 0], sizes = [88, 168], strides = [1, 1]} : vector<88x176xf32> to vector<88x168xf32>
    %63 = vector.extract_strided_slice %61 {offsets = [0, 8], sizes = [88, 168], strides = [1, 1]} : vector<88x176xf32> to vector<88x168xf32>
    %64 = arith.maximumf %62, %63 : vector<88x168xf32>
    %65 = arith.truncf %64 : vector<88x168xf32> to vector<88x168xbf16>
    %c0_41 = arith.constant 0 : index
    %c0_42 = arith.constant 0 : index
    %66 = vector.load %arg10[%c0_41, %c0_42] : memref<168x88xbf16, #tpu.memory_space<vmem>>, vector<168x88xbf16>
    %cst_43 = arith.constant dense<0.000000e+00> : vector<88x88xf32>
    %67 = tpu.matmul %65, %66, %cst_43 {dimension_numbers = #tpu.dot_dimension_numbers<[1], [0], [0], [1], [0, 0, 1, 1], [], []>} : vector<88x168xbf16>, vector<168x88xbf16>, vector<88x88xf32> -> vector<88x88xf32>
    %68 = vector.extract_strided_slice %67 {offsets = [0, 0], sizes = [86, 88], strides = [1, 1]} : vector<88x88xf32> to vector<86x88xf32>
    %69 = arith.truncf %68 : vector<86x88xf32> to vector<86x88xbf16>
    %c0_44 = arith.constant 0 : index
    %c0_45 = arith.constant 0 : index
    %c0_46 = arith.constant 0 : index
    %70 = vector.load %arg11[%c0_44, %c0_45, %c0_46] : memref<3x88x144xbf16, #tpu.memory_space<vmem>>, vector<1x88x144xbf16>
    %71 = vector.shape_cast %70 : vector<1x88x144xbf16> to vector<88x144xbf16>
    %cst_47 = arith.constant dense<0.000000e+00> : vector<86x144xf32>
    %72 = tpu.matmul %69, %71, %cst_47 {dimension_numbers = #tpu.dot_dimension_numbers<[1], [0], [0], [1], [0, 0, 1, 1], [], []>} : vector<86x88xbf16>, vector<88x144xbf16>, vector<86x144xf32> -> vector<86x144xf32>
    %73 = vector.extract_strided_slice %67 {offsets = [1, 0], sizes = [86, 88], strides = [1, 1]} : vector<88x88xf32> to vector<86x88xf32>
    %74 = arith.truncf %73 : vector<86x88xf32> to vector<86x88xbf16>
    %c1_48 = arith.constant 1 : index
    %c0_49 = arith.constant 0 : index
    %c0_50 = arith.constant 0 : index
    %75 = vector.load %arg11[%c1_48, %c0_49, %c0_50] : memref<3x88x144xbf16, #tpu.memory_space<vmem>>, vector<1x88x144xbf16>
    %76 = vector.shape_cast %75 : vector<1x88x144xbf16> to vector<88x144xbf16>
    %cst_51 = arith.constant dense<0.000000e+00> : vector<86x144xf32>
    %77 = tpu.matmul %74, %76, %cst_51 {dimension_numbers = #tpu.dot_dimension_numbers<[1], [0], [0], [1], [0, 0, 1, 1], [], []>} : vector<86x88xbf16>, vector<88x144xbf16>, vector<86x144xf32> -> vector<86x144xf32>
    %78 = arith.addf %72, %77 : vector<86x144xf32>
    %79 = vector.extract_strided_slice %67 {offsets = [2, 0], sizes = [86, 88], strides = [1, 1]} : vector<88x88xf32> to vector<86x88xf32>
    %80 = arith.truncf %79 : vector<86x88xf32> to vector<86x88xbf16>
    %c2_52 = arith.constant 2 : index
    %c0_53 = arith.constant 0 : index
    %c0_54 = arith.constant 0 : index
    %81 = vector.load %arg11[%c2_52, %c0_53, %c0_54] : memref<3x88x144xbf16, #tpu.memory_space<vmem>>, vector<1x88x144xbf16>
    %82 = vector.shape_cast %81 : vector<1x88x144xbf16> to vector<88x144xbf16>
    %cst_55 = arith.constant dense<0.000000e+00> : vector<86x144xf32>
    %83 = tpu.matmul %80, %82, %cst_55 {dimension_numbers = #tpu.dot_dimension_numbers<[1], [0], [0], [1], [0, 0, 1, 1], [], []>} : vector<86x88xbf16>, vector<88x144xbf16>, vector<86x144xf32> -> vector<86x144xf32>
    %84 = arith.addf %78, %83 : vector<86x144xf32>
    %c0_56 = arith.constant 0 : index
    %c0_57 = arith.constant 0 : index
    %85 = vector.load %arg12[%c0_56, %c0_57] : memref<1x144xf32, #tpu.memory_space<vmem>>, vector<1x144xf32>
    %86 = vector.broadcast %85 : vector<1x144xf32> to vector<86x144xf32>
    %87 = arith.addf %84, %86 : vector<86x144xf32>
    %cst_58 = arith.constant 0.000000e+00 : f32
    %88 = vector.broadcast %cst_58 : f32 to vector<86x144xf32>
    %89 = arith.maximumf %87, %88 : vector<86x144xf32>
    %90 = vector.extract_strided_slice %89 {offsets = [0, 0], sizes = [85, 144], strides = [1, 1]} : vector<86x144xf32> to vector<85x144xf32>
    %91 = vector.extract_strided_slice %89 {offsets = [1, 0], sizes = [85, 144], strides = [1, 1]} : vector<86x144xf32> to vector<85x144xf32>
    %92 = arith.maximumf %90, %91 : vector<85x144xf32>
    %c0_59 = arith.constant 0 : index
    %c0_60 = arith.constant 0 : index
    %93 = vector.load %arg13[%c0_59, %c0_60] : memref<32x85xbf16, #tpu.memory_space<vmem>>, vector<32x85xbf16>
    %94 = arith.truncf %92 : vector<85x144xf32> to vector<85x144xbf16>
    %cst_61 = arith.constant dense<0.000000e+00> : vector<32x144xf32>
    %95 = tpu.matmul %93, %94, %cst_61 {dimension_numbers = #tpu.dot_dimension_numbers<[1], [0], [0], [1], [0, 0, 1, 1], [], []>} : vector<32x85xbf16>, vector<85x144xbf16>, vector<32x144xf32> -> vector<32x144xf32>
    %96 = vector.extract_strided_slice %95 {offsets = [0, 0], sizes = [32, 128], strides = [1, 1]} : vector<32x144xf32> to vector<32x128xf32>
    %97 = vector.extract_strided_slice %95 {offsets = [0, 16], sizes = [32, 128], strides = [1, 1]} : vector<32x144xf32> to vector<32x128xf32>
    %98 = arith.maximumf %96, %97 : vector<32x128xf32>
    %99 = arith.truncf %98 : vector<32x128xf32> to vector<32x128xbf16>
    %c0_62 = arith.constant 0 : index
    %c0_63 = arith.constant 0 : index
    %100 = vector.load %arg14[%c0_62, %c0_63] : memref<128x64xbf16, #tpu.memory_space<vmem>>, vector<128x64xbf16>
    %cst_64 = arith.constant dense<0.000000e+00> : vector<32x64xf32>
    %101 = tpu.matmul %99, %100, %cst_64 {dimension_numbers = #tpu.dot_dimension_numbers<[1], [0], [0], [1], [0, 0, 1, 1], [], []>} : vector<32x128xbf16>, vector<128x64xbf16>, vector<32x64xf32> -> vector<32x64xf32>
    %102 = vector.extract_strided_slice %101 {offsets = [0, 0], sizes = [30, 64], strides = [1, 1]} : vector<32x64xf32> to vector<30x64xf32>
    %103 = arith.truncf %102 : vector<30x64xf32> to vector<30x64xbf16>
    %c0_65 = arith.constant 0 : index
    %c0_66 = arith.constant 0 : index
    %c0_67 = arith.constant 0 : index
    %104 = vector.load %arg15[%c0_65, %c0_66, %c0_67] : memref<3x64x64xbf16, #tpu.memory_space<vmem>>, vector<1x64x64xbf16>
    %105 = vector.shape_cast %104 : vector<1x64x64xbf16> to vector<64x64xbf16>
    %cst_68 = arith.constant dense<0.000000e+00> : vector<30x64xf32>
    %106 = tpu.matmul %103, %105, %cst_68 {dimension_numbers = #tpu.dot_dimension_numbers<[1], [0], [0], [1], [0, 0, 1, 1], [], []>} : vector<30x64xbf16>, vector<64x64xbf16>, vector<30x64xf32> -> vector<30x64xf32>
    %107 = vector.extract_strided_slice %101 {offsets = [1, 0], sizes = [30, 64], strides = [1, 1]} : vector<32x64xf32> to vector<30x64xf32>
    %108 = arith.truncf %107 : vector<30x64xf32> to vector<30x64xbf16>
    %c1_69 = arith.constant 1 : index
    %c0_70 = arith.constant 0 : index
    %c0_71 = arith.constant 0 : index
    %109 = vector.load %arg15[%c1_69, %c0_70, %c0_71] : memref<3x64x64xbf16, #tpu.memory_space<vmem>>, vector<1x64x64xbf16>
    %110 = vector.shape_cast %109 : vector<1x64x64xbf16> to vector<64x64xbf16>
    %cst_72 = arith.constant dense<0.000000e+00> : vector<30x64xf32>
    %111 = tpu.matmul %108, %110, %cst_72 {dimension_numbers = #tpu.dot_dimension_numbers<[1], [0], [0], [1], [0, 0, 1, 1], [], []>} : vector<30x64xbf16>, vector<64x64xbf16>, vector<30x64xf32> -> vector<30x64xf32>
    %112 = arith.addf %106, %111 : vector<30x64xf32>
    %113 = vector.extract_strided_slice %101 {offsets = [2, 0], sizes = [30, 64], strides = [1, 1]} : vector<32x64xf32> to vector<30x64xf32>
    %114 = arith.truncf %113 : vector<30x64xf32> to vector<30x64xbf16>
    %c2_73 = arith.constant 2 : index
    %c0_74 = arith.constant 0 : index
    %c0_75 = arith.constant 0 : index
    %115 = vector.load %arg15[%c2_73, %c0_74, %c0_75] : memref<3x64x64xbf16, #tpu.memory_space<vmem>>, vector<1x64x64xbf16>
    %116 = vector.shape_cast %115 : vector<1x64x64xbf16> to vector<64x64xbf16>
    %cst_76 = arith.constant dense<0.000000e+00> : vector<30x64xf32>
    %117 = tpu.matmul %114, %116, %cst_76 {dimension_numbers = #tpu.dot_dimension_numbers<[1], [0], [0], [1], [0, 0, 1, 1], [], []>} : vector<30x64xbf16>, vector<64x64xbf16>, vector<30x64xf32> -> vector<30x64xf32>
    %118 = arith.addf %112, %117 : vector<30x64xf32>
    %c0_77 = arith.constant 0 : index
    %c0_78 = arith.constant 0 : index
    %119 = vector.load %arg16[%c0_77, %c0_78] : memref<1x64xf32, #tpu.memory_space<vmem>>, vector<1x64xf32>
    %120 = vector.broadcast %119 : vector<1x64xf32> to vector<30x64xf32>
    %121 = arith.addf %118, %120 : vector<30x64xf32>
    %cst_79 = arith.constant 0.000000e+00 : f32
    %122 = vector.broadcast %cst_79 : f32 to vector<30x64xf32>
    %123 = arith.maximumf %121, %122 : vector<30x64xf32>
    %124 = vector.extract_strided_slice %123 {offsets = [0, 0], sizes = [29, 64], strides = [1, 1]} : vector<30x64xf32> to vector<29x64xf32>
    %125 = vector.extract_strided_slice %123 {offsets = [1, 0], sizes = [29, 64], strides = [1, 1]} : vector<30x64xf32> to vector<29x64xf32>
    %126 = arith.maximumf %124, %125 : vector<29x64xf32>
    %c0_80 = arith.constant 0 : index
    %c0_81 = arith.constant 0 : index
    %127 = vector.load %arg17[%c0_80, %c0_81] : memref<8x29xbf16, #tpu.memory_space<vmem>>, vector<8x29xbf16>
    %128 = arith.truncf %126 : vector<29x64xf32> to vector<29x64xbf16>
    %cst_82 = arith.constant dense<0.000000e+00> : vector<8x64xf32>
    %129 = tpu.matmul %127, %128, %cst_82 {dimension_numbers = #tpu.dot_dimension_numbers<[1], [0], [0], [1], [0, 0, 1, 1], [], []>} : vector<8x29xbf16>, vector<29x64xbf16>, vector<8x64xf32> -> vector<8x64xf32>
    %130 = vector.extract_strided_slice %129 {offsets = [0, 0], sizes = [8, 32], strides = [1, 1]} : vector<8x64xf32> to vector<8x32xf32>
    %131 = vector.extract_strided_slice %129 {offsets = [0, 32], sizes = [8, 32], strides = [1, 1]} : vector<8x64xf32> to vector<8x32xf32>
    %132 = arith.maximumf %130, %131 : vector<8x32xf32>
    %133 = arith.truncf %132 : vector<8x32xf32> to vector<8x32xbf16>
    %c0_83 = arith.constant 0 : index
    %c0_84 = arith.constant 0 : index
    %134 = vector.load %arg18[%c0_83, %c0_84] : memref<32x32xbf16, #tpu.memory_space<vmem>>, vector<32x32xbf16>
    %cst_85 = arith.constant dense<0.000000e+00> : vector<8x32xf32>
    %135 = tpu.matmul %133, %134, %cst_85 {dimension_numbers = #tpu.dot_dimension_numbers<[1], [0], [0], [1], [0, 0, 1, 1], [], []>} : vector<8x32xbf16>, vector<32x32xbf16>, vector<8x32xf32> -> vector<8x32xf32>
    %136 = arith.truncf %135 : vector<8x32xf32> to vector<8x32xbf16>
    %c0_86 = arith.constant 0 : index
    %c0_87 = arith.constant 0 : index
    %137 = vector.load %arg19[%c0_86, %c0_87] : memref<32x32xbf16, #tpu.memory_space<vmem>>, vector<32x32xbf16>
    %cst_88 = arith.constant dense<0.000000e+00> : vector<8x32xf32>
    %138 = tpu.matmul %136, %137, %cst_88 {dimension_numbers = #tpu.dot_dimension_numbers<[1], [0], [0], [1], [0, 0, 1, 1], [], []>} : vector<8x32xbf16>, vector<32x32xbf16>, vector<8x32xf32> -> vector<8x32xf32>
    %c0_89 = arith.constant 0 : index
    %c0_90 = arith.constant 0 : index
    %139 = vector.load %arg20[%c0_89, %c0_90] : memref<1x32xf32, #tpu.memory_space<vmem>>, vector<1x32xf32>
    %140 = vector.broadcast %139 : vector<1x32xf32> to vector<8x32xf32>
    %141 = arith.addf %138, %140 : vector<8x32xf32>
    %cst_91 = arith.constant 0.000000e+00 : f32
    %142 = vector.broadcast %cst_91 : f32 to vector<8x32xf32>
    %143 = arith.maximumf %141, %142 : vector<8x32xf32>
    %c0_92 = arith.constant 0 : index
    %c0_93 = arith.constant 0 : index
    %144 = vector.load %arg2[%c0_92, %c0_93] : memref<8x32xf32, #tpu.memory_space<vmem>>, vector<8x32xf32>
    %145 = arith.mulf %143, %144 : vector<8x32xf32>
    %146 = arith.truncf %145 : vector<8x32xf32> to vector<8x32xbf16>
    %c0_94 = arith.constant 0 : index
    %c0_95 = arith.constant 0 : index
    %147 = vector.load %arg21[%c0_94, %c0_95] : memref<32x2xbf16, #tpu.memory_space<vmem>>, vector<32x2xbf16>
    %cst_96 = arith.constant dense<0.000000e+00> : vector<8x2xf32>
    %148 = tpu.matmul %146, %147, %cst_96 {dimension_numbers = #tpu.dot_dimension_numbers<[1], [0], [0], [1], [0, 0, 1, 1], [], []>} : vector<8x32xbf16>, vector<32x2xbf16>, vector<8x2xf32> -> vector<8x2xf32>
    %c0_97 = arith.constant 0 : index
    %c0_98 = arith.constant 0 : index
    %149 = vector.load %arg22[%c0_97, %c0_98] : memref<1x2xf32, #tpu.memory_space<vmem>>, vector<1x2xf32>
    %150 = vector.broadcast %149 : vector<1x2xf32> to vector<8x2xf32>
    %151 = arith.addf %148, %150 : vector<8x2xf32>
    %cst_99 = arith.constant dense<0xFF800000> : vector<8xf32>
    %152 = vector.multi_reduction <maximumf>, %151, %cst_99 [1] : vector<8x2xf32> to vector<8xf32>
    %153 = vector.shape_cast %152 : vector<8xf32> to vector<8x1xf32>
    %154 = vector.broadcast %153 : vector<8x1xf32> to vector<8x2xf32>
    %155 = arith.subf %151, %154 : vector<8x2xf32>
    %156 = math.exp %155 : vector<8x2xf32>
    %cst_100 = arith.constant dense<0.000000e+00> : vector<8xf32>
    %157 = vector.multi_reduction <add>, %156, %cst_100 [1] : vector<8x2xf32> to vector<8xf32>
    %158 = vector.shape_cast %157 : vector<8xf32> to vector<8x1xf32>
    %159 = math.log %158 : vector<8x1xf32>
    %160 = arith.addf %159, %153 : vector<8x1xf32>
    %161 = vector.broadcast %160 : vector<8x1xf32> to vector<8x2xf32>
    %162 = arith.subf %151, %161 : vector<8x2xf32>
    %c0_101 = arith.constant 0 : index
    %c0_102 = arith.constant 0 : index
    %163 = vector.load %arg23[%c0_101, %c0_102] : memref<8x2xf32, #tpu.memory_space<vmem>>, vector<8x2xf32>
    tpu.vector_store %arg23[%c0_101, %c0_102], %162 {strides = array<i32>} : memref<8x2xf32, #tpu.memory_space<vmem>>, vector<8x2xf32>,
    return
  }
  func.func @transform_0(%arg0: i32) -> (i32, i32) {
    %c0_i32 = arith.constant 0 : i32
    %c0_i32_0 = arith.constant 0 : i32
    return %arg0, %c0_i32 : i32, i32
  }
  func.func @transform_1(%arg0: i32) -> (i32, i32) {
    %c0_i32 = arith.constant 0 : i32
    %c0_i32_0 = arith.constant 0 : i32
    return %arg0, %c0_i32 : i32, i32
  }
  func.func @transform_2(%arg0: i32) -> (i32, i32, i32) {
    %c0_i32 = arith.constant 0 : i32
    %c0_i32_0 = arith.constant 0 : i32
    %c0_i32_1 = arith.constant 0 : i32
    %c0_i32_2 = arith.constant 0 : i32
    return %c0_i32, %c0_i32_0, %c0_i32_1 : i32, i32, i32
  }
  func.func @transform_3(%arg0: i32) -> (i32, i32) {
    %c0_i32 = arith.constant 0 : i32
    %c0_i32_0 = arith.constant 0 : i32
    %c0_i32_1 = arith.constant 0 : i32
    return %c0_i32, %c0_i32_0 : i32, i32
  }
  func.func @transform_4(%arg0: i32) -> (i32, i32) {
    %c0_i32 = arith.constant 0 : i32
    %c0_i32_0 = arith.constant 0 : i32
    %c0_i32_1 = arith.constant 0 : i32
    return %c0_i32, %c0_i32_0 : i32, i32
  }
  func.func @transform_5(%arg0: i32) -> (i32, i32) {
    %c0_i32 = arith.constant 0 : i32
    %c0_i32_0 = arith.constant 0 : i32
    %c0_i32_1 = arith.constant 0 : i32
    return %c0_i32, %c0_i32_0 : i32, i32
  }
  func.func @transform_6(%arg0: i32) -> (i32, i32, i32) {
    %c0_i32 = arith.constant 0 : i32
    %c0_i32_0 = arith.constant 0 : i32
    %c0_i32_1 = arith.constant 0 : i32
    %c0_i32_2 = arith.constant 0 : i32
    return %c0_i32, %c0_i32_0, %c0_i32_1 : i32, i32, i32
  }
  func.func @transform_7(%arg0: i32) -> (i32, i32) {
    %c0_i32 = arith.constant 0 : i32
    %c0_i32_0 = arith.constant 0 : i32
    %c0_i32_1 = arith.constant 0 : i32
    return %c0_i32, %c0_i32_0 : i32, i32
  }
  func.func @transform_8(%arg0: i32) -> (i32, i32) {
    %c0_i32 = arith.constant 0 : i32
    %c0_i32_0 = arith.constant 0 : i32
    %c0_i32_1 = arith.constant 0 : i32
    return %c0_i32, %c0_i32_0 : i32, i32
  }
  func.func @transform_9(%arg0: i32) -> (i32, i32) {
    %c0_i32 = arith.constant 0 : i32
    %c0_i32_0 = arith.constant 0 : i32
    %c0_i32_1 = arith.constant 0 : i32
    return %c0_i32, %c0_i32_0 : i32, i32
  }
  func.func @transform_10(%arg0: i32) -> (i32, i32, i32) {
    %c0_i32 = arith.constant 0 : i32
    %c0_i32_0 = arith.constant 0 : i32
    %c0_i32_1 = arith.constant 0 : i32
    %c0_i32_2 = arith.constant 0 : i32
    return %c0_i32, %c0_i32_0, %c0_i32_1 : i32, i32, i32
  }
  func.func @transform_11(%arg0: i32) -> (i32, i32) {
    %c0_i32 = arith.constant 0 : i32
    %c0_i32_0 = arith.constant 0 : i32
    %c0_i32_1 = arith.constant 0 : i32
    return %c0_i32, %c0_i32_0 : i32, i32
  }
  func.func @transform_12(%arg0: i32) -> (i32, i32) {
    %c0_i32 = arith.constant 0 : i32
    %c0_i32_0 = arith.constant 0 : i32
    %c0_i32_1 = arith.constant 0 : i32
    return %c0_i32, %c0_i32_0 : i32, i32
  }
  func.func @transform_13(%arg0: i32) -> (i32, i32) {
    %c0_i32 = arith.constant 0 : i32
    %c0_i32_0 = arith.constant 0 : i32
    %c0_i32_1 = arith.constant 0 : i32
    return %c0_i32, %c0_i32_0 : i32, i32
  }
  func.func @transform_14(%arg0: i32) -> (i32, i32, i32) {
    %c0_i32 = arith.constant 0 : i32
    %c0_i32_0 = arith.constant 0 : i32
    %c0_i32_1 = arith.constant 0 : i32
    %c0_i32_2 = arith.constant 0 : i32
    return %c0_i32, %c0_i32_0, %c0_i32_1 : i32, i32, i32
  }
  func.func @transform_15(%arg0: i32) -> (i32, i32) {
    %c0_i32 = arith.constant 0 : i32
    %c0_i32_0 = arith.constant 0 : i32
    %c0_i32_1 = arith.constant 0 : i32
    return %c0_i32, %c0_i32_0 : i32, i32
  }
  func.func @transform_16(%arg0: i32) -> (i32, i32) {
    %c0_i32 = arith.constant 0 : i32
    %c0_i32_0 = arith.constant 0 : i32
    %c0_i32_1 = arith.constant 0 : i32
    return %c0_i32, %c0_i32_0 : i32, i32
  }
  func.func @transform_17(%arg0: i32) -> (i32, i32) {
    %c0_i32 = arith.constant 0 : i32
    %c0_i32_0 = arith.constant 0 : i32
    %c0_i32_1 = arith.constant 0 : i32
    return %c0_i32, %c0_i32_0 : i32, i32
  }
  func.func @transform_18(%arg0: i32) -> (i32, i32) {
    %c0_i32 = arith.constant 0 : i32
    %c0_i32_0 = arith.constant 0 : i32
    %c0_i32_1 = arith.constant 0 : i32
    return %c0_i32, %c0_i32_0 : i32, i32
  }
  func.func @transform_19(%arg0: i32) -> (i32, i32) {
    %c0_i32 = arith.constant 0 : i32
    %c0_i32_0 = arith.constant 0 : i32
    %c0_i32_1 = arith.constant 0 : i32
    return %c0_i32, %c0_i32_0 : i32, i32
  }
  func.func @transform_20(%arg0: i32) -> (i32, i32) {
    %c0_i32 = arith.constant 0 : i32
    %c0_i32_0 = arith.constant 0 : i32
    %c0_i32_1 = arith.constant 0 : i32
    return %c0_i32, %c0_i32_0 : i32, i32
  }
  func.func @transform_21(%arg0: i32) -> (i32, i32) {
    %c0_i32 = arith.constant 0 : i32
    %c0_i32_0 = arith.constant 0 : i32
    %c0_i32_1 = arith.constant 0 : i32
    return %c0_i32, %c0_i32_0 : i32, i32
  }
  func.func @transform_22(%arg0: i32) -> (i32, i32) {
    %c0_i32 = arith.constant 0 : i32
    %c0_i32_0 = arith.constant 0 : i32
    return %arg0, %c0_i32 : i32, i32
  }
}

</mosaic_0001>

<bundles_post_ra>
// kernel: forward.1
= control target key start
LH: loop header
LB: loop body
LE: loop exit
PB: predicated region body
PF: predicated region fallthrough
CT: control target
= control target key end

     0   :  { %s12624_s0 = inlined_call_operand.vmem [shape: f32[800,150], index: 0, kind: input, shape index: {}]   ;;  %s12625_s1 = inlined_call_operand.vmem [shape: f32[16,32], index: 1, kind: input, shape index: {}]   ;;  %s12626_s2 = inlined_call_operand.vmem [shape: bf16[3,150,192], index: 2, kind: input, shape index: {}]   ;;  %s12627_s3 = inlined_call_operand.vmem [shape: f32[1,192], index: 3, kind: input, shape index: {}]   ;;  %s12628_s4 = inlined_call_operand.vmem [shape: bf16[192,397], index: 4, kind: input, shape index: {}]   ;;  %s12629_s5 = inlined_call_operand.vmem [shape: bf16[188,96], index: 5, kind: input, shape index: {}]   ;;  %s12630_s6 = inlined_call_operand.vmem [shape: bf16[3,96,176], index: 6, kind: input, shape index: {}]   ;;  %s12631_s7 = inlined_call_operand.vmem [shape: f32[1,176], index: 7, kind: input, shape index: {}]   ;;  %s12632_s8 = inlined_call_operand.vmem [shape: bf16[88,189], index: 8, kind: input, shape index: {}]   ;;  %s12633_s9 = inlined_call_operand.vmem [shape: bf16[168,88], index: 9, kind: input, shape index: {}]   ;;  %s12634_s10 = inlined_call_operand.vmem [shape: bf16[3,88,144], index: 10, kind: input, shape index: {}]   ;;  %s12635_s11 = inlined_call_operand.vmem [shape: f32[1,144], index: 11, kind: input, shape index: {}]   ;;  %s12636_s12 = inlined_call_operand.vmem [shape: bf16[32,85], index: 12, kind: input, shape index: {}]   ;;  %s12637_s13 = inlined_call_operand.vmem [shape: bf16[128,64], index: 13, kind: input, shape index: {}]   ;;  %s12638_s14 = inlined_call_operand.vmem [shape: bf16[3,64,64], index: 14, kind: input, shape index: {}]   ;;  %s12639_s15 = inlined_call_operand.vmem [shape: f32[1,64], index: 15, kind: input, shape index: {}]   ;;  %s12640_s16 = inlined_call_operand.vmem [shape: bf16[8,29], index: 16, kind: input, shape index: {}]   ;;  %s12641_s17 = inlined_call_operand.vmem [shape: bf16[32,32], index: 17, kind: input, shape index: {}]   ;;  %s12642_s18 = inlined_call_operand.vmem [shape: bf16[32,32], index: 18, kind: input, shape index: {}]   ;;  %s12643_s19 = inlined_call_operand.vmem [shape: f32[1,32], index: 19, kind: input, shape index: {}]   ;;  %s12644_s20 = inlined_call_operand.vmem [shape: bf16[32,2], index: 20, kind: input, shape index: {}]   ;;  %s12645_s21 = inlined_call_operand.vmem [shape: f32[1,2], index: 21, kind: input, shape index: {}]   ;;  %s12646_s22 = inlined_call_operand.vmem [shape: f32[16,2], index: 22, kind: output, shape index: {}]  }
   0x1   :  { %12667 = sst [smem:[#allocation6_spill]] %s12624_s0 }
   0x2   :  { %12668 = sst [smem:[#allocation7_spill]] %s12625_s1 }
   0x3   :  { %12669 = sst [smem:[#allocation8_spill]] %s12626_s2 }
   0x4   :  { %12670 = sst [smem:[#allocation9_spill]] %s12627_s3  ;;  %s10198_s3 = smov 0  }
   0x5   :  { %12671 = sst [smem:[#allocation10_spill]] %s12628_s4 }
   0x6   :  { %12672 = sst [smem:[#allocation11_spill]] %s12629_s5 }
   0x7   :  { %12673 = sst [smem:[#allocation12_spill]] %s12630_s6 }
   0x8 LB: > { %s10204_s28 = sadd.s32 4294967295, %s10073_s3   ;;  %p8461_p0 = scmp.ge.s32.totalorder %s10073_s3, 1  ;;  %s10073_s3 = sphi %s10198_s3, %s32_s3  }
   0x9   : > { %p623_p1 = scmp.lt.s32.totalorder %s10073_s3, 3 }
   0xb   : > { %p624_p2 = pnand %p8461_p0, %p623_p1 }
   0xd   : > { %627 = sbr.rel (%p624_p2) target bundleno = 5074 (0x13d2), region = 108 }
  0x14   : > { %s12674_s4 = sld [smem:[#allocation8_spill]]  ;;  %s689_s0 = smul.u32 50, %s10204_s28  ;;  %vm902_vm0 = vsmask.f32 7424  ;;  %vm1421_vm1 = vcmask 179200   ;;  %vm1497_vm2 = vcmask 1042432  }
  0x15   : > { %s12675_s6 = sld [smem:[#allocation6_spill]]  ;;  %vm2301_vm3 = vcmask 1046528   ;;  %s12684_s2 = sld [smem:[#allocation9_spill]]  ;;  %vm4058_vm4 = vcmask 1045504   ;;  %vm4021_vm5 = vcmask 105472   ;;  %vm4517_vm6 = vcmask 1014784  }
  0x16   : > { %p690_p3 = scmp.lt.s32.totalorder %s689_s0, 99  ;;  %s12686_s30 = sld [smem:[#allocation10_spill]]  ;;  %vm4757_vm7 = vcmask 490496   ;;  %vm5118_vm8 = vcmask 785408   ;;  %vm6322_vm9 = vcmask 498688   ;;  %vm6675_vm10 = vcmask 1043456  }
  0x17   : > { %s10077_s23 = smov 124   ;;  %s12689_s24 = sld [smem:[#allocation12_spill]]  ;;  %vm6504_vm11 = vcmask 982016   ;;  %vm6656_vm12 = vcmask 326656   ;;  %vm6890_vm13 = vcmask 719872   ;;  %vm7588_vm14 = vcmask 1041408  }
  0x18   : > { %s12696_s0 = smov (!%p690_p3, %s689_s0), 99  ;;  %vm7581_vm15 = vcmask 695296   ;;  %s10082_s5 = smov 96  }
  0x19   : > { %s8997_s27 = sshll.u32 %s12696_s0, 4  ;;  %p696_p4 = scmp.lt.s32.totalorder %s10204_s28, 1 }
  0x1a   : > { %v9729_v0 = vld [vmem:[%s12674_s4 + $0x9c] ss:$8 sps:$4 sm:$0xff]   ;;  %v9731_v1 = vld [vmem:[%s12674_s4 + $0x98] ss:$8 sps:$4 sm:$0xff]   ;;  %v9732_v2 = vld [vmem:[%s12674_s4 + $0xac] ss:$8 sps:$4 sm:$0xff]  }
  0x1b   : > { %1504 = vmatprep.subr.bf16.mxu0 %v9729_v0  ;;  %v9734_v3 = vld [vmem:[%s12674_s4 + $0xa8] ss:$8 sps:$4 sm:$0xff]   ;;  %v9735_v4 = vld [vmem:[%s12674_s4 + $0xbc] ss:$8 sps:$4 sm:$0xff]   ;;  %v9737_v5 = vld [vmem:[%s12674_s4 + $0xb8] ss:$8 sps:$4 sm:$0xff]   ;;  %s10233_s25 = scalar_lea.vmem %s12675_s6, %s8997_s27 }
  0x1c   : > { %1505 = vmatpush1.bf16.msra.mxu0 %v9731_v1  ;;  %v9738_v6 = vld [vmem:[%s12674_s4 + $0xcc] ss:$8 sps:$4 sm:$0xff]   ;;  %v9740_v7 = vld [vmem:[%s12674_s4 + $0xc8] ss:$8 sps:$4 sm:$0xff]   ;;  %v9741_v8 = vld [vmem:[%s12674_s4 + $0xdc] ss:$8 sps:$4 sm:$0xff]  }
  0x1d   : > { %1506 = vmatprep.subr.bf16.mxu0 %v9732_v2  ;;  %v708_v9 = vld [vmem:[%s10233_s25 + $0x18] sm:$0xff]  ;;  %v710_v10 = vld [vmem:[%s10233_s25 + $0x28] sm:$0xff]  ;;  %v707_v25 = vld [vmem:[%s10233_s25 + $0x10] sm:$0xff]  ;;  %s10079_s27 = smov 112   ;;  %s12698_s28 = smov (!%p696_p4, %s10204_s28), 1 }
  0x1e   : > { %v712_v11 = vld [vmem:[%s10233_s25 + $0x38] sm:$0xff]  ;;  %v875_v12 = vld [vmem:[%s10233_s25 + $0x8] sm:$0xfe]  ;;  %v874_v26 = vld [vmem:[%s10233_s25] sm:$0xfe]  ;;  %s8464_s1 = sshll.u32 %s12698_s28, 3 }
  0x1f   : > { %v10245_v13 = vpack.c.bf16 %v712_v11, %v710_v10  ;;  %v879_v14 = vpack.c.bf16 %v708_v9, %v875_v12  ;;  %v9743_v15 = vld [vmem:[%s12674_s4 + $0xd8] ss:$8 sps:$4 sm:$0xff]   ;;  %v9744_v16 = vld [vmem:[%s12674_s4 + $0xec] ss:$8 sps:$4 sm:$0xff]   ;;  %v9746_v22 = vld [vmem:[%s12674_s4 + $0xe8] ss:$8 sps:$4 sm:$0xff]   ;;  %v878_v29 = vpack.c.bf16 %v707_v25, %v874_v26  ;;  %s703_s6 = scalar_lea.vmem %s12646_s22, %s8464_s1 }
  0x20   : > { %1507 = vmatpush1.bf16.msra.mxu0 %v9734_v3  ;;  %v9747_v23 = vld [vmem:[%s12674_s4 + $0xfc] ss:$8 sps:$4 sm:$0xff]   ;;  %v9749_v28 = vld [vmem:[%s12674_s4 + $0xf8] ss:$8 sps:$4 sm:$0xff]   ;;  %v9750_v30 = vld [vmem:[%s12674_s4 + $0x10c] ss:$8 sps:$4 sm:$0xff]  }
  0x21   : > { %1508 = vmatprep.subr.bf16.mxu0 %v9735_v4  ;;  %v916_v17 = vshrl.u32 %v879_v14, 16  ;;  %v918_v18 = vshll.u32 %v879_v14, 16  ;;  %v923_v19 = vshll.u32 %v10245_v13, 16  ;;  %v709_v31 = vld [vmem:[%s10233_s25 + $0x20] sm:$0xff]  ;;  %v711_v32 = vld [vmem:[%s10233_s25 + $0x30] sm:$0xff]  ;;  %v714_v33 = vld [vmem:[%s10233_s25 + $0x48] sm:$0xff] }
  0x22   : > { %v716_v34 = vld [vmem:[%s10233_s25 + $0x58] sm:$0xff]  ;;  %v9752_v35 = vld [vmem:[%s12674_s4 + $0x108] ss:$8 sps:$4 sm:$0xff]   ;;  %v10277_v36 = vpack.c.bf16 %v711_v32, %v709_v31  ;;  %v906_v37 = vshll.u32 %v878_v29, 16  ;;  %v904_v42 = vshrl.u32 %v878_v29, 16  ;;  %v935_v47 = vshrl.u32 %v10245_v13, 16 }
  0x23   : > { %v920_v20 = vrot.slane %v918_v18, 1  ;;  %v925_v21 = vrot.slane %v923_v19, 1  ;;  %v9753_v38 = vld [vmem:[%s12674_s4 + $0x11c] ss:$8 sps:$4 sm:$0xff]   ;;  %v10282_v39 = vpack.c.bf16 %v716_v34, %v714_v33  ;;  %v8484_v40 = vld [vmem:[%s12674_s4 + $0x128] sm:$0x77] }
  0x24   : > { %1509 = vmatpush1.bf16.msra.mxu0 %v9737_v5  ;;  %v9755_v41 = vld [vmem:[%s12674_s4 + $0x118] ss:$8 sps:$4 sm:$0xff]   ;;  %v908_v43 = vrot.slane %v906_v37, 1  ;;  %v911_v44 = vshll.u32 %v10277_v36, 16  ;;  %v8504_v45 = vcombine.high %v8484_v40, %v8484_v40  ;;  %v8503_v46 = vcombine.low %v8484_v40, %v8484_v40  ;;  %v715_v50 = vld [vmem:[%s10233_s25 + $0x50] sm:$0xff]  ;;  %v718_v51 = vld [vmem:[%s10233_s25 + $0x68] sm:$0xff] }
  0x25   : > { %1510 = vmatprep.subr.bf16.mxu0 %v9738_v6  ;;  %v921_v24 = vor.u32 %v920_v20, %v916_v17  ;;  %v939_v48 = vshll.u32 %v10282_v39, 16  ;;  %v713_v49 = vld [vmem:[%s10233_s25 + $0x40] sm:$0xff]  ;;  %v720_v52 = vld [vmem:[%s10233_s25 + $0x78] sm:$0xff]  ;;  %v937_v57 = vor.u32 %v935_v47, %v925_v21  ;;  %v719_v63 = vld [vmem:[%s10233_s25 + $0x70] sm:$0xff]  ;;  %v927_v1 = vshrl.u32 %v10277_v36, 16  ;;  %s12694_s26 = sld [smem:[#allocation7_spill]] }
  0x26   : > { %v909_v53 = vor.u32 %v908_v43, %v904_v42  ;;  %v913_v54 = vrot.slane %v911_v44, 1  ;;  %v10297_v55 = vpack.c.bf16 %v715_v50, %v713_v49  ;;  %v1499_v56 = vsel %vm1497_vm2, %v8503_v46, 0  ;;  %v9760_v60 = vld [vmem:[%s12674_s4 + $0x4] ss:$8 sps:$4 sm:$0xff]   ;;  %v9758_v61 = vld [vmem:[%s12674_s4] ss:$8 sps:$4 sm:$0xff]  }
  0x27   : > { %v926_v27 = vsel %vm902_vm0, %v921_v24, %v925_v21  ;;  %v941_v58 = vrot.slane %v939_v48, 1  ;;  %v10301_v59 = vpack.c.bf16 %v720_v52, %v718_v51  ;;  %v717_v62 = vld [vmem:[%s10233_s25 + $0x60] sm:$0xff]  ;;  %v951_v4 = vshrl.u32 %v10282_v39, 16  ;;  %v722_v6 = vld [vmem:[%s10233_s25 + $0x88] sm:$0xff]  ;;  %v9761_v12 = vld [vmem:[%s12674_s4 + $0x10] ss:$8 sps:$4 sm:$0xff]  }
  0x28   : > { %1511 = vmatpush1.bf16.msra.mxu0 %v9740_v7  ;;  %8506 = vmatprep.mubr.msk.bf16.mxu0 %vm1421_vm1, %v926_v27  ;;  %v914_v0 = vsel %vm902_vm0, %v909_v53, %v913_v54  ;;  %v931_v2 = vshll.u32 %v10297_v55, 16  ;;  %v724_v7 = vld [vmem:[%s10233_s25 + $0x98] sm:$0xff]  ;;  %v929_v9 = vor.u32 %v927_v1, %v913_v54  ;;  %v10323_v11 = vpack.c.bf16 %v719_v63, %v717_v62  ;;  %v721_v17 = vld [vmem:[%s10233_s25 + $0x80] sm:$0xff]  ;;  %v723_v18 = vld [vmem:[%s10233_s25 + $0x90] sm:$0xff] }
  0x29   : > { %1512 = vmatprep.subr.bf16.mxu0 %v9741_v8  ;;  %v942_v3 = vsel %vm902_vm0, %v937_v57, %v941_v58  ;;  %v955_v5 = vshll.u32 %v10301_v59, 16  ;;  %v9763_v8 = vld [vmem:[%s12674_s4 + $0x14] ss:$8 sps:$4 sm:$0xff]   ;;  %v953_v14 = vor.u32 %v951_v4, %v941_v58  ;;  %v943_v20 = vshrl.u32 %v10297_v55, 16  ;;  %v726_v25 = vld [vmem:[%s10233_s25 + $0xa8] sm:$0xff]  ;;  %v725_v33 = vld [vmem:[%s10233_s25 + $0xa0] sm:$0xff] }
  0x2a   : > { %v933_v10 = vrot.slane %v931_v2, 1  ;;  %v947_v21 = vshll.u32 %v10323_v11, 16  ;;  %v728_v26 = vld [vmem:[%s10233_s25 + $0xb8] sm:$0xff]  ;;  %v10341_v29 = vpack.c.bf16 %v723_v18, %v721_v17  ;;  %v727_v34 = vld [vmem:[%s10233_s25 + $0xb0] sm:$0xff]  ;;  %v959_v37 = vshrl.u32 %v10323_v11, 16  ;;  %v730_v43 = vld [vmem:[%s10233_s25 + $0xc8] sm:$0xff] }
  0x2b   : > { %v10343_v32 = vpack.c.bf16 %v728_v26, %v726_v25  ;;  %v732_v44 = vld [vmem:[%s10233_s25 + $0xd8] sm:$0xff]  ;;  %v10356_v47 = vpack.c.bf16 %v727_v34, %v725_v33  ;;  %v729_v51 = vld [vmem:[%s10233_s25 + $0xc0] sm:$0xff]  ;;  %v731_v52 = vld [vmem:[%s10233_s25 + $0xd0] sm:$0xff]  ;;  %s699_s29 = scalar_lea.vmem %s12694_s26, %s8464_s1 }
  0x2c   : > { %1513 = vmatpush1.bf16.msra.mxu0 %v9743_v15  ;;  %v957_v15 = vrot.slane %v955_v5, 1  ;;  %v934_v19 = vsel %vm902_vm0, %v929_v9, %v933_v10  ;;  %v945_v27 = vor.u32 %v943_v20, %v933_v10  ;;  %v10358_v50 = vpack.c.bf16 %v732_v44, %v730_v43  ;;  %v736_v62 = vld [vmem:[%s10233_s25 + $0xf8] sm:$0xff]  ;;  %v9764_v63 = vld [vmem:[%s12674_s4 + $0x20] ss:$8 sps:$4 sm:$0xff]  }
  0x2d   : > { %1514 = vmatprep.subr.bf16.mxu0 %v9744_v16  ;;  %v10328_v16 = vpack.c.bf16 %v724_v7, %v722_v6  ;;  %v987_v42 = vshll.u32 %v10343_v32, 16  ;;  %v975_v54 = vshrl.u32 %v10341_v29, 16  ;;  %v999_v58 = vshrl.u32 %v10343_v32, 16  ;;  %v733_v7 = vld [vmem:[%s10233_s25 + $0xe0] sm:$0xff]  ;;  %v738_v18 = vld [vmem:[%s10233_s25 + $0x108] sm:$0xff] }
  0x2e   : > { %v991_v10 = vshrl.u32 %v10356_v47, 16  ;;  %v737_v26 = vld [vmem:[%s10233_s25 + $0x100] sm:$0xff] }
  0x2f   : > { %v971_v24 = vshll.u32 %v10328_v16, 16  ;;  %v989_v49 = vrot.slane %v987_v42, 1  ;;  %v9769_v42 = vld [vmem:[%s12674_s4 + $0x34] ss:$8 sps:$4 sm:$0xff]  }
  0x30   : > { %1515 = vmatpush1.bf16.msra.mxu0 %v9746_v22  ;;  %v958_v22 = vsel %vm902_vm0, %v953_v14, %v957_v15 }
  0x31   : > { %1516 = vmatprep.subr.bf16.mxu0 %v9747_v23  ;;  %v967_v23 = vshrl.u32 %v10301_v59, 16  ;;  %v973_v31 = vrot.slane %v971_v24, 1  ;;  %v1001_v4 = vor.u32 %v999_v58, %v989_v49 }
  0x34   : > { %1517 = vmatpush1.bf16.msra.mxu0 %v9749_v28  ;;  %v949_v28 = vrot.slane %v947_v21, 1 }
  0x35   : > { %1518 = vmatprep.subr.bf16.mxu0 %v9750_v30  ;;  %v969_v30 = vor.u32 %v967_v23, %v957_v15  ;;  %v1015_v15 = vshrl.u32 %v10358_v50, 16 }
  0x37   : > { %v974_v40 = vsel %vm902_vm0, %v969_v30, %v973_v31 }
  0x38   : > { %1519 = vmatpush1.bf16.msra.mxu0 %v9752_v35  ;;  %v950_v35 = vsel %vm902_vm0, %v945_v27, %v949_v28  ;;  %v739_v27 = vld [vmem:[%s10233_s25 + $0x110] sm:$0xff] }
  0x39   : > { %1520 = vmatprep.subr.bf16.mxu0 %v9753_v38  ;;  %v963_v38 = vshll.u32 %v10341_v29, 16 }
  0x3b   : > { %v965_v46 = vrot.slane %v963_v38, 1  ;;  %v744_v38 = vld [vmem:[%s10233_s25 + $0x138] sm:$0xff] }
  0x3c   : > { %1521 = vmatpush1.bf16.msra.mxu0 %v9755_v41  ;;  %v983_v41 = vshrl.u32 %v10328_v16, 16 }
  0x3d   : > { %8505 = vmatprep.subr.msk.bf16.mxu0 %vm1497_vm2, %v8504_v45  ;;  %v961_v45 = vor.u32 %v959_v37, %v949_v28  ;;  %v977_v1 = vor.u32 %v975_v54, %v965_v46  ;;  %v742_v37 = vld [vmem:[%s10233_s25 + $0x128] sm:$0xff]  ;;  %v743_v54 = vld [vmem:[%s10233_s25 + $0x130] sm:$0xff] }
  0x3e   : > { %v985_v48 = vor.u32 %v983_v41, %v973_v31  ;;  %v9767_v41 = vld [vmem:[%s12674_s4 + $0x30] ss:$8 sps:$4 sm:$0xff]  }
  0x3f   : > { %v966_v53 = vsel %vm902_vm0, %v961_v45, %v965_v46 }
  0x40   : > { %1523 = vmatpush1.bf16.msra.mxu0 %v1499_v56  ;;  %v979_v56 = vshll.u32 %v10356_v47, 16  ;;  %v990_v57 = vsel %vm902_vm0, %v985_v48, %v989_v49  ;;  %v10416_v49 = vpack.c.bf16 %v744_v38, %v742_v37  ;;  %v9781_v37 = vld [vmem:[%s12674_s4 + $0x74] ss:$8 sps:$4 sm:$0xff]  }
  0x41   : > { %1940 = vmatprep.subr.bf16.mxu0 %v9760_v60  ;;  %v1003_v60 = vshll.u32 %v10358_v50, 16 }
  0x42   : > { %v981_v2 = vrot.slane %v979_v56, 1  ;;  %v1051_v58 = vshll.u32 %v10416_v49, 16 }
  0x43   : > { %1537 = vmatmul.mubr.bf16.vlgmr.msra.gmra.mrb[0].mxu0 %v914_v0  ;;  %v9766_v0 = vld [vmem:[%s12674_s4 + $0x24] ss:$8 sps:$4 sm:$0xff]   ;;  %v1005_v5 = vrot.slane %v1003_v60, 1 }
  0x44   : > { %8507 = vmatprep.mubr.msk.bf16.mxu0 %vm1421_vm1, %v942_v3  ;;  %1941 = vmatpush1.bf16.msra.mxu0 %v9758_v61  ;;  %v734_v61 = vld [vmem:[%s10233_s25 + $0xe8] sm:$0xff]  ;;  %v10377_v3 = vpack.c.bf16 %v731_v52, %v729_v51  ;;  %v982_v9 = vsel %vm902_vm0, %v977_v1, %v981_v2  ;;  %v993_v20 = vor.u32 %v991_v10, %v981_v2  ;;  %v745_v10 = vld [vmem:[%s10233_s25 + $0x140] sm:$0xff] }
  0x45   : > { %1942 = vmatprep.subr.bf16.mxu0 %v9763_v8  ;;  %v10379_v6 = vpack.c.bf16 %v736_v62, %v734_v61  ;;  %v735_v8 = vld [vmem:[%s10233_s25 + $0xf0] sm:$0xff]  ;;  %v1006_v14 = vsel %vm902_vm0, %v1001_v4, %v1005_v5  ;;  %v1017_v23 = vor.u32 %v1015_v15, %v1005_v5  ;;  %v9772_v60 = vld [vmem:[%s12674_s4 + $0x44] ss:$8 sps:$4 sm:$0xff]   ;;  %v748_v62 = vld [vmem:[%s10233_s25 + $0x158] sm:$0xff] }
  0x46   : > { %v1007_v30 = vshrl.u32 %v10377_v3, 16  ;;  %v746_v61 = vld [vmem:[%s10233_s25 + $0x148] sm:$0xff]  ;;  %v9773_v5 = vld [vmem:[%s12674_s4 + $0x50] ss:$8 sps:$4 sm:$0xff]  }
  0x47   : > { %v1019_v17 = vshll.u32 %v10379_v6, 16  ;;  %v1031_v33 = vshrl.u32 %v10379_v6, 16  ;;  %v752_v15 = vld [vmem:[%s10233_s25 + $0x178] sm:$0xff] }
  0x48   : > { %1943 = vmatpush1.bf16.msra.mxu0 %v9761_v12  ;;  %v995_v12 = vshll.u32 %v10377_v3, 16 }
  0x49   : > { %1944 = vmatprep.subr.bf16.mxu0 %v9766_v0  ;;  %v1021_v24 = vrot.slane %v1019_v17, 1  ;;  %v9775_v0 = vld [vmem:[%s12674_s4 + $0x54] ss:$8 sps:$4 sm:$0xff]  }
  0x4a   : > { %v997_v21 = vrot.slane %v995_v12, 1  ;;  %v747_v12 = vld [vmem:[%s10233_s25 + $0x150] sm:$0xff] }
  0x4b   : > { %1547 = vmatmul.mubr.bf16.gmra.mrb[4].mxu0 %v934_v19  ;;  %v740_v19 = vld [vmem:[%s10233_s25 + $0x118] sm:$0xff]  ;;  %v1022_v34 = vsel %vm902_vm0, %v1017_v23, %v1021_v24  ;;  %v1033_v46 = vor.u32 %v1031_v33, %v1021_v24  ;;  %v9778_v24 = vld [vmem:[%s12674_s4 + $0x64] ss:$8 sps:$4 sm:$0xff]  }
  0x4c   : > { %8508 = vmatprep.mubr.msk.bf16.mxu0 %vm1421_vm1, %v958_v22  ;;  %1945 = vmatpush1.bf16.msra.mxu0 %v9764_v63  ;;  %v10392_v22 = vpack.c.bf16 %v735_v8, %v733_v7  ;;  %v10394_v25 = vpack.c.bf16 %v740_v19, %v738_v18  ;;  %v998_v28 = vsel %vm902_vm0, %v993_v20, %v997_v21  ;;  %v9770_v63 = vld [vmem:[%s12674_s4 + $0x40] ss:$8 sps:$4 sm:$0xff]   ;;  %v1053_v8 = vrot.slane %v1051_v58, 1 }
  0x4d   : > { %v1009_v43 = vor.u32 %v1007_v30, %v997_v21  ;;  %1946 = vmatprep.subr.bf16.mxu0 %v9769_v42  ;;  %v1063_v21 = vshrl.u32 %v10416_v49, 16  ;;  %v749_v30 = vld [vmem:[%s10233_s25 + $0x160] sm:$0xff]  ;;  %v754_v33 = vld [vmem:[%s10233_s25 + $0x188] sm:$0xff] }
  0x4e   : > { %v1011_v31 = vshll.u32 %v10392_v22, 16  ;;  %v1023_v45 = vshrl.u32 %v10392_v22, 16  ;;  %v1047_v52 = vshrl.u32 %v10394_v25, 16  ;;  %v9782_v58 = vld [vmem:[%s12674_s4 + $0x80] ss:$8 sps:$4 sm:$0xff]  }
  0x4f   : > { %v1065_v42 = vor.u32 %v1063_v21, %v1053_v8  ;;  %v764_v21 = vld [vmem:[%s10233_s25 + $0x1d8] sm:$0xff] }
  0x50   : > { %v1013_v44 = vrot.slane %v1011_v31, 1  ;;  %1947 = vmatpush1.bf16.msra.mxu0 %v9767_v41  ;;  %v751_v31 = vld [vmem:[%s10233_s25 + $0x170] sm:$0xff] }
  0x51   : > { %1948 = vmatprep.subr.bf16.mxu0 %v9772_v60 }
  0x52   : > { %v1014_v56 = vsel %vm902_vm0, %v1009_v43, %v1013_v44  ;;  %v1025_v1 = vor.u32 %v1023_v45, %v1013_v44 }
  0x53   : > { %1557 = vmatmul.mubr.bf16.gmra.mrb[8].mxu0 %v950_v35  ;;  %v1035_v35 = vshll.u32 %v10394_v25, 16 }
  0x54   : > { %8509 = vmatprep.mubr.msk.bf16.mxu0 %vm1421_vm1, %v974_v40  ;;  %v10406_v40 = vpack.c.bf16 %v739_v27, %v737_v26  ;;  %1949 = vmatpush1.bf16.msra.mxu0 %v9770_v63  ;;  %v10457_v26 = vpack.c.bf16 %v747_v12, %v745_v10  ;;  %v9776_v27 = vld [vmem:[%s12674_s4 + $0x60] ss:$8 sps:$4 sm:$0xff]   ;;  %v755_v12 = vld [vmem:[%s10233_s25 + $0x190] sm:$0xff] }
  0x55   : > { %v1037_v48 = vrot.slane %v1035_v35, 1  ;;  %1950 = vmatprep.subr.bf16.mxu0 %v9775_v0  ;;  %v9779_v35 = vld [vmem:[%s12674_s4 + $0x70] ss:$8 sps:$4 sm:$0xff]   ;;  %v753_v10 = vld [vmem:[%s10233_s25 + $0x180] sm:$0xff] }
  0x56   : > { %v1027_v51 = vshll.u32 %v10406_v40, 16  ;;  %v1039_v18 = vshrl.u32 %v10406_v40, 16  ;;  %v1059_v44 = vshll.u32 %v10457_v26, 16  ;;  %v873_v0 = vld [vmem:[%s12674_s4 + $0x90] sm:$0x77] }
  0x57   : > { %v1049_v7 = vor.u32 %v1047_v52, %v1037_v48 }
  0x58   : > { %v1029_v2 = vrot.slane %v1027_v51, 1  ;;  %1951 = vmatpush1.bf16.msra.mxu0 %v9773_v5  ;;  %v10479_v51 = vpack.c.bf16 %v751_v31, %v749_v30  ;;  %v8550_v5 = vcombine.high %v873_v0, %v873_v0  ;;  %v766_v30 = vld [vmem:[%s10233_s25 + $0x1e8] sm:$0xff]  ;;  %v768_v31 = vld [vmem:[%s10233_s25 + $0x1f8] sm:$0xff] }
  0x59   : > { %v1054_v20 = vsel %vm902_vm0, %v1049_v7, %v1053_v8  ;;  %1952 = vmatprep.subr.bf16.mxu0 %v9778_v24  ;;  %v8549_v7 = vcombine.low %v873_v0, %v873_v0  ;;  %v761_v24 = vld [vmem:[%s10233_s25 + $0x1c0] sm:$0xff] }
  0x5a   : > { %v1030_v17 = vsel %vm902_vm0, %v1025_v1, %v1029_v2  ;;  %v1041_v38 = vor.u32 %v1039_v18, %v1029_v2  ;;  %v1075_v1 = vshll.u32 %v10479_v51, 16  ;;  %v759_v18 = vld [vmem:[%s10233_s25 + $0x1b0] sm:$0xff] }
  0x5b   : > { %1567 = vmatmul.mubr.bf16.gmra.mrb[12].mxu0 %v966_v53  ;;  %v741_v53 = vld [vmem:[%s10233_s25 + $0x120] sm:$0xff] }
  0x5c   : > { %8510 = vmatprep.mubr.msk.bf16.mxu0 %vm1421_vm1, %v990_v57  ;;  %v1038_v57 = vsel %vm902_vm0, %v1033_v46, %v1037_v48  ;;  %v10437_v4 = vpack.c.bf16 %v743_v54, %v741_v53  ;;  %1953 = vmatpush1.bf16.msra.mxu0 %v9776_v27  ;;  %v763_v27 = vld [vmem:[%s10233_s25 + $0x1d0] sm:$0xff] }
  0x5d   : > { %1954 = vmatprep.subr.bf16.mxu0 %v9781_v37 }
  0x5e   : > { %v1043_v19 = vshll.u32 %v10437_v4, 16  ;;  %v1055_v45 = vshrl.u32 %v10437_v4, 16 }
  0x60   : > { %v1045_v41 = vrot.slane %v1043_v19, 1  ;;  %1955 = vmatpush1.bf16.msra.mxu0 %v9779_v35  ;;  %v1935_v19 = vsel %vm1497_vm2, %v8549_v7, 0 }
  0x62   : > { %v1046_v48 = vsel %vm902_vm0, %v1041_v38, %v1045_v41  ;;  %v1057_v60 = vor.u32 %v1055_v45, %v1045_v41  ;;  %v1077_v41 = vrot.slane %v1075_v1, 1  ;;  %v10524_v45 = vpack.c.bf16 %v763_v27, %v761_v24  ;;  %v765_v24 = vld [vmem:[%s10233_s25 + $0x1e0] sm:$0xff]  ;;  %v767_v27 = vld [vmem:[%s10233_s25 + $0x1f0] sm:$0xff] }
  0x63   : > { %1577 = vmatmul.mubr.bf16.gmra.mrb[16].mxu0 %v982_v9  ;;  %v10442_v9 = vpack.c.bf16 %v748_v62, %v746_v61  ;;  %v1071_v62 = vshrl.u32 %v10457_v26, 16 }
  0x64   : > { %8511 = vmatprep.mubr.msk.bf16.mxu0 %vm1421_vm1, %v1006_v14  ;;  %v750_v14 = vld [vmem:[%s10233_s25 + $0x168] sm:$0xff] }
  0x65   : > { %v1067_v23 = vshll.u32 %v10442_v9, 16  ;;  %v1079_v54 = vshrl.u32 %v10442_v9, 16 }
  0x67   : > { %v1069_v43 = vrot.slane %v1067_v23, 1 }
  0x69   : > { %v1070_v53 = vsel %vm902_vm0, %v1065_v42, %v1069_v43  ;;  %v1081_v8 = vor.u32 %v1079_v54, %v1069_v43 }
  0x6b   : > { %1587 = vmatmul.mubr.bf16.gmra.mrb[20].mxu0 %v998_v28  ;;  %v10462_v28 = vpack.c.bf16 %v752_v15, %v750_v14  ;;  %v758_v14 = vld [vmem:[%s10233_s25 + $0x1a8] sm:$0xff]  ;;  %v760_v15 = vld [vmem:[%s10233_s25 + $0x1b8] sm:$0xff] }
  0x6c   : > { %8512 = vmatprep.mubr.msk.bf16.mxu0 %vm1421_vm1, %v1022_v34  ;;  %v756_v34 = vld [vmem:[%s10233_s25 + $0x198] sm:$0xff]  ;;  %v10517_v35 = vpack.c.bf16 %v760_v15, %v758_v14 }
  0x6d   : > { %v1083_v46 = vshll.u32 %v10462_v28, 16  ;;  %v10481_v52 = vpack.c.bf16 %v756_v34, %v754_v33  ;;  %v1095_v63 = vshrl.u32 %v10462_v28, 16  ;;  %v10515_v34 = vpack.c.bf16 %v755_v12, %v753_v10 }
  0x6e   : > { %v1127_v7 = vshrl.u32 %v10517_v35, 16 }
  0x6f   : > { %v1085_v61 = vrot.slane %v1083_v46, 1  ;;  %v1099_v2 = vshll.u32 %v10481_v52, 16  ;;  %v10526_v46 = vpack.c.bf16 %v768_v31, %v766_v30  ;;  %v1103_v1 = vshrl.u32 %v10515_v34, 16  ;;  %v770_v31 = vld [vmem:[%s10233_s25 + $0x208] sm:$0xff] }
  0x71   : > { %v1086_v33 = vsel %vm902_vm0, %v1081_v8, %v1085_v61  ;;  %v1097_v43 = vor.u32 %v1095_v63, %v1085_v61  ;;  %v1111_v61 = vshrl.u32 %v10481_v52, 16  ;;  %v1147_v63 = vshll.u32 %v10526_v46, 16 }
  0x73   : > { %1597 = vmatmul.mubr.bf16.gmra.mrb[24].mxu0 %v1014_v56  ;;  %v9784_v56 = vld [vmem:[%s12674_s4 + $0x84] ss:$8 sps:$4 sm:$0xff]  }
  0x74   : > { %8513 = vmatprep.mubr.msk.bf16.mxu0 %vm1421_vm1, %v1038_v57  ;;  %v1061_v57 = vrot.slane %v1059_v44, 1  ;;  %1956 = vmatprep.subr.bf16.mxu0 %v9784_v56  ;;  %v1101_v44 = vrot.slane %v1099_v2, 1 }
  0x75   : > { %1957 = vmatpush1.bf16.msra.mxu0 %v9782_v58  ;;  %v1087_v58 = vshrl.u32 %v10479_v51, 16 }
  0x76   : > { %8551 = vmatprep.subr.msk.bf16.mxu0 %vm1497_vm2, %v8550_v5  ;;  %v1062_v23 = vsel %vm902_vm0, %v1057_v60, %v1061_v57  ;;  %v1073_v38 = vor.u32 %v1071_v62, %v1061_v57  ;;  %v1102_v60 = vsel %vm902_vm0, %v1097_v43, %v1101_v44  ;;  %v1123_v62 = vshll.u32 %v10524_v45, 16 }
  0x77   : > { %v1089_v8 = vor.u32 %v1087_v58, %v1077_v41  ;;  %v1113_v15 = vor.u32 %v1111_v61, %v1101_v44  ;;  %v10553_v43 = vpack.c.bf16 %v767_v27, %v765_v24  ;;  %v769_v61 = vld [vmem:[%s10233_s25 + $0x200] sm:$0xff]  ;;  %v778_v24 = vld [vmem:[%s10233_s25 + $0x248] sm:$0xff] }
  0x78   : > { %v1078_v56 = vsel %vm902_vm0, %v1073_v38, %v1077_v41 }
  0x79   : > { %1959 = vmatpush1.bf16.msra.mxu0 %v1935_v19 }
  0x7b   : > { %1607 = vmatmul.mubr.bf16.gmra.mrb[28].mxu0 %v1030_v17  ;;  %v757_v17 = vld [vmem:[%s10233_s25 + $0x1a0] sm:$0xff] }
  0x7c   : > { %8514 = vmatprep.mubr.msk.bf16.mxu0 %vm1421_vm1, %v1054_v20  ;;  %v762_v20 = vld [vmem:[%s10233_s25 + $0x1c8] sm:$0xff]  ;;  %v10519_v37 = vpack.c.bf16 %v759_v18, %v757_v17  ;;  %v1125_v17 = vrot.slane %v1123_v62, 1  ;;  %v1149_v18 = vrot.slane %v1147_v63, 1  ;;  %v771_v62 = vld [vmem:[%s10233_s25 + $0x210] sm:$0xff] }
  0x7d   : > { %v10522_v42 = vpack.c.bf16 %v764_v21, %v762_v20  ;;  %v774_v63 = vld [vmem:[%s10233_s25 + $0x228] sm:$0xff] }
  0x7e   : > { %v1107_v54 = vshll.u32 %v10519_v37, 16  ;;  %v1119_v12 = vshrl.u32 %v10519_v37, 16 }
  0x7f   : > { %v1131_v57 = vshll.u32 %v10522_v42, 16  ;;  %v1143_v14 = vshrl.u32 %v10522_v42, 16 }
  0x80   : > { %v1109_v5 = vrot.slane %v1107_v54, 1  ;;  %v1135_v54 = vshrl.u32 %v10524_v45, 16 }
  0x81   : > { %v1133_v10 = vrot.slane %v1131_v57, 1  ;;  %v1159_v57 = vshrl.u32 %v10526_v46, 16 }
  0x82   : > { %v1121_v41 = vor.u32 %v1119_v12, %v1109_v5 }
  0x83   : > { %1617 = vmatmul.mubr.bf16.gmra.mrb[32].mxu0 %v1046_v48  ;;  %v1091_v48 = vshll.u32 %v10515_v34, 16  ;;  %v1145_v44 = vor.u32 %v1143_v14, %v1133_v10  ;;  %v1151_v14 = vshrl.u32 %v10553_v43, 16 }
  0x84   : > { %8515 = vmatprep.mubr.msk.bf16.mxu0 %vm1421_vm1, %v1070_v53  ;;  %v1115_v53 = vshll.u32 %v10517_v35, 16 }
  0x85   : > { %v1093_v0 = vrot.slane %v1091_v48, 1  ;;  %v1150_v58 = vsel %vm902_vm0, %v1145_v44, %v1149_v18 }
  0x86   : > { %v1117_v2 = vrot.slane %v1115_v53, 1  ;;  %v1126_v53 = vsel %vm902_vm0, %v1121_v41, %v1125_v17 }
  0x87   : > { %v1094_v19 = vsel %vm902_vm0, %v1089_v8, %v1093_v0  ;;  %v1105_v21 = vor.u32 %v1103_v1, %v1093_v0  ;;  %v776_v0 = vld [vmem:[%s10233_s25 + $0x238] sm:$0xff]  ;;  %v1137_v1 = vor.u32 %v1135_v54, %v1125_v17  ;;  %v773_v17 = vld [vmem:[%s10233_s25 + $0x220] sm:$0xff] }
  0x88   : > { %v1118_v20 = vsel %vm902_vm0, %v1113_v15, %v1117_v2 }
  0x89   : > { %v1110_v30 = vsel %vm902_vm0, %v1105_v21, %v1109_v5  ;;  %v10568_v5 = vpack.c.bf16 %v771_v62, %v769_v61  ;;  %v779_v61 = vld [vmem:[%s10233_s25 + $0x250] sm:$0xff]  ;;  %v782_v62 = vld [vmem:[%s10233_s25 + $0x268] sm:$0xff] }
  0x8b   : > { %1627 = vmatmul.mubr.bf16.gmra.mrb[36].mxu0 %v1062_v23  ;;  %v1129_v23 = vor.u32 %v1127_v7, %v1117_v2  ;;  %v1161_v7 = vor.u32 %v1159_v57, %v1149_v18  ;;  %v1155_v15 = vshll.u32 %v10568_v5, 16  ;;  %v780_v18 = vld [vmem:[%s10233_s25 + $0x258] sm:$0xff] }
  0x8c   : > { %8516 = vmatprep.mubr.msk.bf16.mxu0 %vm1421_vm1, %v1086_v33  ;;  %v772_v33 = vld [vmem:[%s10233_s25 + $0x218] sm:$0xff]  ;;  %v10585_v41 = vpack.c.bf16 %v780_v18, %v778_v24  ;;  %v783_v24 = vld [vmem:[%s10233_s25 + $0x270] sm:$0xff]  ;;  %v786_v18 = vld [vmem:[%s10233_s25 + $0x288] sm:$0xff] }
  0x8d   : > { %v1134_v38 = vsel %vm902_vm0, %v1129_v23, %v1133_v10  ;;  %v10555_v48 = vpack.c.bf16 %v772_v33, %v770_v31  ;;  %v10570_v10 = vpack.c.bf16 %v776_v0, %v774_v63  ;;  %v775_v23 = vld [vmem:[%s10233_s25 + $0x230] sm:$0xff]  ;;  %v784_v63 = vld [vmem:[%s10233_s25 + $0x278] sm:$0xff] }
  0x8e   : > { %v10583_v31 = vpack.c.bf16 %v775_v23, %v773_v17  ;;  %v1195_v57 = vshll.u32 %v10585_v41, 16  ;;  %v781_v23 = vld [vmem:[%s10233_s25 + $0x260] sm:$0xff] }
  0x8f   : > { %v1179_v21 = vshll.u32 %v10570_v10, 16 }
  0x90   : > { %v1171_v54 = vshll.u32 %v10583_v31, 16 }
  0x93   : > { %1637 = vmatmul.mubr.bf16.gmra.mrb[40].mxu0 %v1078_v56  ;;  %v1139_v56 = vshll.u32 %v10553_v43, 16 }
  0x94   : > { %8517 = vmatprep.mubr.msk.bf16.mxu0 %vm1421_vm1, %v1102_v60  ;;  %v1163_v60 = vshll.u32 %v10555_v48, 16 }
  0x95   : > { %v1141_v2 = vrot.slane %v1139_v56, 1 }
  0x96   : > { %v1165_v8 = vrot.slane %v1163_v60, 1  ;;  %v777_v60 = vld [vmem:[%s10233_s25 + $0x240] sm:$0xff] }
  0x97   : > { %v1142_v12 = vsel %vm902_vm0, %v1137_v1, %v1141_v2  ;;  %v1153_v27 = vor.u32 %v1151_v14, %v1141_v2  ;;  %v1173_v1 = vrot.slane %v1171_v54, 1  ;;  %v10598_v2 = vpack.c.bf16 %v779_v61, %v777_v60 }
  0x9b   : > { %1647 = vmatmul.mubr.bf16.gmra.mrb[44].mxu0 %v1094_v19  ;;  %v1166_v19 = vsel %vm902_vm0, %v1161_v7, %v1165_v8 }
  0x9c   : > { %8518 = vmatprep.mubr.msk.bf16.mxu0 %vm1421_vm1, %v1118_v20  ;;  %v1175_v20 = vshrl.u32 %v10555_v48, 16 }
  0x9e   : > { %v1177_v33 = vor.u32 %v1175_v20, %v1165_v8  ;;  %v1197_v8 = vrot.slane %v1195_v57, 1 }
  0xa3   : > { %1657 = vmatmul.mubr.bf16.gmra.mrb[48].mxu0 %v1110_v30  ;;  %v1157_v30 = vrot.slane %v1155_v15, 1  ;;  %v1183_v15 = vshrl.u32 %v10583_v31, 16 }
  0xa4   : > { %8519 = vmatprep.mubr.msk.bf16.mxu0 %vm1421_vm1, %v1134_v38  ;;  %v1181_v38 = vrot.slane %v1179_v21, 1  ;;  %v1207_v21 = vshrl.u32 %v10585_v41, 16 }
  0xa5   : > { %v1158_v44 = vsel %vm902_vm0, %v1153_v27, %v1157_v30  ;;  %v788_v27 = vld [vmem:[%s10233_s25 + $0x298] sm:$0xff] }
  0xa6   : > { %v1182_v56 = vsel %vm902_vm0, %v1177_v33, %v1181_v38  ;;  %v10615_v54 = vpack.c.bf16 %v788_v27, %v786_v18 }
  0xa8   : > { %v1239_v27 = vshrl.u32 %v10615_v54, 16 }
  0xab   : > { %1667 = vmatmul.mubr.bf16.gmra.mrb[52].mxu0 %v1126_v53  ;;  %v1167_v53 = vshrl.u32 %v10568_v5, 16 }
  0xac   : > { %8520 = vmatprep.mubr.msk.bf16.mxu0 %vm1421_vm1, %v1150_v58  ;;  %v1191_v58 = vshrl.u32 %v10570_v10, 16 }
  0xad   : > { %v1169_v0 = vor.u32 %v1167_v53, %v1157_v30  ;;  %v1185_v30 = vor.u32 %v1183_v15, %v1173_v1 }
  0xae   : > { %v1193_v7 = vor.u32 %v1191_v58, %v1181_v38  ;;  %v10613_v38 = vpack.c.bf16 %v783_v24, %v781_v23  ;;  %v1199_v58 = vshrl.u32 %v10598_v2, 16 }
  0xaf   : > { %v1174_v14 = vsel %vm902_vm0, %v1169_v0, %v1173_v1  ;;  %v787_v0 = vld [vmem:[%s10233_s25 + $0x290] sm:$0xff]  ;;  %v790_v1 = vld [vmem:[%s10233_s25 + $0x2a8] sm:$0xff] }
  0xb0   : > { %v1198_v20 = vsel %vm902_vm0, %v1193_v7, %v1197_v8  ;;  %v1203_v57 = vshll.u32 %v10613_v38, 16  ;;  %v792_v7 = vld [vmem:[%s10233_s25 + $0x2b8] sm:$0xff]  ;;  %v1215_v23 = vshrl.u32 %v10613_v38, 16 }
  0xb3   : > { %1677 = vmatmul.mubr.bf16.gmra.mrb[56].mxu0 %v1142_v12  ;;  %v10600_v12 = vpack.c.bf16 %v784_v63, %v782_v62  ;;  %v1227_v62 = vshll.u32 %v10615_v54, 16  ;;  %v785_v63 = vld [vmem:[%s10233_s25 + $0x280] sm:$0xff] }
  0xb4   : > { %8521 = vmatprep.mubr.msk.bf16.mxu0 %vm1421_vm1, %v1166_v19  ;;  %v1187_v19 = vshll.u32 %v10598_v2, 16  ;;  %v10628_v15 = vpack.c.bf16 %v787_v0, %v785_v63 }
  0xb5   : > { %v1211_v17 = vshll.u32 %v10600_v12, 16  ;;  %v1223_v61 = vshrl.u32 %v10600_v12, 16 }
  0xb6   : > { %v1189_v33 = vrot.slane %v1187_v19, 1  ;;  %12676 = vst [vmem:[#allocation2_spill] sm:$0xff] %v10628_v15  ;;  %v1219_v24 = vshll.u32 %v10628_v15, 16 }
  0xb7   : > { %v1213_v53 = vrot.slane %v1211_v17, 1 }
  0xb9   : > { %v1225_v19 = vor.u32 %v1223_v61, %v1213_v53 }
  0xbb   : > { %1687 = vmatmul.mubr.bf16.gmra.mrb[60].mxu0 %v1158_v44  ;;  %v1209_v44 = vor.u32 %v1207_v21, %v1197_v8  ;;  %v1201_v8 = vor.u32 %v1199_v58, %v1189_v33  ;;  %v10630_v21 = vpack.c.bf16 %v792_v7, %v790_v1  ;;  %v1231_v1 = vshrl.u32 %v10628_v15, 16 }
  0xbc   : > { %8522 = vmatprep.mubr.msk.bf16.mxu0 %vm1421_vm1, %v1182_v56  ;;  %v1190_v56 = vsel %vm902_vm0, %v1185_v30, %v1189_v33  ;;  %v789_v33 = vld [vmem:[%s10233_s25 + $0x2a0] sm:$0xff] }
  0xbd   : > { %v1214_v60 = vsel %vm902_vm0, %v1209_v44, %v1213_v53  ;;  %12677 = vst [vmem:[#allocation3_spill] sm:$0xff] %v10630_v21  ;;  %v1243_v30 = vshll.u32 %v10630_v21, 16  ;;  %v791_v44 = vld [vmem:[%s10233_s25 + $0x2b0] sm:$0xff]  ;;  %v796_v53 = vld [vmem:[%s10233_s25 + $0x2d8] sm:$0xff] }
  0xc3   : > { %1697 = vmatmul.mubr.bf16.gmra.mrb[64].mxu0 %v1174_v14  ;;  %v1205_v14 = vrot.slane %v1203_v57, 1  ;;  %v1221_v57 = vrot.slane %v1219_v24, 1  ;;  %v798_v24 = vld [vmem:[%s10233_s25 + $0x2e8] sm:$0xff] }
  0xc4   : > { %8523 = vmatprep.mubr.msk.bf16.mxu0 %vm1421_vm1, %v1198_v20  ;;  %v1229_v20 = vrot.slane %v1227_v62, 1  ;;  %v1245_v62 = vrot.slane %v1243_v30, 1 }
  0xc5   : > { %v1206_v17 = vsel %vm902_vm0, %v1201_v8, %v1205_v14  ;;  %v1217_v58 = vor.u32 %v1215_v23, %v1205_v14  ;;  %v793_v14 = vld [vmem:[%s10233_s25 + $0x2c0] sm:$0xff]  ;;  %v795_v23 = vld [vmem:[%s10233_s25 + $0x2d0] sm:$0xff] }
  0xc6   : > { %v1230_v18 = vsel %vm902_vm0, %v1225_v19, %v1229_v20  ;;  %v1241_v61 = vor.u32 %v1239_v27, %v1229_v20  ;;  %v1255_v19 = vshrl.u32 %v10630_v21, 16  ;;  %v800_v20 = vld [vmem:[%s10233_s25 + $0x2f8] sm:$0xff]  ;;  %v10658_v30 = vpack.c.bf16 %v795_v23, %v793_v14 }
  0xc7   : > { %v1222_v0 = vsel %vm902_vm0, %v1217_v58, %v1221_v57 }
  0xc8   : > { %v1246_v8 = vsel %vm902_vm0, %v1241_v61, %v1245_v62  ;;  %v1251_v61 = vshll.u32 %v10658_v30, 16 }
  0xcb   : > { %1707 = vmatmul.mubr.bf16.gmra.mrb[68].mxu0 %v1190_v56  ;;  %v794_v56 = vld [vmem:[%s10233_s25 + $0x2c8] sm:$0xff] }
  0xcc   : > { %8524 = vmatprep.mubr.msk.bf16.mxu0 %vm1421_vm1, %v1214_v60  ;;  %v10643_v60 = vpack.c.bf16 %v791_v44, %v789_v33  ;;  %v10645_v63 = vpack.c.bf16 %v796_v53, %v794_v56  ;;  %v1257_v33 = vor.u32 %v1255_v19, %v1245_v62  ;;  %v10660_v56 = vpack.c.bf16 %v800_v20, %v798_v24  ;;  %v877_v62 = vld [vmem:[%s10233_s25 + $0x318] sm:$0x7f] }
  0xce   : > { %12678 = vst [vmem:[#allocation4_spill] sm:$0xff] %v10643_v60  ;;  %12679 = vst [vmem:[#allocation5_spill] sm:$0xff] %v10645_v63  ;;  %v1235_v7 = vshll.u32 %v10643_v60, 16  ;;  %v1247_v58 = vshrl.u32 %v10643_v60, 16  ;;  %v1271_v21 = vshrl.u32 %v10645_v63, 16 }
  0xd0   : > { %v1237_v27 = vrot.slane %v1235_v7, 1  ;;  %v10671_v7 = vld [vmem:[%s10233_s25 + $0x308] sm:$0xff] }
  0xd1   : > { %v881_v20 = vpack.c.bf16 %v877_v62, %v10671_v7 }
  0xd2   : > { %v1249_v19 = vor.u32 %v1247_v58, %v1237_v27 }
  0xd3   : > { %1717 = vmatmul.mubr.bf16.gmra.mrb[72].mxu0 %v1206_v17  ;;  %v1259_v17 = vshll.u32 %v10645_v63, 16  ;;  %v1291_v15 = vshll.u32 %v881_v20, 16 }
  0xd4   : > { %8525 = vmatprep.mubr.msk.bf16.mxu0 %vm1421_vm1, %v1230_v18  ;;  %v1233_v18 = vor.u32 %v1231_v1, %v1221_v57  ;;  %v797_v57 = vld [vmem:[%s10233_s25 + $0x2e0] sm:$0xff]  ;;  %v799_v1 = vld [vmem:[%s10233_s25 + $0x2f0] sm:$0xff] }
  0xd5   : > { %v1261_v44 = vrot.slane %v1259_v17, 1  ;;  %v1253_v17 = vrot.slane %v1251_v61, 1  ;;  %v10675_v14 = vpack.c.bf16 %v799_v1, %v797_v57 }
  0xd6   : > { %v1238_v53 = vsel %vm902_vm0, %v1233_v18, %v1237_v27  ;;  %v876_v27 = vld [vmem:[%s10233_s25 + $0x310] sm:$0x7f] }
  0xd7   : > { %v1273_v23 = vor.u32 %v1271_v21, %v1261_v44  ;;  %v1254_v18 = vsel %vm902_vm0, %v1249_v19, %v1253_v17  ;;  %v1267_v63 = vshll.u32 %v10675_v14, 16  ;;  %v1279_v1 = vshrl.u32 %v10675_v14, 16 }
  0xdb   : > { %1727 = vmatmul.mubr.bf16.gmra.mrb[76].mxu0 %v1222_v0  ;;  %v1262_v0 = vsel %vm902_vm0, %v1257_v33, %v1261_v44  ;;  %v1263_v33 = vshrl.u32 %v10658_v30, 16  ;;  %v1269_v44 = vrot.slane %v1267_v63, 1  ;;  %v1298_v63 = vshrl.u32 %v881_v20, 16  ;;  %v705_v20 = vld [vmem:[%s10233_s25] sm:$0xff] }
  0xdc   : > { %8526 = vmatprep.mubr.msk.bf16.mxu0 %vm1421_vm1, %v1246_v8  ;;  %v1275_v8 = vshll.u32 %v10660_v56, 16 }
  0xdd   : > { %v1265_v21 = vor.u32 %v1263_v33, %v1253_v17  ;;  %v706_v33 = vld [vmem:[%s10233_s25 + $0x8] sm:$0xff] }
  0xde   : > { %v1277_v24 = vrot.slane %v1275_v8, 1  ;;  %v1293_v8 = vrot.slane %v1291_v15, 1 }
  0xdf   : > { %v1270_v57 = vsel %vm902_vm0, %v1265_v21, %v1269_v44 }
  0xe0   : > { %v1278_v60 = vsel %vm902_vm0, %v1273_v23, %v1277_v24  ;;  %v1281_v23 = vor.u32 %v1279_v1, %v1269_v44  ;;  %v1300_v15 = vor.u32 %v1298_v63, %v1293_v8  ;;  %v10706_v44 = vld [vmem:[%s10233_s25 + $0x10] sm:$0xff] }
  0xe1   : > { %v9793_v1 = vld [vmem:[%s12674_s4 + $0x150] ss:$8 sps:$4 sm:$0xff]  }
  0xe2   : > { %v9799_v63 = vld [vmem:[%s12674_s4 + $0x170] ss:$8 sps:$4 sm:$0xff]  }
  0xe3   : > { %1737 = vmatmul.mubr.bf16.gmra.mrb[80].mxu0 %v1238_v53  ;;  %v1287_v53 = vshrl.u32 %v10660_v56, 16 }
  0xe4   : > { %8527 = vmatprep.mubr.msk.bf16.mxu0 %vm1421_vm1, %v1262_v0  ;;  %v10684_v0 = vld [vmem:[%s10233_s25 + $0x300] sm:$0xff] }
  0xe5   : > { %v880_v58 = vpack.c.bf16 %v876_v27, %v10684_v0  ;;  %v1289_v61 = vor.u32 %v1287_v53, %v1277_v24  ;;  %v10700_v27 = vld [vmem:[%s10233_s25 + $0x18] sm:$0xff] }
  0xe6   : > { %v806_v21 = vpack.c.bf16 %v10700_v27, %v706_v33  ;;  %v9810_v33 = vld [vmem:[%s12674_s4 + $0x1a4] ss:$8 sps:$4 sm:$0xff]  }
  0xe7   : > { %v1283_v62 = vshll.u32 %v880_v58, 16  ;;  %v1294_v19 = vsel %vm902_vm0, %v1289_v61, %v1293_v8  ;;  %v1295_v24 = vshrl.u32 %v880_v58, 16  ;;  %v805_v58 = vpack.c.bf16 %v10706_v44, %v705_v20  ;;  %v9787_v61 = vld [vmem:[%s12674_s4 + $0x130] ss:$8 sps:$4 sm:$0xff]   ;;  %v9792_v8 = vld [vmem:[%s12674_s4 + $0x144] ss:$8 sps:$4 sm:$0xff]  }
  0xe8   : > { %v9811_v20 = vld [vmem:[%s12674_s4 + $0x1b0] ss:$8 sps:$4 sm:$0xff]  }
  0xeb   : > { %1747 = vmatmul.mubr.bf16.gmra.mrb[84].mxu0 %v1254_v18  ;;  %v9789_v18 = vld [vmem:[%s12674_s4 + $0x134] ss:$8 sps:$4 sm:$0xff]  }
  0xec   : > { %8528 = vmatprep.mubr.msk.bf16.mxu0 %vm1421_vm1, %v1278_v60  ;;  %v1285_v60 = vrot.slane %v1283_v62, 1  ;;  %2601 = vmatprep.subr.bf16.mxu0 %v9789_v18  ;;  %v9795_v62 = vld [vmem:[%s12674_s4 + $0x154] ss:$8 sps:$4 sm:$0xff]   ;;  %v9805_v18 = vld [vmem:[%s12674_s4 + $0x190] ss:$8 sps:$4 sm:$0xff]  }
  0xee   : > { %v1286_v17 = vsel %vm902_vm0, %v1281_v23, %v1285_v60  ;;  %v1297_v53 = vor.u32 %v1295_v24, %v1285_v60  ;;  %v9798_v23 = vld [vmem:[%s12674_s4 + $0x164] ss:$8 sps:$4 sm:$0xff]   ;;  %v9801_v60 = vld [vmem:[%s12674_s4 + $0x174] ss:$8 sps:$4 sm:$0xff]  }
  0xef   : > { %v9807_v24 = vld [vmem:[%s12674_s4 + $0x194] ss:$8 sps:$4 sm:$0xff]  }
  0xf3   : > { %1757 = vmatmul.mubr.bf16.gmra.mrb[88].mxu0 %v1270_v57  ;;  %v9790_v57 = vld [vmem:[%s12674_s4 + $0x140] ss:$8 sps:$4 sm:$0xff]  }
  0xf4   : > { %8529 = vmatprep.mubr.msk.bf16.mxu0 %vm1421_vm1, %v1294_v19  ;;  %v9796_v19 = vld [vmem:[%s12674_s4 + $0x160] ss:$8 sps:$4 sm:$0xff]  }
  0xfb   : > { %1767 = vmatmul.mubr.bf16.gmra.mrb[92].mxu0 %v1286_v17  ;;  %v9804_v17 = vld [vmem:[%s12674_s4 + $0x184] ss:$8 sps:$4 sm:$0xff]  }
  0xfc   : > { %8530 = vmatprep.mubr.msk.bf16.mxu0 %vm1421_vm1, %v1300_v15  ;;  %v9802_v15 = vld [vmem:[%s12674_s4 + $0x180] ss:$8 sps:$4 sm:$0xff]  }
 0x103   : > { %1777 = vmatmul.mubr.bf16.gmra.mrb[96].mxu0 %v1297_v53  ;;  %v9808_v53 = vld [vmem:[%s12674_s4 + $0x1a0] ss:$8 sps:$4 sm:$0xff]  }
 0x104   : > { %8552 = vmatprep.mubr.msk.bf16.mxu0 %vm1421_vm1, %v806_v21  ;;  %v9813_v21 = vld [vmem:[%s12674_s4 + $0x1b4] ss:$8 sps:$4 sm:$0xff]  }
 0x10b   : > { %1973 = vmatmul.mubr.bf16.vlgmr.msra.gmra.mrb[0].mxu0 %v805_v58  ;;  %v8595_v58 = vld [vmem:[%s12674_s4 + $0x1c0] sm:$0x77] }
 0x10c   : > { %8553 = vmatprep.mubr.msk.bf16.mxu0 %vm1421_vm1, %v10245_v13  ;;  %2602 = vmatpush1.bf16.msra.mxu0 %v9787_v61  ;;  %v8615_v61 = vcombine.high %v8595_v58, %v8595_v58 }
 0x10d   : > { %2603 = vmatprep.subr.bf16.mxu0 %v9792_v8  ;;  %v8614_v8 = vcombine.low %v8595_v58, %v8595_v58 }
 0x110   : > { %2604 = vmatpush1.bf16.msra.mxu0 %v9790_v57  ;;  %v2596_v57 = vsel %vm1497_vm2, %v8614_v8, 0  ;;  %v2310_v8 = vrot.slane %v10282_v39, 1 }
 0x111   : > { %2605 = vmatprep.subr.bf16.mxu0 %v9795_v62  ;;  %v12681_v62 = vld [vmem:[#allocation3_spill] sm:$0xff] }
 0x113   : > { %1983 = vmatmul.mubr.bf16.gmra.mrb[4].mxu0 %v10277_v36 }
 0x114   : > { %8554 = vmatprep.mubr.msk.bf16.mxu0 %vm1421_vm1, %v10282_v39  ;;  %2606 = vmatpush1.bf16.msra.mxu0 %v9793_v1  ;;  %v12680_v1 = vld [vmem:[#allocation2_spill] sm:$0xff]  ;;  %v2318_v39 = vrot.slane %v10328_v16, 1 }
 0x115   : > { %2607 = vmatprep.subr.bf16.mxu0 %v9798_v23  ;;  %v12683_v23 = vld [vmem:[#allocation5_spill] sm:$0xff] }
 0x118   : > { %2608 = vmatpush1.bf16.msra.mxu0 %v9796_v19  ;;  %v12682_v19 = vld [vmem:[#allocation4_spill] sm:$0xff] }
 0x119   : > { %2609 = vmatprep.subr.bf16.mxu0 %v9801_v60  ;;  %v804_v60 = vld [vmem:[%s10233_s25 + $0x318] sm:$0x3f] }
 0x11b   : > { %1993 = vmatmul.mubr.bf16.gmra.mrb[8].mxu0 %v10297_v55 }
 0x11c   : > { %8555 = vmatprep.mubr.msk.bf16.mxu0 %vm1421_vm1, %v10301_v59  ;;  %2610 = vmatpush1.bf16.msra.mxu0 %v9799_v63  ;;  %v2224_v63 = vld [vmem:[%s10233_s25 + $0x8] sm:$0xfc] }
 0x11d   : > { %2611 = vmatprep.subr.bf16.mxu0 %v9804_v17  ;;  %v854_v17 = vpack.c.bf16 %v804_v60, %v10671_v7  ;;  %v2308_v60 = vrot.slane %v10297_v55, 1  ;;  %v2316_v55 = vrot.slane %v10341_v29, 1 }
 0x120   : > { %2612 = vmatpush1.bf16.msra.mxu0 %v9802_v15  ;;  %v2228_v15 = vpack.c.bf16 %v10700_v27, %v2224_v63 }
 0x121   : > { %2613 = vmatprep.subr.bf16.mxu0 %v9807_v24  ;;  %v803_v24 = vld [vmem:[%s10233_s25 + $0x310] sm:$0x3f] }
 0x123   : > { %2003 = vmatmul.mubr.bf16.gmra.mrb[12].mxu0 %v10323_v11 }
 0x124   : > { %8556 = vmatprep.mubr.msk.bf16.mxu0 %vm1421_vm1, %v10328_v16  ;;  %2614 = vmatpush1.bf16.msra.mxu0 %v9805_v18  ;;  %v2305_v18 = vrot.slane %v2228_v15, 1  ;;  %v2326_v16 = vrot.slane %v10358_v50, 1 }
 0x125   : > { %2615 = vmatprep.subr.bf16.mxu0 %v9810_v33  ;;  %v2306_v33 = vrot.slane %v10245_v13, 1 }
 0x127   : > { %v2307_v58 = vsel %vm2301_vm3, %v2305_v18, %v2306_v33  ;;  %v2311_v13 = vsel %vm2301_vm3, %v2306_v33, %v2310_v8 }
 0x128   : > { %2616 = vmatpush1.bf16.msra.mxu0 %v9808_v53  ;;  %v2223_v53 = vld [vmem:[%s10233_s25] sm:$0xfc] }
 0x129   : > { %2617 = vmatprep.subr.bf16.mxu0 %v9813_v21  ;;  %v853_v21 = vpack.c.bf16 %v803_v24, %v10684_v0 }
 0x12b   : > { %2013 = vmatmul.mubr.bf16.gmra.mrb[16].mxu0 %v10341_v29  ;;  %v2324_v29 = vrot.slane %v10377_v3, 1 }
 0x12c   : > { %8557 = vmatprep.mubr.msk.bf16.mxu0 %vm1421_vm1, %v10343_v32  ;;  %2618 = vmatpush1.bf16.msra.mxu0 %v9811_v20  ;;  %v2227_v20 = vpack.c.bf16 %v10706_v44, %v2223_v53  ;;  %v2314_v44 = vrot.slane %v10301_v59, 1  ;;  %v2322_v59 = vrot.slane %v10343_v32, 1  ;;  %v2330_v32 = vrot.slane %v10379_v6, 1 }
 0x12d   : > { %8616 = vmatprep.subr.msk.bf16.mxu0 %vm1497_vm2, %v8615_v61  ;;  %v2303_v61 = vrot.slane %v10277_v36, 1  ;;  %v2312_v36 = vrot.slane %v10323_v11, 1  ;;  %v2320_v11 = vrot.slane %v10356_v47, 1 }
 0x12e   : > { %v2302_v27 = vrot.slane %v2227_v20, 1  ;;  %v2319_v24 = vsel %vm2301_vm3, %v2314_v44, %v2318_v39  ;;  %v2323_v33 = vsel %vm2301_vm3, %v2318_v39, %v2322_v59 }
 0x12f   : > { %v2309_v63 = vsel %vm2301_vm3, %v2303_v61, %v2308_v60  ;;  %v2313_v15 = vsel %vm2301_vm3, %v2308_v60, %v2312_v36  ;;  %v2317_v18 = vsel %vm2301_vm3, %v2312_v36, %v2316_v55  ;;  %v2321_v53 = vsel %vm2301_vm3, %v2316_v55, %v2320_v11 }
 0x130   : > { %2620 = vmatpush1.bf16.msra.mxu0 %v2596_v57  ;;  %v2304_v57 = vsel %vm2301_vm3, %v2302_v27, %v2303_v61  ;;  %v2325_v20 = vsel %vm2301_vm3, %v2320_v11, %v2324_v29 }
 0x133   : > { %2023 = vmatmul.mubr.bf16.gmra.mrb[20].mxu0 %v10356_v47  ;;  %v2328_v47 = vrot.slane %v10392_v22, 1 }
 0x134   : > { %8558 = vmatprep.mubr.msk.bf16.mxu0 %vm1421_vm1, %v10358_v50  ;;  %v2334_v50 = vrot.slane %v10394_v25, 1 }
 0x135   : > { %v2329_v27 = vsel %vm2301_vm3, %v2324_v29, %v2328_v47 }
 0x136   : > { %v2335_v61 = vsel %vm2301_vm3, %v2330_v32, %v2334_v50 }
 0x13b   : > { %2033 = vmatmul.mubr.bf16.gmra.mrb[24].mxu0 %v10377_v3  ;;  %v2332_v3 = vrot.slane %v10406_v40, 1 }
 0x13c   : > { %8559 = vmatprep.mubr.msk.bf16.mxu0 %vm1421_vm1, %v10379_v6  ;;  %v2338_v6 = vrot.slane %v10416_v49, 1 }
 0x143   : > { %2043 = vmatmul.mubr.bf16.gmra.mrb[28].mxu0 %v10392_v22  ;;  %v2336_v22 = vrot.slane %v10437_v4, 1 }
 0x144   : > { %8560 = vmatprep.mubr.msk.bf16.mxu0 %vm1421_vm1, %v10394_v25  ;;  %v2342_v25 = vrot.slane %v10442_v9, 1 }
 0x146   : > { %v2343_v60 = vsel %vm2301_vm3, %v2338_v6, %v2342_v25 }
 0x14b   : > { %2053 = vmatmul.mubr.bf16.gmra.mrb[32].mxu0 %v10406_v40  ;;  %v2340_v40 = vrot.slane %v10457_v26, 1 }
 0x14c   : > { %8561 = vmatprep.mubr.msk.bf16.mxu0 %vm1421_vm1, %v10416_v49  ;;  %v2346_v49 = vrot.slane %v10462_v28, 1 }
 0x153   : > { %2063 = vmatmul.mubr.bf16.gmra.mrb[36].mxu0 %v10437_v4  ;;  %v2344_v4 = vrot.slane %v10479_v51, 1 }
 0x154   : > { %8562 = vmatprep.mubr.msk.bf16.mxu0 %vm1421_vm1, %v10442_v9  ;;  %v2350_v9 = vrot.slane %v10481_v52, 1 }
 0x156   : > { %v2351_v36 = vsel %vm2301_vm3, %v2346_v49, %v2350_v9 }
 0x15b   : > { %2073 = vmatmul.mubr.bf16.gmra.mrb[40].mxu0 %v10457_v26  ;;  %v2348_v26 = vrot.slane %v10515_v34, 1 }
 0x15c   : > { %8563 = vmatprep.mubr.msk.bf16.mxu0 %vm1421_vm1, %v10462_v28  ;;  %v2354_v28 = vrot.slane %v10517_v35, 1 }
 0x15d   : > { %v2349_v39 = vsel %vm2301_vm3, %v2344_v4, %v2348_v26 }
 0x163   : > { %2083 = vmatmul.mubr.bf16.gmra.mrb[44].mxu0 %v10479_v51  ;;  %v2352_v51 = vrot.slane %v10519_v37, 1 }
 0x164   : > { %8564 = vmatprep.mubr.msk.bf16.mxu0 %vm1421_vm1, %v10481_v52  ;;  %v2358_v52 = vrot.slane %v10522_v42, 1 }
 0x166   : > { %v2359_v55 = vsel %vm2301_vm3, %v2354_v28, %v2358_v52 }
 0x16b   : > { %2093 = vmatmul.mubr.bf16.gmra.mrb[48].mxu0 %v10515_v34  ;;  %v2356_v34 = vrot.slane %v10524_v45, 1 }
 0x16c   : > { %8565 = vmatprep.mubr.msk.bf16.mxu0 %vm1421_vm1, %v10517_v35  ;;  %v2362_v35 = vrot.slane %v10526_v46, 1 }
 0x173   : > { %2103 = vmatmul.mubr.bf16.gmra.mrb[52].mxu0 %v10519_v37  ;;  %v2360_v37 = vrot.slane %v10553_v43, 1 }
 0x174   : > { %8566 = vmatprep.mubr.msk.bf16.mxu0 %vm1421_vm1, %v10522_v42  ;;  %v2366_v42 = vrot.slane %v10555_v48, 1 }
 0x176   : > { %v2367_v11 = vsel %vm2301_vm3, %v2362_v35, %v2366_v42 }
 0x17b   : > { %2113 = vmatmul.mubr.bf16.gmra.mrb[56].mxu0 %v10524_v45  ;;  %v2364_v45 = vrot.slane %v10568_v5, 1 }
 0x17c   : > { %8567 = vmatprep.mubr.msk.bf16.mxu0 %vm1421_vm1, %v10526_v46  ;;  %v2370_v46 = vrot.slane %v10570_v10, 1 }
 0x183   : > { %2123 = vmatmul.mubr.bf16.gmra.mrb[60].mxu0 %v10553_v43  ;;  %v2368_v43 = vrot.slane %v10583_v31, 1 }
 0x184   : > { %8568 = vmatprep.mubr.msk.bf16.mxu0 %vm1421_vm1, %v10555_v48  ;;  %v2374_v48 = vrot.slane %v10585_v41, 1 }
 0x186   : > { %v2375_v29 = vsel %vm2301_vm3, %v2370_v46, %v2374_v48 }
 0x18b   : > { %2133 = vmatmul.mubr.bf16.gmra.mrb[64].mxu0 %v10568_v5  ;;  %v2372_v5 = vrot.slane %v10598_v2, 1 }
 0x18c   : > { %8569 = vmatprep.mubr.msk.bf16.mxu0 %vm1421_vm1, %v10570_v10  ;;  %v2378_v10 = vrot.slane %v10600_v12, 1 }
 0x193   : > { %2143 = vmatmul.mubr.bf16.gmra.mrb[68].mxu0 %v10583_v31  ;;  %v2376_v31 = vrot.slane %v10613_v38, 1 }
 0x194   : > { %8570 = vmatprep.mubr.msk.bf16.mxu0 %vm1421_vm1, %v10585_v41  ;;  %v2382_v41 = vrot.slane %v10615_v54, 1 }
 0x19b   : > { %2153 = vmatmul.mubr.bf16.gmra.mrb[72].mxu0 %v10598_v2  ;;  %v2380_v2 = vrot.slane %v12680_v1, 1 }
 0x19c   : > { %8571 = vmatprep.mubr.msk.bf16.mxu0 %vm1421_vm1, %v10600_v12  ;;  %v2386_v12 = vrot.slane %v12681_v62, 1 }
 0x1a3   : > { %2163 = vmatmul.mubr.bf16.gmra.mrb[76].mxu0 %v10613_v38  ;;  %v2384_v38 = vrot.slane %v12682_v19, 1 }
 0x1a4   : > { %8572 = vmatprep.mubr.msk.bf16.mxu0 %vm1421_vm1, %v10615_v54  ;;  %v2390_v54 = vrot.slane %v12683_v23, 1 }
 0x1ab   : > { %2173 = vmatmul.mubr.bf16.gmra.mrb[80].mxu0 %v12680_v1  ;;  %v2388_v1 = vrot.slane %v10658_v30, 1 }
 0x1ac   : > { %8573 = vmatprep.mubr.msk.bf16.mxu0 %vm1421_vm1, %v12681_v62  ;;  %v2394_v62 = vrot.slane %v10660_v56, 1 }
 0x1b3   : > { %2183 = vmatmul.mubr.bf16.gmra.mrb[84].mxu0 %v12682_v19 }
 0x1b4   : > { %8574 = vmatprep.mubr.msk.bf16.mxu0 %vm1421_vm1, %v12683_v23  ;;  %v2392_v23 = vrot.slane %v10675_v14, 1 }
 0x1bb   : > { %2193 = vmatmul.mubr.bf16.gmra.mrb[88].mxu0 %v10658_v30 }
 0x1bc   : > { %8575 = vmatprep.mubr.msk.bf16.mxu0 %vm1421_vm1, %v10660_v56 }
 0x1c3   : > { %2203 = vmatmul.mubr.bf16.gmra.mrb[92].mxu0 %v10675_v14 }
 0x1c4   : > { %8576 = vmatprep.mubr.msk.bf16.mxu0 %vm1421_vm1, %v854_v17  ;;  %v2315_v17 = vsel %vm2301_vm3, %v2310_v8, %v2314_v44  ;;  %v2333_v8 = vsel %vm2301_vm3, %v2328_v47, %v2332_v3  ;;  %v2341_v44 = vsel %vm2301_vm3, %v2336_v22, %v2340_v40  ;;  %v2383_v47 = vsel %vm2301_vm3, %v2378_v10, %v2382_v41 }
 0x1cb   : > { %2213 = vmatmul.mubr.bf16.gmra.mrb[96].mxu0 %v853_v21  ;;  %v2327_v21 = vsel %vm2301_vm3, %v2322_v59, %v2326_v16  ;;  %v2357_v59 = vsel %vm2301_vm3, %v2352_v51, %v2356_v34 }
 0x1cc   : > { %8617 = vmatprep.mubr.msk.bf16.mxu0 %vm1421_vm1, %v2307_v58  ;;  %v2331_v58 = vsel %vm2301_vm3, %v2326_v16, %v2330_v32  ;;  %v2365_v16 = vsel %vm2301_vm3, %v2360_v37, %v2364_v45  ;;  %v2373_v32 = vsel %vm2301_vm3, %v2368_v43, %v2372_v5 }
 0x1d3   : > { %2634 = vmatmul.mubr.bf16.vlgmr.msra.gmra.mrb[0].mxu0 %v2304_v57  ;;  %v2339_v57 = vsel %vm2301_vm3, %v2334_v50, %v2338_v6  ;;  %v2381_v50 = vsel %vm2301_vm3, %v2376_v31, %v2380_v2  ;;  %v2226_v6 = vld [vmem:[%s10233_s25 + $0x318] sm:$0xff] }
 0x1d4   : > { %8618 = vmatprep.mubr.msk.bf16.mxu0 %vm1421_vm1, %v2311_v13  ;;  %v2337_v13 = vsel %vm2301_vm3, %v2332_v3, %v2336_v22  ;;  %v2391_v3 = vsel %vm2301_vm3, %v2386_v12, %v2390_v54  ;;  %v2230_v19 = vpack.c.bf16 %v2226_v6, %v10671_v7  ;;  %v2986_v7 = vlaneseq }
 0x1d6   : > { %v2398_v22 = vrot.slane %v2230_v19, 1  ;;  %v2987_v14 = vshrl.u32 %v2986_v7, 7 }
 0x1d8   : > { %v2399_v56 = vsel %vm2301_vm3, %v2394_v62, %v2398_v22 }
 0x1db   : > { %2644 = vmatmul.mubr.bf16.gmra.mrb[4].mxu0 %v2309_v63  ;;  %v2347_v63 = vsel %vm2301_vm3, %v2342_v25, %v2346_v49  ;;  %v2225_v25 = vld [vmem:[%s10233_s25 + $0x310] sm:$0xff]  ;;  %v10966_v49 = vsub.s32 0, %v2987_v14 }
 0x1dc   : > { %8619 = vmatprep.mubr.msk.bf16.mxu0 %vm1421_vm1, %v2315_v17  ;;  %v2345_v17 = vsel %vm2301_vm3, %v2340_v40, %v2344_v4  ;;  %v2229_v30 = vpack.c.bf16 %v2225_v25, %v10684_v0  ;;  %v2984_v0 = vld [vmem:[%s12684_s2] sm:$0x3]  ;;  %s12688_s2 = sld [smem:[#allocation11_spill]] }
 0x1e3   : > { %2654 = vmatmul.mubr.bf16.gmra.mrb[8].mxu0 %v2313_v15  ;;  %v2355_v15 = vsel %vm2301_vm3, %v2350_v9, %v2354_v28 }
 0x1e4   : > { %8620 = vmatprep.mubr.msk.bf16.mxu0 %vm1421_vm1, %v2319_v24  ;;  %v2353_v24 = vsel %vm2301_vm3, %v2348_v26, %v2352_v51 }
 0x1eb   : > { %2664 = vmatmul.mubr.bf16.gmra.mrb[12].mxu0 %v2317_v18  ;;  %v2363_v18 = vsel %vm2301_vm3, %v2358_v52, %v2362_v35 }
 0x1ec   : > { %8621 = vmatprep.mubr.msk.bf16.mxu0 %vm1421_vm1, %v2323_v33  ;;  %v2361_v33 = vsel %vm2301_vm3, %v2356_v34, %v2360_v37 }
 0x1f3   : > { %2674 = vmatmul.mubr.bf16.gmra.mrb[16].mxu0 %v2321_v53  ;;  %v2371_v53 = vsel %vm2301_vm3, %v2366_v42, %v2370_v46 }
 0x1f4   : > { %8622 = vmatprep.mubr.msk.bf16.mxu0 %vm1421_vm1, %v2327_v21  ;;  %v2369_v21 = vsel %vm2301_vm3, %v2364_v45, %v2368_v43 }
 0x1fb   : > { %2684 = vmatmul.mubr.bf16.gmra.mrb[20].mxu0 %v2325_v20  ;;  %v2379_v20 = vsel %vm2301_vm3, %v2374_v48, %v2378_v10 }
 0x1fc   : > { %8623 = vmatprep.mubr.msk.bf16.mxu0 %vm1421_vm1, %v2331_v58  ;;  %v2377_v58 = vsel %vm2301_vm3, %v2372_v5, %v2376_v31 }
 0x203   : > { %2694 = vmatmul.mubr.bf16.gmra.mrb[24].mxu0 %v2329_v27  ;;  %v2387_v27 = vsel %vm2301_vm3, %v2382_v41, %v2386_v12 }
 0x204   : > { %8624 = vmatprep.mubr.msk.bf16.mxu0 %vm1421_vm1, %v2335_v61  ;;  %v2385_v61 = vsel %vm2301_vm3, %v2380_v2, %v2384_v38 }
 0x20b   : > { %2704 = vmatmul.mubr.bf16.gmra.mrb[28].mxu0 %v2333_v8  ;;  %v2389_v8 = vsel %vm2301_vm3, %v2384_v38, %v2388_v1 }
 0x20c   : > { %8625 = vmatprep.mubr.msk.bf16.mxu0 %vm1421_vm1, %v2339_v57  ;;  %v2395_v57 = vsel %vm2301_vm3, %v2390_v54, %v2394_v62 }
 0x213   : > { %2714 = vmatmul.mubr.bf16.gmra.mrb[32].mxu0 %v2337_v13  ;;  %v2393_v13 = vsel %vm2301_vm3, %v2388_v1, %v2392_v23 }
 0x214   : > { %8626 = vmatprep.mubr.msk.bf16.mxu0 %vm1421_vm1, %v2343_v60  ;;  %v2396_v60 = vrot.slane %v2229_v30, 1 }
 0x216   : > { %v2397_v40 = vsel %vm2301_vm3, %v2392_v23, %v2396_v60 }
 0x21b   : > { %2724 = vmatmul.mubr.bf16.gmra.mrb[36].mxu0 %v2341_v44  ;;  %v10971_v44 = vsub.s32 1, %v2987_v14 }
 0x21c   : > { %8627 = vmatprep.mubr.msk.bf16.mxu0 %vm1421_vm1, %v2347_v63  ;;  %v10974_v63 = vrot.slane %v2984_v0, %v10966_v49 }
 0x21d   : > { %12685 = vst [vmem:[#allocation2_spill] sm:$0xff] %v10971_v44  ;;  %v10977_v4 = vrot.slane %v2984_v0, %v10971_v44 }
 0x223   : > { %2734 = vmatmul.mubr.bf16.gmra.mrb[40].mxu0 %v2345_v17 }
 0x224   : > { %8628 = vmatprep.mubr.msk.bf16.mxu0 %vm1421_vm1, %v2351_v36 }
 0x22b   : > { %2744 = vmatmul.mubr.bf16.gmra.mrb[44].mxu0 %v2349_v39 }
 0x22c   : > { %8629 = vmatprep.mubr.msk.bf16.mxu0 %vm1421_vm1, %v2355_v15 }
 0x233   : > { %2754 = vmatmul.mubr.bf16.gmra.mrb[48].mxu0 %v2353_v24 }
 0x234   : > { %8630 = vmatprep.mubr.msk.bf16.mxu0 %vm1421_vm1, %v2359_v55 }
 0x23b   : > { %2764 = vmatmul.mubr.bf16.gmra.mrb[52].mxu0 %v2357_v59 }
 0x23c   : > { %8631 = vmatprep.mubr.msk.bf16.mxu0 %vm1421_vm1, %v2363_v18 }
 0x243   : > { %2774 = vmatmul.mubr.bf16.gmra.mrb[56].mxu0 %v2361_v33 }
 0x244   : > { %8632 = vmatprep.mubr.msk.bf16.mxu0 %vm1421_vm1, %v2367_v11 }
 0x24b   : > { %2784 = vmatmul.mubr.bf16.gmra.mrb[60].mxu0 %v2365_v16 }
 0x24c   : > { %8633 = vmatprep.mubr.msk.bf16.mxu0 %vm1421_vm1, %v2371_v53 }
 0x253   : > { %2794 = vmatmul.mubr.bf16.gmra.mrb[64].mxu0 %v2369_v21 }
 0x254   : > { %8634 = vmatprep.mubr.msk.bf16.mxu0 %vm1421_vm1, %v2375_v29 }
 0x25b   : > { %2804 = vmatmul.mubr.bf16.gmra.mrb[68].mxu0 %v2373_v32 }
 0x25c   : > { %8635 = vmatprep.mubr.msk.bf16.mxu0 %vm1421_vm1, %v2379_v20 }
 0x263   : > { %2814 = vmatmul.mubr.bf16.gmra.mrb[72].mxu0 %v2377_v58 }
 0x264   : > { %8636 = vmatprep.mubr.msk.bf16.mxu0 %vm1421_vm1, %v2383_v47  ;;  %v9818_v47 = vld [vmem:[%s12686_s30 + $0x4] ss:$16 sps:$4 sm:$0xff]  }
 0x265   : > { %4099 = vmatprep.mubr.bf16.mxu1 %v9818_v47 }
 0x26b   : > { %2824 = vmatmul.mubr.bf16.gmra.mrb[76].mxu0 %v2381_v50 }
 0x26c   : > { %8637 = vmatprep.mubr.msk.bf16.mxu0 %vm1421_vm1, %v2387_v27 }
 0x273   : > { %2834 = vmatmul.mubr.bf16.gmra.mrb[80].mxu0 %v2385_v61 }
 0x274   : > { %8638 = vmatprep.mubr.msk.bf16.mxu0 %vm1421_vm1, %v2391_v3 }
 0x27b   : > { %2844 = vmatmul.mubr.bf16.gmra.mrb[84].mxu0 %v2389_v8 }
 0x27c   : > { %8639 = vmatprep.mubr.msk.bf16.mxu0 %vm1421_vm1, %v2395_v57 }
 0x283   : > { %2854 = vmatmul.mubr.bf16.gmra.mrb[88].mxu0 %v2393_v13 }
 0x284   : > { %8640 = vmatprep.mubr.msk.bf16.mxu0 %vm1421_vm1, %v2399_v56 }
 0x28b   : > { %2864 = vmatmul.mubr.bf16.gmra.mrb[92].mxu0 %v2397_v40 }
 0x28c   : > { %8641 = vmatprep.mubr.msk.bf16.mxu0 %vm1421_vm1, %v2398_v22  ;;  %vm7674_vm1 = vcmask 916480  }
 0x293   : > { %2874 = vmatmul.mubr.bf16.gmra.mrb[96].mxu0 %v2396_v60 }
 0x2a6   : > { %v2635_v9 = vpop.f32.mrb[0].mxu0 }
 0x2a7   : > { %v2996_v17 = vadd.f32 %v10974_v63, %v2635_v9  ;;  %v2637_v36 = vpop.f32.mrb[1].mxu0 }
 0x2a8   : > { %v2997_v26 = vadd.f32 %v10977_v4, %v2637_v36  ;;  %v2639_v28 = vpop.f32.mrb[2].mxu0 }
 0x2a9   : > { %v3096_v39 = vmax.f32 %v2996_v17, 0.0  ;;  %v2998_v15 = vadd.f32 %v10974_v63, %v2639_v28  ;;  %v2641_v51 = vpop.f32.mrb[3].mxu0 }
 0x2aa   : > { %v3097_v52 = vmax.f32 %v2997_v26, 0.0  ;;  %v2999_v24 = vadd.f32 %v10977_v4, %v2641_v51 }
 0x2ab   : > { %v3098_v55 = vmax.f32 %v2998_v15, 0.0  ;;  %v3297_v35 = vrot.slane %v3096_v39, 1 }
 0x2ac   : > { %v3099_v34 = vmax.f32 %v2999_v24, 0.0  ;;  %v3300_v18 = vrot.slane %v3097_v52, 1 }
 0x2ad   : > { %v3298_v59 = vrot.slane %v3098_v55, 1 }
 0x2ae   : > { %v3301_v37 = vrot.slane %v3099_v34, 1  ;;  %v2645_v42 = vpop.f32.mrb[4].mxu0 }
 0x2af   : > { %v3000_v33 = vadd.f32 %v10974_v63, %v2645_v42  ;;  %v2647_v11 = vpop.f32.mrb[5].mxu0  ;;  %v3299_v45 = vsel %vm2301_vm3, %v3297_v35, %v3298_v59 }
 0x2b0   : > { %v3001_v46 = vadd.f32 %v10977_v4, %v2647_v11  ;;  %v2649_v16 = vpop.f32.mrb[6].mxu0  ;;  %v3302_v53 = vsel %vm2301_vm3, %v3300_v18, %v3301_v37  ;;  %v3595_v43 = vmax.f32 %v3096_v39, %v3299_v45 }
 0x2b1   : > { %v3100_v48 = vmax.f32 %v3000_v33, 0.0  ;;  %v3002_v21 = vadd.f32 %v10974_v63, %v2649_v16  ;;  %v2651_v29 = vpop.f32.mrb[7].mxu0  ;;  %v3596_v5 = vmax.f32 %v3097_v52, %v3302_v53 }
 0x2b2   : > { %v3101_v10 = vmax.f32 %v3001_v46, 0.0  ;;  %v3003_v32 = vadd.f32 %v10977_v4, %v2651_v29 }
 0x2b3   : > { %v3303_v20 = vrot.slane %v3100_v48, 1  ;;  %v3102_v31 = vmax.f32 %v3002_v21, 0.0 }
 0x2b4   : > { %v3305_v41 = vrot.slane %v3101_v10, 1  ;;  %v3103_v58 = vmax.f32 %v3003_v32, 0.0 }
 0x2b5   : > { %v3307_v2 = vrot.slane %v3102_v31, 1  ;;  %v3304_v12 = vsel %vm2301_vm3, %v3298_v59, %v3303_v20 }
 0x2b6   : > { %v3309_v50 = vrot.slane %v3103_v58, 1  ;;  %v2655_v27 = vpop.f32.mrb[8].mxu0  ;;  %v3306_v38 = vsel %vm2301_vm3, %v3301_v37, %v3305_v41  ;;  %v3597_v54 = vmax.f32 %v3098_v55, %v3304_v12 }
 0x2b7   : > { %v3004_v61 = vadd.f32 %v10974_v63, %v2655_v27  ;;  %v2657_v3 = vpop.f32.mrb[9].mxu0  ;;  %v3598_v1 = vmax.f32 %v3099_v34, %v3306_v38  ;;  %v3308_v62 = vsel %vm2301_vm3, %v3303_v20, %v3307_v2 }
 0x2b8   : > { %v3005_v6 = vadd.f32 %v10977_v4, %v2657_v3  ;;  %v2659_v8 = vpop.f32.mrb[10].mxu0  ;;  %v3743_v57 = vpack.c.bf16 %v3597_v54, %v3595_v43  ;;  %v3310_v19 = vsel %vm2301_vm3, %v3305_v41, %v3309_v50  ;;  %v3599_v23 = vmax.f32 %v3100_v48, %v3308_v62 }
 0x2b9   : > { %v3104_v22 = vmax.f32 %v3004_v61, 0.0  ;;  %v3006_v25 = vadd.f32 %v10974_v63, %v2659_v8  ;;  %v2661_v13 = vpop.f32.mrb[11].mxu0  ;;  %v3744_v30 = vpack.c.bf16 %v3598_v1, %v3596_v5  ;;  %v3600_v56 = vmax.f32 %v3101_v10, %v3310_v19 }
 0x2ba   : > { %v3105_v60 = vmax.f32 %v3005_v6, 0.0  ;;  %v3007_v40 = vadd.f32 %v10977_v4, %v2661_v13 }
 0x2bb   : > { %v3311_v7 = vrot.slane %v3104_v22, 1  ;;  %v3106_v14 = vmax.f32 %v3006_v25, 0.0  ;;  %4067 = vmatprep.subr.bf16.mxu1 %v3744_v30 }
 0x2bc   : > { %v3313_v0 = vrot.slane %v3105_v60, 1  ;;  %v3107_v9 = vmax.f32 %v3007_v40, 0.0  ;;  %4068 = vmatpush1.bf16.msra.mxu1 %v3743_v57 }
 0x2bd   : > { %v3315_v17 = vrot.slane %v3106_v14, 1  ;;  %v3312_v36 = vsel %vm2301_vm3, %v3307_v2, %v3311_v7 }
 0x2be   : > { %v3317_v26 = vrot.slane %v3107_v9, 1  ;;  %v2665_v28 = vpop.f32.mrb[12].mxu0  ;;  %v3314_v39 = vsel %vm2301_vm3, %v3309_v50, %v3313_v0  ;;  %v3601_v15 = vmax.f32 %v3102_v31, %v3312_v36 }
 0x2bf   : > { %v3008_v51 = vadd.f32 %v10974_v63, %v2665_v28  ;;  %v2667_v52 = vpop.f32.mrb[13].mxu0  ;;  %v3602_v24 = vmax.f32 %v3103_v58, %v3314_v39  ;;  %v3316_v55 = vsel %vm2301_vm3, %v3311_v7, %v3315_v17 }
 0x2c0   : > { %v3009_v34 = vadd.f32 %v10977_v4, %v2667_v52  ;;  %v2669_v35 = vpop.f32.mrb[14].mxu0  ;;  %v3745_v59 = vpack.c.bf16 %v3601_v15, %v3599_v23  ;;  %v3318_v18 = vsel %vm2301_vm3, %v3313_v0, %v3317_v26  ;;  %v3603_v37 = vmax.f32 %v3104_v22, %v3316_v55 }
 0x2c1   : > { %v3108_v42 = vmax.f32 %v3008_v51, 0.0  ;;  %v3010_v33 = vadd.f32 %v10974_v63, %v2669_v35  ;;  %v2671_v11 = vpop.f32.mrb[15].mxu0  ;;  %v3746_v45 = vpack.c.bf16 %v3602_v24, %v3600_v56  ;;  %v3604_v46 = vmax.f32 %v3105_v60, %v3318_v18 }
 0x2c2   : > { %v3109_v16 = vmax.f32 %v3009_v34, 0.0  ;;  %v3011_v53 = vadd.f32 %v10977_v4, %v2671_v11 }
 0x2c3   : > { %v3319_v43 = vrot.slane %v3108_v42, 1  ;;  %v3110_v48 = vmax.f32 %v3010_v33, 0.0  ;;  %4069 = vmatprep.subr.bf16.mxu1 %v3746_v45 }
 0x2c4   : > { %v3321_v21 = vrot.slane %v3109_v16, 1  ;;  %v3111_v29 = vmax.f32 %v3011_v53, 0.0  ;;  %4070 = vmatpush1.bf16.msra.mxu1 %v3745_v59 }
 0x2c5   : > { %v3323_v5 = vrot.slane %v3110_v48, 1  ;;  %v3320_v10 = vsel %vm2301_vm3, %v3315_v17, %v3319_v43 }
 0x2c6   : > { %v3325_v32 = vrot.slane %v3111_v29, 1  ;;  %v2675_v20 = vpop.f32.mrb[16].mxu0  ;;  %v3322_v31 = vsel %vm2301_vm3, %v3317_v26, %v3321_v21  ;;  %v3605_v41 = vmax.f32 %v3106_v14, %v3320_v10 }
 0x2c7   : > { %v3012_v58 = vadd.f32 %v10974_v63, %v2675_v20  ;;  %v2677_v47 = vpop.f32.mrb[17].mxu0  ;;  %v3606_v2 = vmax.f32 %v3107_v9, %v3322_v31  ;;  %v3324_v12 = vsel %vm2301_vm3, %v3319_v43, %v3323_v5 }
 0x2c8   : > { %v3013_v50 = vadd.f32 %v10977_v4, %v2677_v47  ;;  %v2679_v27 = vpop.f32.mrb[18].mxu0  ;;  %v3747_v38 = vpack.c.bf16 %v3605_v41, %v3603_v37  ;;  %v3326_v54 = vsel %vm2301_vm3, %v3321_v21, %v3325_v32  ;;  %v3607_v61 = vmax.f32 %v3108_v42, %v3324_v12 }
 0x2c9   : > { %v3112_v3 = vmax.f32 %v3012_v58, 0.0  ;;  %v3014_v1 = vadd.f32 %v10974_v63, %v2679_v27  ;;  %v2681_v62 = vpop.f32.mrb[19].mxu0  ;;  %v3748_v6 = vpack.c.bf16 %v3606_v2, %v3604_v46  ;;  %v3608_v8 = vmax.f32 %v3109_v16, %v3326_v54 }
 0x2ca   : > { %v3113_v57 = vmax.f32 %v3013_v50, 0.0  ;;  %v3015_v19 = vadd.f32 %v10977_v4, %v2681_v62 }
 0x2cb   : > { %v3327_v23 = vrot.slane %v3112_v3, 1  ;;  %v3114_v22 = vmax.f32 %v3014_v1, 0.0  ;;  %4071 = vmatprep.subr.bf16.mxu1 %v3748_v6 }
 0x2cc   : > { %v3329_v25 = vrot.slane %v3113_v57, 1  ;;  %v3115_v13 = vmax.f32 %v3015_v19, 0.0  ;;  %4072 = vmatpush1.bf16.msra.mxu1 %v3747_v38 }
 0x2cd   : > { %v3331_v30 = vrot.slane %v3114_v22, 1  ;;  %v3328_v56 = vsel %vm2301_vm3, %v3323_v5, %v3327_v23 }
 0x2ce   : > { %v3333_v60 = vrot.slane %v3115_v13, 1  ;;  %v2685_v40 = vpop.f32.mrb[20].mxu0  ;;  %v3330_v7 = vsel %vm2301_vm3, %v3325_v32, %v3329_v25  ;;  %v3609_v14 = vmax.f32 %v3110_v48, %v3328_v56 }
 0x2cf   : > { %v3016_v0 = vadd.f32 %v10974_v63, %v2685_v40  ;;  %v2687_v9 = vpop.f32.mrb[21].mxu0  ;;  %v3610_v17 = vmax.f32 %v3111_v29, %v3330_v7  ;;  %v3332_v36 = vsel %vm2301_vm3, %v3327_v23, %v3331_v30 }
 0x2d0   : > { %v3017_v26 = vadd.f32 %v10977_v4, %v2687_v9  ;;  %v2689_v28 = vpop.f32.mrb[22].mxu0  ;;  %v3749_v39 = vpack.c.bf16 %v3609_v14, %v3607_v61  ;;  %v3334_v15 = vsel %vm2301_vm3, %v3329_v25, %v3333_v60  ;;  %v3611_v51 = vmax.f32 %v3112_v3, %v3332_v36 }
 0x2d1   : > { %v3116_v52 = vmax.f32 %v3016_v0, 0.0  ;;  %v3018_v24 = vadd.f32 %v10974_v63, %v2689_v28  ;;  %v2691_v55 = vpop.f32.mrb[23].mxu0  ;;  %v3750_v34 = vpack.c.bf16 %v3610_v17, %v3608_v8  ;;  %v3612_v35 = vmax.f32 %v3113_v57, %v3334_v15 }
 0x2d2   : > { %v3117_v59 = vmax.f32 %v3017_v26, 0.0  ;;  %v3019_v18 = vadd.f32 %v10977_v4, %v2691_v55 }
 0x2d3   : > { %v3335_v37 = vrot.slane %v3116_v52, 1  ;;  %v3118_v42 = vmax.f32 %v3018_v24, 0.0  ;;  %4073 = vmatprep.subr.bf16.mxu1 %v3750_v34 }
 0x2d4   : > { %v3337_v33 = vrot.slane %v3117_v59, 1  ;;  %v3119_v11 = vmax.f32 %v3019_v18, 0.0  ;;  %4074 = vmatpush1.bf16.msra.mxu1 %v3749_v39 }
 0x2d5   : > { %v3339_v45 = vrot.slane %v3118_v42, 1  ;;  %v3336_v46 = vsel %vm2301_vm3, %v3331_v30, %v3335_v37 }
 0x2d6   : > { %v3341_v16 = vrot.slane %v3119_v11, 1  ;;  %v2695_v53 = vpop.f32.mrb[24].mxu0  ;;  %v3338_v43 = vsel %vm2301_vm3, %v3333_v60, %v3337_v33  ;;  %v3613_v48 = vmax.f32 %v3114_v22, %v3336_v46 }
 0x2d7   : > { %v3020_v21 = vadd.f32 %v10974_v63, %v2695_v53  ;;  %v2697_v29 = vpop.f32.mrb[25].mxu0  ;;  %v3614_v5 = vmax.f32 %v3115_v13, %v3338_v43  ;;  %v3340_v10 = vsel %vm2301_vm3, %v3335_v37, %v3339_v45 }
 0x2d8   : > { %v3021_v32 = vadd.f32 %v10977_v4, %v2697_v29  ;;  %v2699_v20 = vpop.f32.mrb[26].mxu0  ;;  %v3751_v31 = vpack.c.bf16 %v3613_v48, %v3611_v51  ;;  %v3342_v41 = vsel %vm2301_vm3, %v3337_v33, %v3341_v16  ;;  %v3615_v58 = vmax.f32 %v3116_v52, %v3340_v10 }
 0x2d9   : > { %v3120_v47 = vmax.f32 %v3020_v21, 0.0  ;;  %v3022_v2 = vadd.f32 %v10974_v63, %v2699_v20  ;;  %v2701_v12 = vpop.f32.mrb[27].mxu0  ;;  %v3752_v50 = vpack.c.bf16 %v3614_v5, %v3612_v35  ;;  %v3616_v27 = vmax.f32 %v3117_v59, %v3342_v41 }
 0x2da   : > { %v3121_v38 = vmax.f32 %v3021_v32, 0.0  ;;  %v3023_v54 = vadd.f32 %v10977_v4, %v2701_v12 }
 0x2db   : > { %v3343_v61 = vrot.slane %v3120_v47, 1  ;;  %v3122_v3 = vmax.f32 %v3022_v2, 0.0  ;;  %4075 = vmatprep.subr.bf16.mxu1 %v3752_v50 }
 0x2dc   : > { %v3345_v1 = vrot.slane %v3121_v38, 1  ;;  %v3123_v62 = vmax.f32 %v3023_v54, 0.0  ;;  %4076 = vmatpush1.bf16.msra.mxu1 %v3751_v31 }
 0x2dd   : > { %v3347_v6 = vrot.slane %v3122_v3, 1  ;;  %v3344_v8 = vsel %vm2301_vm3, %v3339_v45, %v3343_v61 }
 0x2de   : > { %v3349_v57 = vrot.slane %v3123_v62, 1  ;;  %v2705_v19 = vpop.f32.mrb[28].mxu0  ;;  %v3346_v23 = vsel %vm2301_vm3, %v3341_v16, %v3345_v1  ;;  %v3617_v22 = vmax.f32 %v3118_v42, %v3344_v8 }
 0x2df   : > { %v3024_v25 = vadd.f32 %v10974_v63, %v2705_v19  ;;  %v2707_v13 = vpop.f32.mrb[29].mxu0  ;;  %v3618_v30 = vmax.f32 %v3119_v11, %v3346_v23  ;;  %v3348_v56 = vsel %vm2301_vm3, %v3343_v61, %v3347_v6 }
 0x2e0   : > { %v3025_v60 = vadd.f32 %v10977_v4, %v2707_v13  ;;  %v2709_v40 = vpop.f32.mrb[30].mxu0  ;;  %v3753_v7 = vpack.c.bf16 %v3617_v22, %v3615_v58  ;;  %v3350_v14 = vsel %vm2301_vm3, %v3345_v1, %v3349_v57  ;;  %v3619_v0 = vmax.f32 %v3120_v47, %v3348_v56 }
 0x2e1   : > { %v3124_v9 = vmax.f32 %v3024_v25, 0.0  ;;  %v3026_v17 = vadd.f32 %v10974_v63, %v2709_v40  ;;  %v2711_v36 = vpop.f32.mrb[31].mxu0  ;;  %v3754_v26 = vpack.c.bf16 %v3618_v30, %v3616_v27  ;;  %v3620_v28 = vmax.f32 %v3121_v38, %v3350_v14 }
 0x2e2   : > { %v3125_v39 = vmax.f32 %v3025_v60, 0.0  ;;  %v3027_v15 = vadd.f32 %v10977_v4, %v2711_v36 }
 0x2e3   : > { %v3351_v51 = vrot.slane %v3124_v9, 1  ;;  %v3126_v52 = vmax.f32 %v3026_v17, 0.0  ;;  %4077 = vmatprep.subr.bf16.mxu1 %v3754_v26 }
 0x2e4   : > { %v3353_v24 = vrot.slane %v3125_v39, 1  ;;  %v3127_v55 = vmax.f32 %v3027_v15, 0.0  ;;  %4078 = vmatpush1.bf16.msra.mxu1 %v3753_v7 }
 0x2e5   : > { %v3355_v34 = vrot.slane %v3126_v52, 1  ;;  %v3352_v35 = vsel %vm2301_vm3, %v3347_v6, %v3351_v51 }
 0x2e6   : > { %v3357_v59 = vrot.slane %v3127_v55, 1  ;;  %v2715_v18 = vpop.f32.mrb[32].mxu0  ;;  %v3354_v37 = vsel %vm2301_vm3, %v3349_v57, %v3353_v24  ;;  %v3621_v42 = vmax.f32 %v3122_v3, %v3352_v35 }
 0x2e7   : > { %v3028_v33 = vadd.f32 %v10974_v63, %v2715_v18  ;;  %v2717_v11 = vpop.f32.mrb[33].mxu0  ;;  %v3622_v45 = vmax.f32 %v3123_v62, %v3354_v37  ;;  %v3356_v46 = vsel %vm2301_vm3, %v3351_v51, %v3355_v34 }
 0x2e8   : > { %v3029_v16 = vadd.f32 %v10977_v4, %v2717_v11  ;;  %v2719_v53 = vpop.f32.mrb[34].mxu0  ;;  %v3755_v43 = vpack.c.bf16 %v3621_v42, %v3619_v0  ;;  %v3358_v48 = vsel %vm2301_vm3, %v3353_v24, %v3357_v59  ;;  %v3623_v21 = vmax.f32 %v3124_v9, %v3356_v46 }
 0x2e9   : > { %v3128_v29 = vmax.f32 %v3028_v33, 0.0  ;;  %v3030_v5 = vadd.f32 %v10974_v63, %v2719_v53  ;;  %v2721_v10 = vpop.f32.mrb[35].mxu0  ;;  %v3756_v32 = vpack.c.bf16 %v3622_v45, %v3620_v28  ;;  %v3624_v20 = vmax.f32 %v3125_v39, %v3358_v48 }
 0x2ea   : > { %v3129_v31 = vmax.f32 %v3029_v16, 0.0  ;;  %v3031_v41 = vadd.f32 %v10977_v4, %v2721_v10 }
 0x2eb   : > { %v3359_v58 = vrot.slane %v3128_v29, 1  ;;  %v3130_v47 = vmax.f32 %v3030_v5, 0.0  ;;  %4079 = vmatprep.subr.bf16.mxu1 %v3756_v32 }
 0x2ec   : > { %v3361_v2 = vrot.slane %v3129_v31, 1  ;;  %v3131_v12 = vmax.f32 %v3031_v41, 0.0  ;;  %4080 = vmatpush1.bf16.msra.mxu1 %v3755_v43 }
 0x2ed   : > { %v3363_v50 = vrot.slane %v3130_v47, 1  ;;  %v3360_v27 = vsel %vm2301_vm3, %v3355_v34, %v3359_v58 }
 0x2ee   : > { %v3365_v38 = vrot.slane %v3131_v12, 1  ;;  %v2725_v54 = vpop.f32.mrb[36].mxu0  ;;  %v3362_v61 = vsel %vm2301_vm3, %v3357_v59, %v3361_v2  ;;  %v3625_v3 = vmax.f32 %v3126_v52, %v3360_v27 }
 0x2ef   : > { %v3032_v1 = vadd.f32 %v10974_v63, %v2725_v54  ;;  %v2727_v62 = vpop.f32.mrb[37].mxu0  ;;  %v3626_v6 = vmax.f32 %v3127_v55, %v3362_v61  ;;  %v3364_v8 = vsel %vm2301_vm3, %v3359_v58, %v3363_v50 }
 0x2f0   : > { %v3033_v57 = vadd.f32 %v10977_v4, %v2727_v62  ;;  %v2729_v19 = vpop.f32.mrb[38].mxu0  ;;  %v3757_v23 = vpack.c.bf16 %v3625_v3, %v3623_v21  ;;  %v3366_v22 = vsel %vm2301_vm3, %v3361_v2, %v3365_v38  ;;  %v3627_v25 = vmax.f32 %v3128_v29, %v3364_v8 }
 0x2f1   : > { %v3132_v13 = vmax.f32 %v3032_v1, 0.0  ;;  %v3034_v30 = vadd.f32 %v10974_v63, %v2729_v19  ;;  %v2731_v56 = vpop.f32.mrb[39].mxu0  ;;  %v3758_v60 = vpack.c.bf16 %v3626_v6, %v3624_v20  ;;  %v3628_v40 = vmax.f32 %v3129_v31, %v3366_v22 }
 0x2f2   : > { %v3133_v7 = vmax.f32 %v3033_v57, 0.0  ;;  %v3035_v14 = vadd.f32 %v10977_v4, %v2731_v56 }
 0x2f3   : > { %v3367_v0 = vrot.slane %v3132_v13, 1  ;;  %v3134_v9 = vmax.f32 %v3034_v30, 0.0  ;;  %4081 = vmatprep.subr.bf16.mxu1 %v3758_v60 }
 0x2f4   : > { %v3369_v17 = vrot.slane %v3133_v7, 1  ;;  %v3135_v36 = vmax.f32 %v3035_v14, 0.0  ;;  %4082 = vmatpush1.bf16.msra.mxu1 %v3757_v23 }
 0x2f5   : > { %v3371_v26 = vrot.slane %v3134_v9, 1  ;;  %v3368_v28 = vsel %vm2301_vm3, %v3363_v50, %v3367_v0 }
 0x2f6   : > { %v3373_v39 = vrot.slane %v3135_v36, 1  ;;  %v2735_v15 = vpop.f32.mrb[40].mxu0  ;;  %v3370_v51 = vsel %vm2301_vm3, %v3365_v38, %v3369_v17  ;;  %v3629_v52 = vmax.f32 %v3130_v47, %v3368_v28 }
 0x2f7   : > { %v3036_v24 = vadd.f32 %v10974_v63, %v2735_v15  ;;  %v2737_v55 = vpop.f32.mrb[41].mxu0  ;;  %v3630_v34 = vmax.f32 %v3131_v12, %v3370_v51  ;;  %v3372_v35 = vsel %vm2301_vm3, %v3367_v0, %v3371_v26 }
 0x2f8   : > { %v3037_v59 = vadd.f32 %v10977_v4, %v2737_v55  ;;  %v2739_v18 = vpop.f32.mrb[42].mxu0  ;;  %v3759_v37 = vpack.c.bf16 %v3629_v52, %v3627_v25  ;;  %v3374_v42 = vsel %vm2301_vm3, %v3369_v17, %v3373_v39  ;;  %v3631_v33 = vmax.f32 %v3132_v13, %v3372_v35 }
 0x2f9   : > { %v3136_v11 = vmax.f32 %v3036_v24, 0.0  ;;  %v3038_v45 = vadd.f32 %v10974_v63, %v2739_v18  ;;  %v2741_v46 = vpop.f32.mrb[43].mxu0  ;;  %v3760_v16 = vpack.c.bf16 %v3630_v34, %v3628_v40  ;;  %v3632_v53 = vmax.f32 %v3133_v7, %v3374_v42 }
 0x2fa   : > { %v3137_v43 = vmax.f32 %v3037_v59, 0.0  ;;  %v3039_v48 = vadd.f32 %v10977_v4, %v2741_v46 }
 0x2fb   : > { %v3375_v21 = vrot.slane %v3136_v11, 1  ;;  %v3138_v29 = vmax.f32 %v3038_v45, 0.0  ;;  %4083 = vmatprep.subr.bf16.mxu1 %v3760_v16 }
 0x2fc   : > { %v3377_v5 = vrot.slane %v3137_v43, 1  ;;  %v3139_v10 = vmax.f32 %v3039_v48, 0.0  ;;  %4084 = vmatpush1.bf16.msra.mxu1 %v3759_v37 }
 0x2fd   : > { %v3379_v32 = vrot.slane %v3138_v29, 1  ;;  %v3376_v20 = vsel %vm2301_vm3, %v3371_v26, %v3375_v21 }
 0x2fe   : > { %v3381_v31 = vrot.slane %v3139_v10, 1  ;;  %v2745_v41 = vpop.f32.mrb[44].mxu0  ;;  %v3378_v58 = vsel %vm2301_vm3, %v3373_v39, %v3377_v5  ;;  %v3633_v47 = vmax.f32 %v3134_v9, %v3376_v20 }
 0x2ff   : > { %v3040_v2 = vadd.f32 %v10974_v63, %v2745_v41  ;;  %v2747_v12 = vpop.f32.mrb[45].mxu0  ;;  %v3634_v50 = vmax.f32 %v3135_v36, %v3378_v58  ;;  %v3380_v27 = vsel %vm2301_vm3, %v3375_v21, %v3379_v32 }
 0x300   : > { %v3041_v38 = vadd.f32 %v10977_v4, %v2747_v12  ;;  %v2749_v54 = vpop.f32.mrb[46].mxu0  ;;  %v3761_v61 = vpack.c.bf16 %v3633_v47, %v3631_v33  ;;  %v3382_v3 = vsel %vm2301_vm3, %v3377_v5, %v3381_v31  ;;  %v3635_v1 = vmax.f32 %v3136_v11, %v3380_v27 }
 0x301   : > { %v3140_v62 = vmax.f32 %v3040_v2, 0.0  ;;  %v3042_v6 = vadd.f32 %v10974_v63, %v2749_v54  ;;  %v2751_v8 = vpop.f32.mrb[47].mxu0  ;;  %v3762_v57 = vpack.c.bf16 %v3634_v50, %v3632_v53  ;;  %v3636_v19 = vmax.f32 %v3137_v43, %v3382_v3 }
 0x302   : > { %v3141_v23 = vmax.f32 %v3041_v38, 0.0  ;;  %v3043_v22 = vadd.f32 %v10977_v4, %v2751_v8 }
 0x303   : > { %v3383_v25 = vrot.slane %v3140_v62, 1  ;;  %v3142_v13 = vmax.f32 %v3042_v6, 0.0  ;;  %4085 = vmatprep.subr.bf16.mxu1 %v3762_v57 }
 0x304   : > { %v3385_v30 = vrot.slane %v3141_v23, 1  ;;  %v3143_v56 = vmax.f32 %v3043_v22, 0.0  ;;  %4086 = vmatpush1.bf16.msra.mxu1 %v3761_v61 }
 0x305   : > { %v3387_v60 = vrot.slane %v3142_v13, 1  ;;  %v3384_v40 = vsel %vm2301_vm3, %v3379_v32, %v3383_v25 }
 0x306   : > { %v3389_v7 = vrot.slane %v3143_v56, 1  ;;  %v2755_v14 = vpop.f32.mrb[48].mxu0  ;;  %v3386_v0 = vsel %vm2301_vm3, %v3381_v31, %v3385_v30  ;;  %v3637_v9 = vmax.f32 %v3138_v29, %v3384_v40 }
 0x307   : > { %v3044_v17 = vadd.f32 %v10974_v63, %v2755_v14  ;;  %v2757_v36 = vpop.f32.mrb[49].mxu0  ;;  %v3638_v26 = vmax.f32 %v3139_v10, %v3386_v0  ;;  %v3388_v28 = vsel %vm2301_vm3, %v3383_v25, %v3387_v60 }
 0x308   : > { %v3045_v39 = vadd.f32 %v10977_v4, %v2757_v36  ;;  %v2759_v15 = vpop.f32.mrb[50].mxu0  ;;  %v3763_v51 = vpack.c.bf16 %v3637_v9, %v3635_v1  ;;  %v3390_v52 = vsel %vm2301_vm3, %v3385_v30, %v3389_v7  ;;  %v3639_v24 = vmax.f32 %v3140_v62, %v3388_v28 }
 0x309   : > { %v3144_v55 = vmax.f32 %v3044_v17, 0.0  ;;  %v3046_v34 = vadd.f32 %v10974_v63, %v2759_v15  ;;  %v2761_v35 = vpop.f32.mrb[51].mxu0  ;;  %v3764_v59 = vpack.c.bf16 %v3638_v26, %v3636_v19  ;;  %v3640_v18 = vmax.f32 %v3141_v23, %v3390_v52 }
 0x30a   : > { %v3145_v37 = vmax.f32 %v3045_v39, 0.0  ;;  %v3047_v42 = vadd.f32 %v10977_v4, %v2761_v35 }
 0x30b   : > { %v3391_v33 = vrot.slane %v3144_v55, 1  ;;  %v3146_v11 = vmax.f32 %v3046_v34, 0.0  ;;  %4087 = vmatprep.subr.bf16.mxu1 %v3764_v59 }
 0x30c   : > { %v3393_v45 = vrot.slane %v3145_v37, 1  ;;  %v3147_v46 = vmax.f32 %v3047_v42, 0.0  ;;  %4088 = vmatpush1.bf16.msra.mxu1 %v3763_v51 }
 0x30d   : > { %v3395_v16 = vrot.slane %v3146_v11, 1  ;;  %v3392_v53 = vsel %vm2301_vm3, %v3387_v60, %v3391_v33 }
 0x30e   : > { %v3397_v43 = vrot.slane %v3147_v46, 1  ;;  %v2765_v48 = vpop.f32.mrb[52].mxu0  ;;  %v3394_v21 = vsel %vm2301_vm3, %v3389_v7, %v3393_v45  ;;  %v3641_v29 = vmax.f32 %v3142_v13, %v3392_v53 }
 0x30f   : > { %v3048_v5 = vadd.f32 %v10974_v63, %v2765_v48  ;;  %v2767_v10 = vpop.f32.mrb[53].mxu0  ;;  %v3642_v32 = vmax.f32 %v3143_v56, %v3394_v21  ;;  %v3396_v20 = vsel %vm2301_vm3, %v3391_v33, %v3395_v16 }
 0x310   : > { %v3049_v31 = vadd.f32 %v10977_v4, %v2767_v10  ;;  %v2769_v41 = vpop.f32.mrb[54].mxu0  ;;  %v3765_v58 = vpack.c.bf16 %v3641_v29, %v3639_v24  ;;  %v3398_v47 = vsel %vm2301_vm3, %v3393_v45, %v3397_v43  ;;  %v3643_v2 = vmax.f32 %v3144_v55, %v3396_v20 }
 0x311   : > { %v3148_v12 = vmax.f32 %v3048_v5, 0.0  ;;  %v3050_v50 = vadd.f32 %v10974_v63, %v2769_v41  ;;  %v2771_v27 = vpop.f32.mrb[55].mxu0  ;;  %v3766_v38 = vpack.c.bf16 %v3642_v32, %v3640_v18  ;;  %v3644_v54 = vmax.f32 %v3145_v37, %v3398_v47 }
 0x312   : > { %v3149_v61 = vmax.f32 %v3049_v31, 0.0  ;;  %v3051_v3 = vadd.f32 %v10977_v4, %v2771_v27 }
 0x313   : > { %v3399_v1 = vrot.slane %v3148_v12, 1  ;;  %v3150_v62 = vmax.f32 %v3050_v50, 0.0  ;;  %4089 = vmatprep.subr.bf16.mxu1 %v3766_v38 }
 0x314   : > { %v3401_v6 = vrot.slane %v3149_v61, 1  ;;  %v3151_v8 = vmax.f32 %v3051_v3, 0.0  ;;  %4090 = vmatpush1.bf16.msra.mxu1 %v3765_v58 }
 0x315   : > { %v3403_v57 = vrot.slane %v3150_v62, 1  ;;  %v3400_v19 = vsel %vm2301_vm3, %v3395_v16, %v3399_v1 }
 0x316   : > { %v3405_v23 = vrot.slane %v3151_v8, 1  ;;  %v2775_v22 = vpop.f32.mrb[56].mxu0  ;;  %v3402_v25 = vsel %vm2301_vm3, %v3397_v43, %v3401_v6  ;;  %v3645_v13 = vmax.f32 %v3146_v11, %v3400_v19 }
 0x317   : > { %v3052_v30 = vadd.f32 %v10974_v63, %v2775_v22  ;;  %v2777_v56 = vpop.f32.mrb[57].mxu0  ;;  %v3646_v60 = vmax.f32 %v3147_v46, %v3402_v25  ;;  %v3404_v40 = vsel %vm2301_vm3, %v3399_v1, %v3403_v57 }
 0x318   : > { %v3053_v7 = vadd.f32 %v10977_v4, %v2777_v56  ;;  %v2779_v14 = vpop.f32.mrb[58].mxu0  ;;  %v3767_v0 = vpack.c.bf16 %v3645_v13, %v3643_v2  ;;  %v3406_v9 = vsel %vm2301_vm3, %v3401_v6, %v3405_v23  ;;  %v3647_v17 = vmax.f32 %v3148_v12, %v3404_v40 }
 0x319   : > { %v3152_v36 = vmax.f32 %v3052_v30, 0.0  ;;  %v3054_v26 = vadd.f32 %v10974_v63, %v2779_v14  ;;  %v2781_v28 = vpop.f32.mrb[59].mxu0  ;;  %v3768_v39 = vpack.c.bf16 %v3646_v60, %v3644_v54  ;;  %v3648_v15 = vmax.f32 %v3149_v61, %v3406_v9 }
 0x31a   : > { %v3153_v51 = vmax.f32 %v3053_v7, 0.0  ;;  %v3055_v52 = vadd.f32 %v10977_v4, %v2781_v28 }
 0x31b   : > { %v3407_v24 = vrot.slane %v3152_v36, 1  ;;  %v3154_v55 = vmax.f32 %v3054_v26, 0.0  ;;  %4091 = vmatprep.subr.bf16.mxu1 %v3768_v39 }
 0x31c   : > { %v3409_v34 = vrot.slane %v3153_v51, 1  ;;  %v3155_v35 = vmax.f32 %v3055_v52, 0.0  ;;  %4092 = vmatpush1.bf16.msra.mxu1 %v3767_v0 }
 0x31d   : > { %v3411_v59 = vrot.slane %v3154_v55, 1  ;;  %v3408_v18 = vsel %vm2301_vm3, %v3403_v57, %v3407_v24 }
 0x31e   : > { %v3413_v37 = vrot.slane %v3155_v35, 1  ;;  %v2785_v42 = vpop.f32.mrb[60].mxu0  ;;  %v3410_v33 = vsel %vm2301_vm3, %v3405_v23, %v3409_v34  ;;  %v3649_v11 = vmax.f32 %v3150_v62, %v3408_v18 }
 0x31f   : > { %v3056_v45 = vadd.f32 %v10974_v63, %v2785_v42  ;;  %v2787_v46 = vpop.f32.mrb[61].mxu0  ;;  %v3650_v16 = vmax.f32 %v3151_v8, %v3410_v33  ;;  %v3412_v53 = vsel %vm2301_vm3, %v3407_v24, %v3411_v59 }
 0x320   : > { %v3057_v43 = vadd.f32 %v10977_v4, %v2787_v46  ;;  %v2789_v48 = vpop.f32.mrb[62].mxu0  ;;  %v3769_v21 = vpack.c.bf16 %v3649_v11, %v3647_v17  ;;  %v3414_v29 = vsel %vm2301_vm3, %v3409_v34, %v3413_v37  ;;  %v3651_v5 = vmax.f32 %v3152_v36, %v3412_v53 }
 0x321   : > { %v3156_v10 = vmax.f32 %v3056_v45, 0.0  ;;  %v3058_v32 = vadd.f32 %v10974_v63, %v2789_v48  ;;  %v2791_v20 = vpop.f32.mrb[63].mxu0  ;;  %v3770_v31 = vpack.c.bf16 %v3650_v16, %v3648_v15  ;;  %v3652_v41 = vmax.f32 %v3153_v51, %v3414_v29 }
 0x322   : > { %v3157_v58 = vmax.f32 %v3057_v43, 0.0  ;;  %v3059_v47 = vadd.f32 %v10977_v4, %v2791_v20 }
 0x323   : > { %v3415_v2 = vrot.slane %v3156_v10, 1  ;;  %v3158_v12 = vmax.f32 %v3058_v32, 0.0  ;;  %4093 = vmatprep.subr.bf16.mxu1 %v3770_v31  ;;  %v9816_v32 = vld [vmem:[%s12686_s30] ss:$16 sps:$4 sm:$0xff]  }
 0x324   : > { %v3417_v50 = vrot.slane %v3157_v58, 1  ;;  %v3159_v27 = vmax.f32 %v3059_v47, 0.0  ;;  %4094 = vmatpush1.bf16.msra.mxu1 %v3769_v21 }
 0x325   : > { %v3419_v38 = vrot.slane %v3158_v12, 1  ;;  %v3416_v54 = vsel %vm2301_vm3, %v3411_v59, %v3415_v2 }
 0x326   : > { %v3421_v61 = vrot.slane %v3159_v27, 1  ;;  %v2795_v3 = vpop.f32.mrb[64].mxu0  ;;  %v3418_v1 = vsel %vm2301_vm3, %v3413_v37, %v3417_v50  ;;  %v3653_v62 = vmax.f32 %v3154_v55, %v3416_v54 }
 0x327   : > { %v3060_v6 = vadd.f32 %v10974_v63, %v2795_v3  ;;  %v2797_v8 = vpop.f32.mrb[65].mxu0  ;;  %v3654_v57 = vmax.f32 %v3155_v35, %v3418_v1  ;;  %v3420_v19 = vsel %vm2301_vm3, %v3415_v2, %v3419_v38 }
 0x328   : > { %v3061_v23 = vadd.f32 %v10977_v4, %v2797_v8  ;;  %v2799_v22 = vpop.f32.mrb[66].mxu0  ;;  %v3771_v25 = vpack.c.bf16 %v3653_v62, %v3651_v5  ;;  %v3422_v13 = vsel %vm2301_vm3, %v3417_v50, %v3421_v61  ;;  %v3655_v30 = vmax.f32 %v3156_v10, %v3420_v19 }
 0x329   : > { %v3160_v56 = vmax.f32 %v3060_v6, 0.0  ;;  %v3062_v60 = vadd.f32 %v10974_v63, %v2799_v22  ;;  %v2801_v40 = vpop.f32.mrb[67].mxu0  ;;  %v3772_v7 = vpack.c.bf16 %v3654_v57, %v3652_v41  ;;  %v3656_v14 = vmax.f32 %v3157_v58, %v3422_v13  ;;  %v9819_v41 = vld [vmem:[%s12686_s30 + $0x24] ss:$16 sps:$4 sm:$0xff]  }
 0x32a   : > { %v3161_v0 = vmax.f32 %v3061_v23, 0.0  ;;  %v3063_v9 = vadd.f32 %v10977_v4, %v2801_v40 }
 0x32b   : > { %v3423_v17 = vrot.slane %v3160_v56, 1  ;;  %v3162_v36 = vmax.f32 %v3062_v60, 0.0  ;;  %4095 = vmatprep.subr.bf16.mxu1 %v3772_v7  ;;  %v9821_v7 = vld [vmem:[%s12686_s30 + $0x20] ss:$16 sps:$4 sm:$0xff]  }
 0x32c   : > { %v3425_v26 = vrot.slane %v3161_v0, 1  ;;  %v3163_v28 = vmax.f32 %v3063_v9, 0.0  ;;  %4096 = vmatpush1.bf16.msra.mxu1 %v3771_v25  ;;  %v9822_v9 = vld [vmem:[%s12686_s30 + $0x44] ss:$16 sps:$4 sm:$0xff]  }
 0x32d   : > { %v3427_v39 = vrot.slane %v3162_v36, 1  ;;  %v3424_v15 = vsel %vm2301_vm3, %v3419_v38, %v3423_v17 }
 0x32e   : > { %v3429_v51 = vrot.slane %v3163_v28, 1  ;;  %v2805_v52 = vpop.f32.mrb[68].mxu0  ;;  %v3426_v24 = vsel %vm2301_vm3, %v3421_v61, %v3425_v26  ;;  %v3657_v55 = vmax.f32 %v3158_v12, %v3424_v15 }
 0x32f   : > { %v3428_v34 = vsel %vm2301_vm3, %v3423_v17, %v3427_v39  ;;  %v3064_v35 = vadd.f32 %v10974_v63, %v2805_v52  ;;  %v2807_v59 = vpop.f32.mrb[69].mxu0  ;;  %v3658_v18 = vmax.f32 %v3159_v27, %v3426_v24 }
 0x330   : > { %v3659_v37 = vmax.f32 %v3160_v56, %v3428_v34  ;;  %v3065_v42 = vadd.f32 %v10977_v4, %v2807_v59  ;;  %v2809_v33 = vpop.f32.mrb[70].mxu0  ;;  %v3773_v11 = vpack.c.bf16 %v3657_v55, %v3655_v30  ;;  %v3430_v45 = vsel %vm2301_vm3, %v3425_v26, %v3429_v51 }
 0x331   : > { %v3164_v46 = vmax.f32 %v3064_v35, 0.0  ;;  %v3066_v16 = vadd.f32 %v10974_v63, %v2809_v33  ;;  %v2811_v53 = vpop.f32.mrb[71].mxu0  ;;  %v3774_v43 = vpack.c.bf16 %v3658_v18, %v3656_v14  ;;  %v3660_v48 = vmax.f32 %v3161_v0, %v3430_v45 }
 0x332   : > { %v3165_v21 = vmax.f32 %v3065_v42, 0.0  ;;  %v3067_v29 = vadd.f32 %v10977_v4, %v2811_v53 }
 0x333   : > { %v3431_v5 = vrot.slane %v3164_v46, 1  ;;  %v3166_v10 = vmax.f32 %v3066_v16, 0.0  ;;  %4097 = vmatprep.subr.bf16.mxu1 %v3774_v43 }
 0x334   : > { %v3433_v20 = vrot.slane %v3165_v21, 1  ;;  %v3167_v31 = vmax.f32 %v3067_v29, 0.0  ;;  %4098 = vmatpush1.bf16.msra.mxu1 %v3773_v11 }
 0x335   : > { %v3432_v58 = vsel %vm2301_vm3, %v3427_v39, %v3431_v5  ;;  %v3435_v47 = vrot.slane %v3166_v10, 1 }
 0x336   : > { %v3661_v2 = vmax.f32 %v3162_v36, %v3432_v58  ;;  %v3437_v12 = vrot.slane %v3167_v31, 1  ;;  %v2815_v50 = vpop.f32.mrb[72].mxu0  ;;  %v3434_v27 = vsel %vm2301_vm3, %v3429_v51, %v3433_v20 }
 0x337   : > { %v3436_v38 = vsel %vm2301_vm3, %v3431_v5, %v3435_v47  ;;  %v3068_v54 = vadd.f32 %v10974_v63, %v2815_v50  ;;  %v2817_v61 = vpop.f32.mrb[73].mxu0  ;;  %4100 = vmatmul.mubr.bf16.vlgmr.msra.gmra.mrb[0].mxu1 %v9816_v32  ;;  %v3662_v3 = vmax.f32 %v3163_v28, %v3434_v27 }
 0x338   : > { %v3663_v1 = vmax.f32 %v3164_v46, %v3436_v38  ;;  %v3069_v62 = vadd.f32 %v10977_v4, %v2817_v61  ;;  %v2819_v6 = vpop.f32.mrb[74].mxu0  ;;  %v3775_v8 = vpack.c.bf16 %v3661_v2, %v3659_v37  ;;  %4109 = vmatprep.mubr.bf16.mxu1 %v9819_v41  ;;  %v3438_v57 = vsel %vm2301_vm3, %v3433_v20, %v3437_v12 }
 0x339   : > { %v3168_v19 = vmax.f32 %v3068_v54, 0.0  ;;  %v3070_v23 = vadd.f32 %v10974_v63, %v2819_v6  ;;  %v2821_v22 = vpop.f32.mrb[75].mxu0  ;;  %v3776_v25 = vpack.c.bf16 %v3662_v3, %v3660_v48  ;;  %v3664_v13 = vmax.f32 %v3165_v21, %v3438_v57  ;;  %v9824_v21 = vld [vmem:[%s12686_s30 + $0x40] ss:$16 sps:$4 sm:$0xff]  }
 0x33a   : > { %v3169_v30 = vmax.f32 %v3069_v62, 0.0  ;;  %v3071_v56 = vadd.f32 %v10977_v4, %v2821_v22 }
 0x33b   : > { %v3439_v60 = vrot.slane %v3168_v19, 1  ;;  %v3170_v40 = vmax.f32 %v3070_v23, 0.0  ;;  %4220 = vmatprep.subr.bf16.mxu1 %v3776_v25 }
 0x33c   : > { %v3441_v14 = vrot.slane %v3169_v30, 1  ;;  %v3171_v0 = vmax.f32 %v3071_v56, 0.0  ;;  %4221 = vmatpush1.bf16.msra.mxu1 %v3775_v8 }
 0x33d   : > { %v3440_v17 = vsel %vm2301_vm3, %v3435_v47, %v3439_v60  ;;  %v3443_v36 = vrot.slane %v3170_v40, 1 }
 0x33e   : > { %v3665_v26 = vmax.f32 %v3166_v10, %v3440_v17  ;;  %v3445_v28 = vrot.slane %v3171_v0, 1  ;;  %v2825_v39 = vpop.f32.mrb[76].mxu0  ;;  %v3442_v15 = vsel %vm2301_vm3, %v3437_v12, %v3441_v14  ;;  %v9825_v10 = vld [vmem:[%s12686_s30 + $0x64] ss:$16 sps:$4 sm:$0xff]  }
 0x33f   : > { %v3444_v51 = vsel %vm2301_vm3, %v3439_v60, %v3443_v36  ;;  %v3072_v52 = vadd.f32 %v10974_v63, %v2825_v39  ;;  %v2827_v24 = vpop.f32.mrb[77].mxu0  ;;  %4110 = vmatmul.mubr.bf16.gmra.mrb[4].mxu1 %v9821_v7  ;;  %v3666_v55 = vmax.f32 %v3167_v31, %v3442_v15 }
 0x340   : > { %v3667_v34 = vmax.f32 %v3168_v19, %v3444_v51  ;;  %v3073_v35 = vadd.f32 %v10977_v4, %v2827_v24  ;;  %v2829_v59 = vpop.f32.mrb[78].mxu0  ;;  %v3777_v18 = vpack.c.bf16 %v3665_v26, %v3663_v1  ;;  %4119 = vmatprep.mubr.bf16.mxu1 %v9822_v9  ;;  %v3446_v37 = vsel %vm2301_vm3, %v3441_v14, %v3445_v28 }
 0x341   : > { %v3172_v42 = vmax.f32 %v3072_v52, 0.0  ;;  %v3074_v33 = vadd.f32 %v10974_v63, %v2829_v59  ;;  %v2831_v11 = vpop.f32.mrb[79].mxu0  ;;  %v3778_v45 = vpack.c.bf16 %v3666_v55, %v3664_v13  ;;  %v3668_v46 = vmax.f32 %v3169_v30, %v3446_v37  ;;  %v9827_v30 = vld [vmem:[%s12686_s30 + $0x60] ss:$16 sps:$4 sm:$0xff]  }
 0x342   : > { %v3173_v16 = vmax.f32 %v3073_v35, 0.0  ;;  %v3075_v53 = vadd.f32 %v10977_v4, %v2831_v11 }
 0x343   : > { %v3447_v43 = vrot.slane %v3172_v42, 1  ;;  %v3174_v48 = vmax.f32 %v3074_v33, 0.0  ;;  %4222 = vmatprep.subr.bf16.mxu1 %v3778_v45 }
 0x344   : > { %v3449_v29 = vrot.slane %v3173_v16, 1  ;;  %v3175_v5 = vmax.f32 %v3075_v53, 0.0  ;;  %4223 = vmatpush1.bf16.msra.mxu1 %v3777_v18 }
 0x345   : > { %v3448_v32 = vsel %vm2301_vm3, %v3443_v36, %v3447_v43  ;;  %v3451_v20 = vrot.slane %v3174_v48, 1 }
 0x346   : > { %v3669_v31 = vmax.f32 %v3170_v40, %v3448_v32  ;;  %v3453_v41 = vrot.slane %v3175_v5, 1  ;;  %v2835_v58 = vpop.f32.mrb[80].mxu0  ;;  %v3450_v47 = vsel %vm2301_vm3, %v3445_v28, %v3449_v29  ;;  %v9828_v40 = vld [vmem:[%s12686_s30 + $0x84] ss:$16 sps:$4 sm:$0xff]  }
 0x347   : > { %v3452_v2 = vsel %vm2301_vm3, %v3447_v43, %v3451_v20  ;;  %v3076_v12 = vadd.f32 %v10974_v63, %v2835_v58  ;;  %v2837_v50 = vpop.f32.mrb[81].mxu0  ;;  %4120 = vmatmul.mubr.bf16.gmra.mrb[8].mxu1 %v9824_v21  ;;  %v3670_v27 = vmax.f32 %v3171_v0, %v3450_v47 }
 0x348   : > { %v3671_v38 = vmax.f32 %v3172_v42, %v3452_v2  ;;  %v3077_v54 = vadd.f32 %v10977_v4, %v2837_v50  ;;  %v2839_v61 = vpop.f32.mrb[82].mxu0  ;;  %v3779_v3 = vpack.c.bf16 %v3669_v31, %v3667_v34  ;;  %4129 = vmatprep.mubr.bf16.mxu1 %v9825_v10  ;;  %v3454_v1 = vsel %vm2301_vm3, %v3449_v29, %v3453_v41 }
 0x349   : > { %v3176_v62 = vmax.f32 %v3076_v12, 0.0  ;;  %v3078_v6 = vadd.f32 %v10974_v63, %v2839_v61  ;;  %v2841_v8 = vpop.f32.mrb[83].mxu0  ;;  %v3780_v57 = vpack.c.bf16 %v3670_v27, %v3668_v46  ;;  %v3672_v19 = vmax.f32 %v3173_v16, %v3454_v1  ;;  %v9830_v16 = vld [vmem:[%s12686_s30 + $0x80] ss:$16 sps:$4 sm:$0xff]  }
 0x34a   : > { %v3177_v23 = vmax.f32 %v3077_v54, 0.0  ;;  %v3079_v22 = vadd.f32 %v10977_v4, %v2841_v8 }
 0x34b   : > { %v3455_v25 = vrot.slane %v3176_v62, 1  ;;  %v3178_v13 = vmax.f32 %v3078_v6, 0.0  ;;  %4224 = vmatprep.subr.bf16.mxu1 %v3780_v57 }
 0x34c   : > { %v3457_v56 = vrot.slane %v3177_v23, 1  ;;  %v3179_v60 = vmax.f32 %v3079_v22, 0.0  ;;  %4225 = vmatpush1.bf16.msra.mxu1 %v3779_v3 }
 0x34d   : > { %v3456_v7 = vsel %vm2301_vm3, %v3451_v20, %v3455_v25  ;;  %v3459_v14 = vrot.slane %v3178_v13, 1 }
 0x34e   : > { %v3673_v0 = vmax.f32 %v3174_v48, %v3456_v7  ;;  %v3461_v9 = vrot.slane %v3179_v60, 1  ;;  %v2845_v17 = vpop.f32.mrb[84].mxu0  ;;  %v3458_v36 = vsel %vm2301_vm3, %v3453_v41, %v3457_v56  ;;  %v9831_v48 = vld [vmem:[%s12686_s30 + $0xa4] ss:$16 sps:$4 sm:$0xff]  }
 0x34f   : > { %v3460_v26 = vsel %vm2301_vm3, %v3455_v25, %v3459_v14  ;;  %v3080_v28 = vadd.f32 %v10974_v63, %v2845_v17  ;;  %v2847_v39 = vpop.f32.mrb[85].mxu0  ;;  %4130 = vmatmul.mubr.bf16.gmra.mrb[12].mxu1 %v9827_v30  ;;  %v3674_v15 = vmax.f32 %v3175_v5, %v3458_v36 }
 0x350   : > { %v3675_v51 = vmax.f32 %v3176_v62, %v3460_v26  ;;  %v3081_v52 = vadd.f32 %v10977_v4, %v2847_v39  ;;  %v2849_v24 = vpop.f32.mrb[86].mxu0  ;;  %v3781_v55 = vpack.c.bf16 %v3673_v0, %v3671_v38  ;;  %4139 = vmatprep.mubr.bf16.mxu1 %v9828_v40  ;;  %v3462_v34 = vsel %vm2301_vm3, %v3457_v56, %v3461_v9 }
 0x351   : > { %v3180_v35 = vmax.f32 %v3080_v28, 0.0  ;;  %v3082_v59 = vadd.f32 %v10974_v63, %v2849_v24  ;;  %v2851_v18 = vpop.f32.mrb[87].mxu0  ;;  %v3782_v37 = vpack.c.bf16 %v3674_v15, %v3672_v19  ;;  %v3676_v42 = vmax.f32 %v3177_v23, %v3462_v34  ;;  %v9833_v23 = vld [vmem:[%s12686_s30 + $0xa0] ss:$16 sps:$4 sm:$0xff]  }
 0x352   : > { %v3181_v33 = vmax.f32 %v3081_v52, 0.0  ;;  %v3083_v11 = vadd.f32 %v10977_v4, %v2851_v18 }
 0x353   : > { %v3463_v45 = vrot.slane %v3180_v35, 1  ;;  %v3182_v46 = vmax.f32 %v3082_v59, 0.0  ;;  %4226 = vmatprep.subr.bf16.mxu1 %v3782_v37 }
 0x354   : > { %v3465_v53 = vrot.slane %v3181_v33, 1  ;;  %v3183_v43 = vmax.f32 %v3083_v11, 0.0  ;;  %4227 = vmatpush1.bf16.msra.mxu1 %v3781_v55 }
 0x355   : > { %v3464_v21 = vsel %vm2301_vm3, %v3459_v14, %v3463_v45  ;;  %v3467_v29 = vrot.slane %v3182_v46, 1 }
 0x356   : > { %v3677_v5 = vmax.f32 %v3178_v13, %v3464_v21  ;;  %v3469_v10 = vrot.slane %v3183_v43, 1  ;;  %v2855_v32 = vpop.f32.mrb[88].mxu0  ;;  %v3466_v20 = vsel %vm2301_vm3, %v3461_v9, %v3465_v53  ;;  %v9834_v13 = vld [vmem:[%s12686_s30 + $0xc4] ss:$16 sps:$4 sm:$0xff]  }
 0x357   : > { %v3468_v31 = vsel %vm2301_vm3, %v3463_v45, %v3467_v29  ;;  %v3084_v41 = vadd.f32 %v10974_v63, %v2855_v32  ;;  %v2857_v58 = vpop.f32.mrb[89].mxu0  ;;  %4140 = vmatmul.mubr.bf16.gmra.mrb[16].mxu1 %v9830_v16  ;;  %v3678_v47 = vmax.f32 %v3179_v60, %v3466_v20 }
 0x358   : > { %v3679_v2 = vmax.f32 %v3180_v35, %v3468_v31  ;;  %v3085_v12 = vadd.f32 %v10977_v4, %v2857_v58  ;;  %v2859_v50 = vpop.f32.mrb[90].mxu0  ;;  %v3783_v27 = vpack.c.bf16 %v3677_v5, %v3675_v51  ;;  %4149 = vmatprep.mubr.bf16.mxu1 %v9831_v48  ;;  %v3470_v38 = vsel %vm2301_vm3, %v3465_v53, %v3469_v10 }
 0x359   : > { %v3184_v54 = vmax.f32 %v3084_v41, 0.0  ;;  %v3086_v61 = vadd.f32 %v10974_v63, %v2859_v50  ;;  %v2861_v3 = vpop.f32.mrb[91].mxu0  ;;  %v3784_v1 = vpack.c.bf16 %v3678_v47, %v3676_v42  ;;  %v3680_v62 = vmax.f32 %v3181_v33, %v3470_v38  ;;  %v9836_v33 = vld [vmem:[%s12686_s30 + $0xc0] ss:$16 sps:$4 sm:$0xff]  }
 0x35a   : > { %v3185_v6 = vmax.f32 %v3085_v12, 0.0  ;;  %v3087_v8 = vadd.f32 %v10977_v4, %v2861_v3 }
 0x35b   : > { %v3471_v57 = vrot.slane %v3184_v54, 1  ;;  %v3186_v19 = vmax.f32 %v3086_v61, 0.0  ;;  %4228 = vmatprep.subr.bf16.mxu1 %v3784_v1 }
 0x35c   : > { %v3473_v22 = vrot.slane %v3185_v6, 1  ;;  %v3187_v25 = vmax.f32 %v3087_v8, 0.0  ;;  %4229 = vmatpush1.bf16.msra.mxu1 %v3783_v27 }
 0x35d   : > { %v3472_v30 = vsel %vm2301_vm3, %v3467_v29, %v3471_v57  ;;  %v3475_v56 = vrot.slane %v3186_v19, 1 }
 0x35e   : > { %v3681_v60 = vmax.f32 %v3182_v46, %v3472_v30  ;;  %v3477_v40 = vrot.slane %v3187_v25, 1  ;;  %v2865_v7 = vpop.f32.mrb[92].mxu0  ;;  %v3474_v14 = vsel %vm2301_vm3, %v3469_v10, %v3473_v22  ;;  %v9837_v46 = vld [vmem:[%s12686_s30 + $0xe4] ss:$16 sps:$4 sm:$0xff]  }
 0x35f   : > { %v3476_v0 = vsel %vm2301_vm3, %v3471_v57, %v3475_v56  ;;  %v3088_v9 = vadd.f32 %v10974_v63, %v2865_v7  ;;  %v2867_v17 = vpop.f32.mrb[93].mxu0  ;;  %4150 = vmatmul.mubr.bf16.gmra.mrb[20].mxu1 %v9833_v23  ;;  %v3682_v36 = vmax.f32 %v3183_v43, %v3474_v14 }
 0x360   : > { %v3683_v26 = vmax.f32 %v3184_v54, %v3476_v0  ;;  %v3089_v28 = vadd.f32 %v10977_v4, %v2867_v17  ;;  %v2869_v39 = vpop.f32.mrb[94].mxu0  ;;  %v3785_v15 = vpack.c.bf16 %v3681_v60, %v3679_v2  ;;  %4159 = vmatprep.mubr.bf16.mxu1 %v9834_v13  ;;  %v3478_v51 = vsel %vm2301_vm3, %v3473_v22, %v3477_v40 }
 0x361   : > { %v3188_v52 = vmax.f32 %v3088_v9, 0.0  ;;  %v3090_v24 = vadd.f32 %v10974_v63, %v2869_v39  ;;  %v2871_v55 = vpop.f32.mrb[95].mxu0  ;;  %v3786_v34 = vpack.c.bf16 %v3682_v36, %v3680_v62  ;;  %v3684_v35 = vmax.f32 %v3185_v6, %v3478_v51  ;;  %v9839_v6 = vld [vmem:[%s12686_s30 + $0xe0] ss:$16 sps:$4 sm:$0xff]   ;;  %v9843_v51 = vld [vmem:[%s12686_s30 + $0x124] ss:$16 sps:$4 sm:$0xff]  }
 0x362   : > { %v3189_v59 = vmax.f32 %v3089_v28, 0.0  ;;  %v3091_v18 = vadd.f32 %v10977_v4, %v2871_v55  ;;  %v9845_v55 = vld [vmem:[%s12686_s30 + $0x120] ss:$16 sps:$4 sm:$0xff]  }
 0x363   : > { %v3479_v37 = vrot.slane %v3188_v52, 1  ;;  %v3190_v42 = vmax.f32 %v3090_v24, 0.0  ;;  %4230 = vmatprep.subr.bf16.mxu1 %v3786_v34  ;;  %v9846_v34 = vld [vmem:[%s12686_s30 + $0x144] ss:$16 sps:$4 sm:$0xff]  }
 0x364   : > { %v3481_v11 = vrot.slane %v3189_v59, 1  ;;  %v3191_v45 = vmax.f32 %v3091_v18, 0.0  ;;  %4231 = vmatpush1.bf16.msra.mxu1 %v3785_v15  ;;  %v9842_v15 = vld [vmem:[%s12686_s30 + $0x100] ss:$16 sps:$4 sm:$0xff]  }
 0x365   : > { %v3480_v16 = vsel %vm2301_vm3, %v3475_v56, %v3479_v37  ;;  %v3483_v53 = vrot.slane %v3190_v42, 1  ;;  %v12659_v56 = vmov 65535   ;;  %v9851_v18 = vld [vmem:[%s12686_s30 + $0x160] ss:$16 sps:$4 sm:$0xff]  }
 0x366   : > { %v3685_v43 = vmax.f32 %v3186_v19, %v3480_v16  ;;  %v3485_v48 = vrot.slane %v3191_v45, 1  ;;  %v2875_v21 = vpop.f32.mrb[96].mxu0  ;;  %v3482_v29 = vsel %vm2301_vm3, %v3477_v40, %v3481_v11  ;;  %v4059_v60 = vsel %vm4058_vm4, 4294967295, %v12659_v56  ;;  %v9861_v16 = vld [vmem:[%s12686_s30 + $0x6c] ss:$16 sps:$4 sm:$0xff]  }
 0x367   : > { %v3484_v5 = vsel %vm2301_vm3, %v3479_v37, %v3483_v53  ;;  %v3092_v10 = vadd.f32 %v10974_v63, %v2875_v21  ;;  %v2877_v32 = vpop.f32.mrb[97].mxu0  ;;  %4160 = vmatmul.mubr.bf16.gmra.mrb[24].mxu1 %v9836_v33  ;;  %v3686_v20 = vmax.f32 %v3187_v25, %v3482_v29  ;;  %v11231_v28 = vsel %vm2301_vm3, %v4059_v60, 0  ;;  %v9854_v37 = vld [vmem:[%s12686_s30 + $0xc] ss:$16 sps:$4 sm:$0xff]   ;;  %v9869_v29 = vld [vmem:[%s12686_s30 + $0xa8] ss:$16 sps:$4 sm:$0xff]  }
 0x368   : > { %v3687_v31 = vmax.f32 %v3188_v52, %v3484_v5  ;;  %v3093_v41 = vadd.f32 %v10977_v4, %v2877_v32  ;;  %v2879_v58 = vpop.f32.mrb[98].mxu0  ;;  %v3787_v47 = vpack.c.bf16 %v3685_v43, %v3683_v26  ;;  %4169 = vmatprep.mubr.bf16.mxu1 %v9837_v46  ;;  %v3486_v2 = vsel %vm2301_vm3, %v3481_v11, %v3485_v48  ;;  %v9855_v33 = vld [vmem:[%s12686_s30 + $0x2c] ss:$16 sps:$4 sm:$0xff]   ;;  %v9857_v11 = vld [vmem:[%s12686_s30 + $0x28] ss:$16 sps:$4 sm:$0xff]  }
 0x369   : > { %v3192_v12 = vmax.f32 %v3092_v10, 0.0  ;;  %v3094_v50 = vadd.f32 %v10974_v63, %v2879_v58  ;;  %v2881_v27 = vpop.f32.mrb[99].mxu0  ;;  %v3788_v38 = vpack.c.bf16 %v3686_v20, %v3684_v35  ;;  %v3688_v54 = vmax.f32 %v3189_v59, %v3486_v2  ;;  %v9840_v63 = vld [vmem:[%s12686_s30 + $0x104] ss:$16 sps:$4 sm:$0xff]   ;;  %12687 = vst [vmem:[#allocation3_spill] sm:$0xff] %v11231_v28 }
 0x36a   : > { %v3193_v61 = vmax.f32 %v3093_v41, 0.0  ;;  %v3095_v3 = vadd.f32 %v10977_v4, %v2881_v27  ;;  %v9848_v35 = vld [vmem:[%s12686_s30 + $0x140] ss:$16 sps:$4 sm:$0xff]   ;;  %v9849_v59 = vld [vmem:[%s12686_s30 + $0x164] ss:$16 sps:$4 sm:$0xff]  }
 0x36b   : > { %v3487_v1 = vrot.slane %v3192_v12, 1  ;;  %v3194_v62 = vmax.f32 %v3094_v50, 0.0  ;;  %4232 = vmatprep.subr.bf16.mxu1 %v3788_v38  ;;  %v9860_v46 = vld [vmem:[%s12686_s30 + $0x48] ss:$16 sps:$4 sm:$0xff]   ;;  %v9864_v43 = vld [vmem:[%s12686_s30 + $0x8c] ss:$16 sps:$4 sm:$0xff]  }
 0x36c   : > { %v3489_v8 = vrot.slane %v3193_v61, 1  ;;  %v3195_v57 = vmax.f32 %v3095_v3, 0.0  ;;  %4233 = vmatpush1.bf16.msra.mxu1 %v3787_v47  ;;  %v9867_v21 = vld [vmem:[%s12686_s30 + $0xac] ss:$16 sps:$4 sm:$0xff]   ;;  %v9872_v10 = vld [vmem:[%s12686_s30 + $0xc8] ss:$16 sps:$4 sm:$0xff]  }
 0x36d   : > { %v3488_v19 = vsel %vm2301_vm3, %v3483_v53, %v3487_v1  ;;  %v3491_v23 = vrot.slane %v3194_v62, 1  ;;  %v9863_v53 = vld [vmem:[%s12686_s30 + $0x68] ss:$16 sps:$4 sm:$0xff]   ;;  %v9870_v5 = vld [vmem:[%s12686_s30 + $0xcc] ss:$16 sps:$4 sm:$0xff]   ;;  %v9888_v38 = vld [vmem:[%s12688_s2] sm:$0xff]  }
 0x36e   : > { %v3689_v22 = vmax.f32 %v3190_v42, %v3488_v19  ;;  %v3493_v4 = vrot.slane %v3195_v57, 1  ;;  %v3490_v25 = vsel %vm2301_vm3, %v3485_v48, %v3489_v8  ;;  %v9852_v42 = vld [vmem:[%s12686_s30 + $0x8] ss:$16 sps:$4 sm:$0xff]   ;;  %v9873_v32 = vld [vmem:[%s12686_s30 + $0xec] ss:$16 sps:$4 sm:$0xff]   ;;  %v9890_v3 = vld [vmem:[%s12688_s2 + $0x10] sm:$0xff]  }
 0x36f   : > { %v3492_v13 = vsel %vm2301_vm3, %v3487_v1, %v3491_v23  ;;  %v3693_v30 = vmax.f32 %v3194_v62, %v3491_v23  ;;  %4170 = vmatmul.mubr.bf16.gmra.mrb[28].mxu1 %v9839_v6  ;;  %v3690_v40 = vmax.f32 %v3191_v45, %v3490_v25  ;;  %v9858_v45 = vld [vmem:[%s12686_s30 + $0x4c] ss:$16 sps:$4 sm:$0xff]   ;;  %v9866_v48 = vld [vmem:[%s12686_s30 + $0x88] ss:$16 sps:$4 sm:$0xff]   ;;  %v9892_v62 = vld [vmem:[%s12688_s2 + $0x20] sm:$0xff]  }
 0x370   : > { %v3691_v7 = vmax.f32 %v3192_v12, %v3492_v13  ;;  %v3494_v14 = vsel %vm2301_vm3, %v3489_v8, %v3493_v4  ;;  %v3694_v0 = vmax.f32 %v3195_v57, %v3493_v4  ;;  %v3789_v9 = vpack.c.bf16 %v3689_v22, %v3687_v31  ;;  %4179 = vmatprep.mubr.bf16.mxu1 %v9840_v63  ;;  %v9875_v20 = vld [vmem:[%s12686_s30 + $0xe8] ss:$16 sps:$4 sm:$0xff]   ;;  %v9876_v31 = vld [vmem:[%s12686_s30 + $0x10c] ss:$16 sps:$4 sm:$0xff]   ;;  %v9894_v8 = vld [vmem:[%s12688_s2 + $0x30] sm:$0xff]  }
 0x371   : > { %v3692_v17 = vmax.f32 %v3193_v61, %v3494_v14  ;;  %v3790_v36 = vpack.c.bf16 %v3690_v40, %v3688_v54  ;;  %v9878_v41 = vld [vmem:[%s12686_s30 + $0x108] ss:$16 sps:$4 sm:$0xff]   ;;  %v9879_v58 = vld [vmem:[%s12686_s30 + $0x12c] ss:$16 sps:$4 sm:$0xff]   ;;  %v12660_v54 = vmov 0   ;;  %v9896_v63 = vld [vmem:[%s12688_s2 + $0x40] sm:$0xff]  }
 0x372   : > { %v3791_v26 = vpack.c.bf16 %v3693_v30, %v3691_v7  ;;  %v9881_v47 = vld [vmem:[%s12686_s30 + $0x128] ss:$16 sps:$4 sm:$0xff]   ;;  %v9882_v2 = vld [vmem:[%s12686_s30 + $0x14c] ss:$16 sps:$4 sm:$0xff]   ;;  %v9898_v23 = vld [vmem:[%s12688_s2 + $0x50] sm:$0xff]  }
 0x373   : > { %v3792_v39 = vpack.c.bf16 %v3694_v0, %v3692_v17  ;;  %4234 = vmatprep.subr.bf16.mxu1 %v3790_v36  ;;  %v9884_v12 = vld [vmem:[%s12686_s30 + $0x148] ss:$16 sps:$4 sm:$0xff]   ;;  %v9885_v50 = vld [vmem:[%s12686_s30 + $0x16c] ss:$16 sps:$4 sm:$0xff]  }
 0x374   : > { %4235 = vmatpush1.bf16.msra.mxu1 %v3789_v9  ;;  %v4062_v24 = vand.u32 %v11231_v28, %v3791_v26  ;;  %v9887_v27 = vld [vmem:[%s12686_s30 + $0x168] ss:$16 sps:$4 sm:$0xff]  }
 0x375   : > { %v4065_v52 = vand.u32 %v11231_v28, %v3792_v39  ;;  %v9889_v61 = vld [vmem:[%s12688_s2 + $0x8] sm:$0xff]   ;;  %v9891_v1 = vld [vmem:[%s12688_s2 + $0x18] sm:$0xff]  }
 0x376   : > { %v9893_v6 = vld [vmem:[%s12688_s2 + $0x28] sm:$0xff]   ;;  %v9895_v57 = vld [vmem:[%s12688_s2 + $0x38] sm:$0xff]  }
 0x377   : > { %4180 = vmatmul.mubr.bf16.gmra.mrb[32].mxu1 %v9842_v15  ;;  %4236 = vmatprep.subr.bf16.mxu1 %v4065_v52  ;;  %v9897_v19 = vld [vmem:[%s12688_s2 + $0x48] sm:$0xff]   ;;  %v9899_v22 = vld [vmem:[%s12688_s2 + $0x58] sm:$0x3f]  }
 0x378   : > { %4237 = vmatpush1.bf16.msra.mxu1 %v4062_v24  ;;  %4189 = vmatprep.mubr.bf16.mxu1 %v9843_v51  ;;  %v4795_v4 = vsel %vm4058_vm4, %v9899_v22, 0  ;;  %vm8127_vm4 = vcmask 236544  }
 0x379   : > { %4797 = vmatprep.subr.bf16.mxu1 %v12660_v54 }
 0x37f   : > { %4190 = vmatmul.mubr.bf16.gmra.mrb[36].mxu1 %v9845_v55 }
 0x380   : > { %4199 = vmatprep.mubr.bf16.mxu1 %v9846_v34 }
 0x387   : > { %4200 = vmatmul.mubr.bf16.gmra.mrb[40].mxu1 %v9848_v35 }
 0x388   : > { %4209 = vmatprep.mubr.bf16.mxu1 %v9849_v59 }
 0x38f   : > { %4210 = vmatmul.mubr.bf16.gmra.mrb[44].mxu1 %v9851_v18 }
 0x390   : > { %8690 = vmatprep.mubr.msk.bf16.mxu1 %vm4021_vm5, %v9854_v37 }
 0x397   : > { %4253 = vmatmul.mubr.bf16.vlgmr.msra.gmra.mrb[0].mxu1 %v9852_v42 }
 0x398   : > { %8691 = vmatprep.mubr.msk.bf16.mxu1 %vm4021_vm5, %v9855_v33  ;;  %4798 = vmatpush1.bf16.msra.mxu1 %v9888_v38 }
 0x399   : > { %4799 = vmatprep.subr.bf16.mxu1 %v12660_v54 }
 0x39c   : > { %4800 = vmatpush1.bf16.msra.mxu1 %v9889_v61 }
 0x39d   : > { %4801 = vmatprep.subr.bf16.mxu1 %v12660_v54 }
 0x39f   : > { %4263 = vmatmul.mubr.bf16.gmra.mrb[4].mxu1 %v9857_v11 }
 0x3a0   : > { %8692 = vmatprep.mubr.msk.bf16.mxu1 %vm4021_vm5, %v9858_v45  ;;  %4802 = vmatpush1.bf16.msra.mxu1 %v9890_v3 }
 0x3a1   : > { %4803 = vmatprep.subr.bf16.mxu1 %v12660_v54 }
 0x3a4   : > { %4804 = vmatpush1.bf16.msra.mxu1 %v9891_v1 }
 0x3a5   : > { %4805 = vmatprep.subr.bf16.mxu1 %v12660_v54 }
 0x3a7   : > { %4273 = vmatmul.mubr.bf16.gmra.mrb[8].mxu1 %v9860_v46 }
 0x3a8   : > { %8693 = vmatprep.mubr.msk.bf16.mxu1 %vm4021_vm5, %v9861_v16  ;;  %4806 = vmatpush1.bf16.msra.mxu1 %v9892_v62 }
 0x3a9   : > { %4807 = vmatprep.subr.bf16.mxu1 %v12660_v54 }
 0x3ac   : > { %4808 = vmatpush1.bf16.msra.mxu1 %v9893_v6 }
 0x3ad   : > { %4809 = vmatprep.subr.bf16.mxu1 %v12660_v54 }
 0x3af   : > { %4283 = vmatmul.mubr.bf16.gmra.mrb[12].mxu1 %v9863_v53 }
 0x3b0   : > { %8694 = vmatprep.mubr.msk.bf16.mxu1 %vm4021_vm5, %v9864_v43  ;;  %4810 = vmatpush1.bf16.msra.mxu1 %v9894_v8 }
 0x3b1   : > { %4811 = vmatprep.subr.bf16.mxu1 %v12660_v54 }
 0x3b4   : > { %4812 = vmatpush1.bf16.msra.mxu1 %v9895_v57 }
 0x3b5   : > { %4813 = vmatprep.subr.bf16.mxu1 %v12660_v54 }
 0x3b7   : > { %4293 = vmatmul.mubr.bf16.gmra.mrb[16].mxu1 %v9866_v48 }
 0x3b8   : > { %8695 = vmatprep.mubr.msk.bf16.mxu1 %vm4021_vm5, %v9867_v21  ;;  %4814 = vmatpush1.bf16.msra.mxu1 %v9896_v63 }
 0x3b9   : > { %4815 = vmatprep.subr.bf16.mxu1 %v12660_v54 }
 0x3bc   : > { %4816 = vmatpush1.bf16.msra.mxu1 %v9897_v19 }
 0x3bd   : > { %4817 = vmatprep.subr.bf16.mxu1 %v12660_v54 }
 0x3bf   : > { %4303 = vmatmul.mubr.bf16.gmra.mrb[20].mxu1 %v9869_v29 }
 0x3c0   : > { %8696 = vmatprep.mubr.msk.bf16.mxu1 %vm4021_vm5, %v9870_v5  ;;  %4818 = vmatpush1.bf16.msra.mxu1 %v9898_v23 }
 0x3c1   : > { %4819 = vmatprep.subr.bf16.mxu1 %v12660_v54 }
 0x3c4   : > { %4820 = vmatpush1.bf16.msra.mxu1 %v4795_v4 }
 0x3c7   : > { %4313 = vmatmul.mubr.bf16.gmra.mrb[24].mxu1 %v9872_v10 }
 0x3c8   : > { %8697 = vmatprep.mubr.msk.bf16.mxu1 %vm4021_vm5, %v9873_v32 }
 0x3cf   : > { %4323 = vmatmul.mubr.bf16.gmra.mrb[28].mxu1 %v9875_v20 }
 0x3d0   : > { %8698 = vmatprep.mubr.msk.bf16.mxu1 %vm4021_vm5, %v9876_v31 }
 0x3d7   : > { %4333 = vmatmul.mubr.bf16.gmra.mrb[32].mxu1 %v9878_v41 }
 0x3d8   : > { %8699 = vmatprep.mubr.msk.bf16.mxu1 %vm4021_vm5, %v9879_v58 }
 0x3df   : > { %4343 = vmatmul.mubr.bf16.gmra.mrb[36].mxu1 %v9881_v47 }
 0x3e0   : > { %8700 = vmatprep.mubr.msk.bf16.mxu1 %vm4021_vm5, %v9882_v2 }
 0x3e7   : > { %4353 = vmatmul.mubr.bf16.gmra.mrb[40].mxu1 %v9884_v12 }
 0x3e8   : > { %8701 = vmatprep.mubr.msk.bf16.mxu1 %vm4021_vm5, %v9885_v50  ;;  %vm8377_vm5 = vcmask 15360  }
 0x3ef   : > { %4363 = vmatmul.mubr.bf16.gmra.mrb[44].mxu1 %v9887_v27 }
 0x46a   : > { %v11389_v25 = vpop.f32.mrb[0].mxu1 }
 0x46b   : > { %v11391_v13 = vpop.f32.mrb[1].mxu1 }
 0x46c   : > { %v11393_v30 = vpop.f32.mrb[2].mxu1  ;;  %v9534_v60 = vpack.i.bf16 %v11391_v13, %v11389_v25 }
 0x46d   : > { %v11397_v40 = vpop.f32.mrb[3].mxu1 }
 0x46e   : > { %v9539_v7 = vpack.i.bf16 %v11397_v40, %v11393_v30  ;;  %9535 = vrot.lane.b32.xlu0 %v9534_v60, %s10077_s23 }
 0x472   : > { %9540 = vrot.lane.b32.xlu0 %v9539_v7, %s10077_s23  ;;  %v11403_v14 = vpop.f32.mrb[4].mxu1 }
 0x473   : > { %v11405_v0 = vpop.f32.mrb[5].mxu1 }
 0x474   : > { %v11407_v9 = vpop.f32.mrb[6].mxu1  ;;  %v9544_v17 = vpack.i.bf16 %v11405_v0, %v11403_v14 }
 0x475   : > { %v11411_v36 = vpop.f32.mrb[7].mxu1 }
 0x476   : > { %v9549_v26 = vpack.i.bf16 %v11411_v36, %v11407_v9  ;;  %9545 = vrot.lane.b32.xlu1 %v9544_v17, %s10077_s23 }
 0x47a   : > { %9550 = vrot.lane.b32.xlu1 %v9549_v26, %s10077_s23  ;;  %v11417_v39 = vpop.f32.mrb[8].mxu1 }
 0x47b   : > { %v11419_v15 = vpop.f32.mrb[9].mxu1 }
 0x47c   : > { %v9554_v51 = vpack.i.bf16 %v11419_v15, %v11417_v39  ;;  %v11423_v52 = vpop.f32.mrb[10].mxu1 }
 0x47d   : > { %v11425_v24 = vpop.f32.mrb[11].mxu1 }
 0x47e   : > { %v9559_v55 = vpack.i.bf16 %v11425_v24, %v11423_v52  ;;  %9555 = vrot.lane.b32.xlu0 %v9554_v51, %s10077_s23 }
 0x480   : > { %9560 = vrot.lane.b32.xlu1 %v9559_v55, %s10077_s23 }
 0x482   : > { %v11431_v34 = vpop.f32.mrb[12].mxu1 }
 0x483   : > { %v11433_v35 = vpop.f32.mrb[13].mxu1 }
 0x484   : > { %v9564_v59 = vpack.i.bf16 %v11433_v35, %v11431_v34  ;;  %v11437_v18 = vpop.f32.mrb[14].mxu1 }
 0x485   : > { %v11439_v37 = vpop.f32.mrb[15].mxu1 }
 0x486   : > { %v9569_v42 = vpack.i.bf16 %v11439_v37, %v11437_v18  ;;  %9565 = vrot.lane.b32.xlu0 %v9564_v59, %s10077_s23 }
 0x488   : > { %9570 = vrot.lane.b32.xlu1 %v9569_v42, %s10077_s23 }
 0x48a   : > { %v11445_v33 = vpop.f32.mrb[16].mxu1 }
 0x48b   : > { %v11447_v11 = vpop.f32.mrb[17].mxu1 }
 0x48c   : > { %v9574_v45 = vpack.i.bf16 %v11447_v11, %v11445_v33  ;;  %v11451_v46 = vpop.f32.mrb[18].mxu1 }
 0x48d   : > { %v11453_v16 = vpop.f32.mrb[19].mxu1 }
 0x48e   : > { %v9579_v53 = vpack.i.bf16 %v11453_v16, %v11451_v46  ;;  %9575 = vrot.lane.b32.xlu0 %v9574_v45, %s10077_s23 }
 0x490   : > { %9580 = vrot.lane.b32.xlu1 %v9579_v53, %s10077_s23 }
 0x492   : > { %v11459_v43 = vpop.f32.mrb[20].mxu1 }
 0x493   : > { %v11461_v48 = vpop.f32.mrb[21].mxu1 }
 0x494   : > { %v9584_v21 = vpack.i.bf16 %v11461_v48, %v11459_v43  ;;  %v11465_v29 = vpop.f32.mrb[22].mxu1 }
 0x495   : > { %v11467_v5 = vpop.f32.mrb[23].mxu1 }
 0x496   : > { %v9589_v10 = vpack.i.bf16 %v11467_v5, %v11465_v29  ;;  %9585 = vrot.lane.b32.xlu0 %v9584_v21, %s10077_s23 }
 0x498   : > { %9590 = vrot.lane.b32.xlu1 %v9589_v10, %s10077_s23  ;;  %v9902_v10 = vld [vmem:[%s12689_s24 + $0x64] ss:$8 sps:$4 sm:$0xff]  }
 0x499   : > { %5155 = vmatprep.subr.bf16.mxu1 %v9902_v10 }
 0x49a   : > { %v11473_v32 = vpop.f32.mrb[24].mxu1 }
 0x49b   : > { %v11475_v20 = vpop.f32.mrb[25].mxu1 }
 0x49c   : > { %v9594_v31 = vpack.i.bf16 %v11475_v20, %v11473_v32  ;;  %v11479_v41 = vpop.f32.mrb[26].mxu1 }
 0x49d   : > { %v11481_v58 = vpop.f32.mrb[27].mxu1 }
 0x49e   : > { %v9599_v47 = vpack.i.bf16 %v11481_v58, %v11479_v41  ;;  %9595 = vrot.lane.b32.xlu0 %v9594_v31, %s10077_s23 }
 0x4a0   : > { %9600 = vrot.lane.b32.xlu1 %v9599_v47, %s10077_s23 }
 0x4a2   : > { %v11487_v2 = vpop.f32.mrb[28].mxu1 }
 0x4a3   : > { %v11489_v12 = vpop.f32.mrb[29].mxu1 }
 0x4a4   : > { %v9604_v50 = vpack.i.bf16 %v11489_v12, %v11487_v2  ;;  %v11493_v27 = vpop.f32.mrb[30].mxu1 }
 0x4a5   : > { %v11495_v38 = vpop.f32.mrb[31].mxu1 }
 0x4a6   : > { %v9609_v61 = vpack.i.bf16 %v11495_v38, %v11493_v27  ;;  %9605 = vrot.lane.b32.xlu0 %v9604_v50, %s10077_s23 }
 0x4a8   : > { %9610 = vrot.lane.b32.xlu1 %v9609_v61, %s10077_s23 }
 0x4aa   : > { %v11501_v3 = vpop.f32.mrb[32].mxu1 }
 0x4ab   : > { %v11503_v1 = vpop.f32.mrb[33].mxu1 }
 0x4ac   : > { %v9614_v62 = vpack.i.bf16 %v11503_v1, %v11501_v3  ;;  %v11507_v6 = vpop.f32.mrb[34].mxu1 }
 0x4ad   : > { %v11509_v8 = vpop.f32.mrb[35].mxu1 }
 0x4ae   : > { %v9619_v57 = vpack.i.bf16 %v11509_v8, %v11507_v6  ;;  %9615 = vrot.lane.b32.xlu0 %v9614_v62, %s10077_s23 }
 0x4b0   : > { %9620 = vrot.lane.b32.xlu1 %v9619_v57, %s10077_s23 }
 0x4b2   : > { %v11515_v63 = vpop.f32.mrb[36].mxu1 }
 0x4b3   : > { %v11517_v19 = vpop.f32.mrb[37].mxu1 }
 0x4b4   : > { %v9624_v23 = vpack.i.bf16 %v11517_v19, %v11515_v63  ;;  %v11521_v22 = vpop.f32.mrb[38].mxu1 }
 0x4b5   : > { %v11523_v4 = vpop.f32.mrb[39].mxu1 }
 0x4b6   : > { %v9629_v60 = vpack.i.bf16 %v11523_v4, %v11521_v22  ;;  %9625 = vrot.lane.b32.xlu0 %v9624_v23, %s10077_s23 }
 0x4b8   : > { %9630 = vrot.lane.b32.xlu1 %v9629_v60, %s10077_s23 }
 0x4ba   : > { %v11529_v7 = vpop.f32.mrb[40].mxu1 }
 0x4bb   : > { %v11531_v17 = vpop.f32.mrb[41].mxu1 }
 0x4bc   : > { %v9634_v26 = vpack.i.bf16 %v11531_v17, %v11529_v7  ;;  %v11535_v51 = vpop.f32.mrb[42].mxu1 }
 0x4bd   : > { %v11537_v55 = vpop.f32.mrb[43].mxu1 }
 0x4be   : > { %v9639_v59 = vpack.i.bf16 %v11537_v55, %v11535_v51  ;;  %9635 = vrot.lane.b32.xlu0 %v9634_v26, %s10077_s23 }
 0x4c0   : > { %9640 = vrot.lane.b32.xlu1 %v9639_v59, %s10077_s23 }
 0x4c2   : > { %v11543_v42 = vpop.f32.mrb[44].mxu1 }
 0x4c3   : > { %v11545_v45 = vpop.f32.mrb[45].mxu1 }
 0x4c4   : > { %v9644_v53 = vpack.i.bf16 %v11545_v45, %v11543_v42  ;;  %v11549_v21 = vpop.f32.mrb[46].mxu1 }
 0x4c5   : > { %v11554_v31 = vpop.f32.mrb[47].mxu1 }
 0x4c6   : > { %v9649_v47 = vpack.i.bf16 %v11554_v31, %v11549_v21  ;;  %9645 = vrot.lane.b32.xlu0 %v9644_v53, %s10077_s23 }
 0x4c8   : > { %9650 = vrot.lane.b32.xlu1 %v9649_v47, %s10077_s23  ;;  %s10078_s23 = smov 120  }
 0x4e0   : > { %v9536_v50 = vpop.permute.xlu0 %9535 }
 0x4e1   : > { %v9538_v61 = vunpack.i.h.bf16 %v9536_v50  ;;  %v9537_v62 = vunpack.i.l.bf16 %v9536_v50 }
 0x4e3   : > { %v4518_v23 = vsel %vm4517_vm6, %v9537_v62, %v9538_v61  ;;  %v4591_v59 = vmax.f32 %v11391_v13, %v9538_v61  ;;  %v9900_v62 = vld [vmem:[%s12689_s24 + $0x60] ss:$8 sps:$4 sm:$0xff]   ;;  %v9905_v13 = vld [vmem:[%s12689_s24 + $0x74] ss:$8 sps:$4 sm:$0xff]  }
 0x4e4   : > { %v9541_v57 = vpop.permute.xlu0 %9540  ;;  %v4590_v53 = vmax.f32 %v11389_v25, %v4518_v23 }
 0x4e5   : > { %v9543_v60 = vunpack.i.h.bf16 %v9541_v57  ;;  %v9542_v26 = vunpack.i.l.bf16 %v9541_v57 }
 0x4e7   : > { %v4593_v56 = vmax.f32 %v11397_v40, %v9543_v60  ;;  %v4519_v54 = vsel %vm4517_vm6, %v9542_v26, %v9543_v60 }
 0x4e8   : > { %v4592_v10 = vmax.f32 %v11393_v30, %v4519_v54  ;;  %v9546_v47 = vpop.permute.xlu1 %9545 }
 0x4e9   : > { %v4639_v28 = vpack.c.bf16 %v4593_v56, %v4591_v59  ;;  %v9548_v50 = vunpack.i.h.bf16 %v9546_v47  ;;  %v9547_v44 = vunpack.i.l.bf16 %v9546_v47  ;;  %v9903_v56 = vld [vmem:[%s12689_s24 + $0x70] ss:$8 sps:$4 sm:$0xff]  }
 0x4ea   : > { %v4638_v57 = vpack.c.bf16 %v4592_v10, %v4590_v53 }
 0x4eb   : > { %8714 = vmatprep.mubr.msk.bf16.mxu1 %vm4757_vm7, %v4639_v28  ;;  %v4520_v54 = vsel %vm4517_vm6, %v9547_v44, %v9548_v50  ;;  %v4595_v61 = vmax.f32 %v11405_v0, %v9548_v50 }
 0x4ec   : > { %4830 = vmatmul.mubr.bf16.vlgmr.msra.gmra.mrb[48].mxu1 %v4638_v57  ;;  %v9551_v25 = vpop.permute.xlu1 %9550  ;;  %v4594_v28 = vmax.f32 %v11403_v14, %v4520_v54 }
 0x4ed   : > { %v9553_v30 = vunpack.i.h.bf16 %v9551_v25  ;;  %v9552_v40 = vunpack.i.l.bf16 %v9551_v25  ;;  %5156 = vmatpush1.bf16.msra.mxu1 %v9900_v62 }
 0x4ee   : > { %5157 = vmatprep.subr.bf16.mxu1 %v9905_v13 }
 0x4ef   : > { %v4597_v23 = vmax.f32 %v11411_v36, %v9553_v30  ;;  %v4521_v60 = vsel %vm4517_vm6, %v9552_v40, %v9553_v30 }
 0x4f0   : > { %v9556_v26 = vpop.permute.xlu0 %9555  ;;  %v4596_v59 = vmax.f32 %v11407_v9, %v4521_v60 }
 0x4f1   : > { %v4641_v44 = vpack.c.bf16 %v4597_v23, %v4595_v61  ;;  %v9558_v53 = vunpack.i.h.bf16 %v9556_v26  ;;  %v9557_v10 = vunpack.i.l.bf16 %v9556_v26  ;;  %5158 = vmatpush1.bf16.msra.mxu1 %v9903_v56 }
 0x4f2   : > { %v9561_v47 = vpop.permute.xlu1 %9560  ;;  %v4640_v62 = vpack.c.bf16 %v4596_v59, %v4594_v28 }
 0x4f3   : > { %v4522_v57 = vsel %vm4517_vm6, %v9557_v10, %v9558_v53  ;;  %v9563_v13 = vunpack.i.h.bf16 %v9561_v47  ;;  %v9562_v25 = vunpack.i.l.bf16 %v9561_v47  ;;  %8715 = vmatprep.mubr.msk.bf16.mxu1 %vm4757_vm7, %v4641_v44  ;;  %v4599_v0 = vmax.f32 %v11419_v15, %v9558_v53 }
 0x4f4   : > { %4838 = vmatmul.mubr.bf16.gmra.mrb[52].mxu1 %v4640_v62  ;;  %v4598_v9 = vmax.f32 %v11417_v39, %v4522_v57 }
 0x4f5   : > { %v4601_v36 = vmax.f32 %v11425_v24, %v9563_v13  ;;  %v4523_v14 = vsel %vm4517_vm6, %v9562_v25, %v9563_v13 }
 0x4f6   : > { %v4600_v50 = vmax.f32 %v11423_v52, %v4523_v14 }
 0x4f7   : > { %v4643_v54 = vpack.c.bf16 %v4601_v36, %v4599_v0 }
 0x4f8   : > { %v9566_v30 = vpop.permute.xlu0 %9565  ;;  %v4642_v40 = vpack.c.bf16 %v4600_v50, %v4598_v9 }
 0x4f9   : > { %v9568_v56 = vunpack.i.h.bf16 %v9566_v30  ;;  %v9567_v61 = vunpack.i.l.bf16 %v9566_v30  ;;  %8716 = vmatprep.mubr.msk.bf16.mxu1 %vm4757_vm7, %v4643_v54 }
 0x4fa   : > { %v9571_v23 = vpop.permute.xlu1 %9570 }
 0x4fb   : > { %v4524_v60 = vsel %vm4517_vm6, %v9567_v61, %v9568_v56  ;;  %v9573_v26 = vunpack.i.h.bf16 %v9571_v23  ;;  %v9572_v15 = vunpack.i.l.bf16 %v9571_v23  ;;  %v4603_v24 = vmax.f32 %v11433_v35, %v9568_v56 }
 0x4fc   : > { %4846 = vmatmul.mubr.bf16.gmra.mrb[56].mxu1 %v4642_v40  ;;  %v4602_v52 = vmax.f32 %v11431_v34, %v4524_v60 }
 0x4fd   : > { %v4605_v28 = vmax.f32 %v11439_v37, %v9573_v26  ;;  %v4525_v39 = vsel %vm4517_vm6, %v9572_v15, %v9573_v26 }
 0x4fe   : > { %v4604_v59 = vmax.f32 %v11437_v18, %v4525_v39 }
 0x4ff   : > { %v4645_v44 = vpack.c.bf16 %v4605_v28, %v4603_v24 }
 0x500   : > { %v9576_v53 = vpop.permute.xlu0 %9575  ;;  %v4644_v10 = vpack.c.bf16 %v4604_v59, %v4602_v52 }
 0x501   : > { %v9578_v47 = vunpack.i.h.bf16 %v9576_v53  ;;  %v9577_v62 = vunpack.i.l.bf16 %v9576_v53  ;;  %8717 = vmatprep.mubr.msk.bf16.mxu1 %vm4757_vm7, %v4645_v44 }
 0x502   : > { %v9581_v57 = vpop.permute.xlu1 %9580 }
 0x503   : > { %v4526_v13 = vsel %vm4517_vm6, %v9577_v62, %v9578_v47  ;;  %v9583_v25 = vunpack.i.h.bf16 %v9581_v57  ;;  %v9582_v35 = vunpack.i.l.bf16 %v9581_v57  ;;  %v4607_v37 = vmax.f32 %v11447_v11, %v9578_v47 }
 0x504   : > { %4854 = vmatmul.mubr.bf16.gmra.mrb[60].mxu1 %v4644_v10  ;;  %v4606_v18 = vmax.f32 %v11445_v33, %v4526_v13 }
 0x505   : > { %v4609_v0 = vmax.f32 %v11453_v16, %v9583_v25  ;;  %v4527_v34 = vsel %vm4517_vm6, %v9582_v35, %v9583_v25 }
 0x506   : > { %v4608_v36 = vmax.f32 %v11451_v46, %v4527_v34 }
 0x507   : > { %v4647_v14 = vpack.c.bf16 %v4609_v0, %v4607_v37 }
 0x508   : > { %v9586_v9 = vpop.permute.xlu0 %9585  ;;  %v4646_v50 = vpack.c.bf16 %v4608_v36, %v4606_v18 }
 0x509   : > { %v9588_v54 = vunpack.i.h.bf16 %v9586_v9  ;;  %v9587_v30 = vunpack.i.l.bf16 %v9586_v9  ;;  %8718 = vmatprep.mubr.msk.bf16.mxu1 %vm4757_vm7, %v4647_v14 }
 0x50a   : > { %v9591_v40 = vpop.permute.xlu1 %9590 }
 0x50b   : > { %v4528_v56 = vsel %vm4517_vm6, %v9587_v30, %v9588_v54  ;;  %v9593_v61 = vunpack.i.h.bf16 %v9591_v40  ;;  %v9592_v11 = vunpack.i.l.bf16 %v9591_v40  ;;  %v4611_v16 = vmax.f32 %v11461_v48, %v9588_v54 }
 0x50c   : > { %4862 = vmatmul.mubr.bf16.gmra.mrb[64].mxu1 %v4646_v50  ;;  %v4610_v46 = vmax.f32 %v11459_v43, %v4528_v56 }
 0x50d   : > { %v4613_v23 = vmax.f32 %v11467_v5, %v9593_v61  ;;  %v4529_v33 = vsel %vm4517_vm6, %v9592_v11, %v9593_v61 }
 0x50e   : > { %v4612_v60 = vmax.f32 %v11465_v29, %v4529_v33 }
 0x50f   : > { %v4649_v26 = vpack.c.bf16 %v4613_v23, %v4611_v16 }
 0x510   : > { %v9596_v15 = vpop.permute.xlu0 %9595  ;;  %v4648_v24 = vpack.c.bf16 %v4612_v60, %v4610_v46 }
 0x511   : > { %v9598_v28 = vunpack.i.h.bf16 %v9596_v15  ;;  %v9597_v39 = vunpack.i.l.bf16 %v9596_v15  ;;  %8719 = vmatprep.mubr.msk.bf16.mxu1 %vm4757_vm7, %v4649_v26 }
 0x512   : > { %v9601_v52 = vpop.permute.xlu1 %9600 }
 0x513   : > { %v4530_v59 = vsel %vm4517_vm6, %v9597_v39, %v9598_v28  ;;  %v9603_v44 = vunpack.i.h.bf16 %v9601_v52  ;;  %v9602_v48 = vunpack.i.l.bf16 %v9601_v52  ;;  %v4615_v5 = vmax.f32 %v11475_v20, %v9598_v28 }
 0x514   : > { %4870 = vmatmul.mubr.bf16.gmra.mrb[68].mxu1 %v4648_v24  ;;  %v4614_v29 = vmax.f32 %v11473_v32, %v4530_v59 }
 0x515   : > { %v4617_v53 = vmax.f32 %v11481_v58, %v9603_v44  ;;  %v4531_v43 = vsel %vm4517_vm6, %v9602_v48, %v9603_v44 }
 0x516   : > { %v4616_v10 = vmax.f32 %v11479_v41, %v4531_v43 }
 0x517   : > { %v4651_v47 = vpack.c.bf16 %v4617_v53, %v4615_v5 }
 0x518   : > { %v9606_v62 = vpop.permute.xlu0 %9605  ;;  %v4650_v57 = vpack.c.bf16 %v4616_v10, %v4614_v29 }
 0x519   : > { %v9608_v13 = vunpack.i.h.bf16 %v9606_v62  ;;  %v9607_v25 = vunpack.i.l.bf16 %v9606_v62  ;;  %8720 = vmatprep.mubr.msk.bf16.mxu1 %vm4757_vm7, %v4651_v47 }
 0x51a   : > { %v9611_v35 = vpop.permute.xlu1 %9610 }
 0x51b   : > { %v4532_v37 = vsel %vm4517_vm6, %v9607_v25, %v9608_v13  ;;  %v9613_v0 = vunpack.i.h.bf16 %v9611_v35  ;;  %v9612_v20 = vunpack.i.l.bf16 %v9611_v35  ;;  %v4619_v58 = vmax.f32 %v11489_v12, %v9608_v13 }
 0x51c   : > { %4878 = vmatmul.mubr.bf16.gmra.mrb[72].mxu1 %v4650_v57  ;;  %v4618_v41 = vmax.f32 %v11487_v2, %v4532_v37 }
 0x51d   : > { %v4621_v34 = vmax.f32 %v11495_v38, %v9613_v0  ;;  %v4533_v32 = vsel %vm4517_vm6, %v9612_v20, %v9613_v0 }
 0x51e   : > { %v4620_v18 = vmax.f32 %v11493_v27, %v4533_v32 }
 0x51f   : > { %v4653_v36 = vpack.c.bf16 %v4621_v34, %v4619_v58 }
 0x520   : > { %v9616_v14 = vpop.permute.xlu0 %9615  ;;  %v4652_v9 = vpack.c.bf16 %v4620_v18, %v4618_v41  ;;  %v9908_v41 = vld [vmem:[%s12689_s24 + $0x84] ss:$8 sps:$4 sm:$0xff]  }
 0x521   : > { %v9618_v50 = vunpack.i.h.bf16 %v9616_v14  ;;  %v9617_v54 = vunpack.i.l.bf16 %v9616_v14  ;;  %8721 = vmatprep.mubr.msk.bf16.mxu1 %vm4757_vm7, %v4653_v36  ;;  %v9906_v36 = vld [vmem:[%s12689_s24 + $0x80] ss:$8 sps:$4 sm:$0xff]   ;;  %5159 = vmatprep.subr.bf16.mxu1 %v9908_v41  ;;  %v9933_v41 = vld [vmem:[%s12689_s24 + $0x50] ss:$8 sps:$4 sm:$0xff]  }
 0x522   : > { %v9621_v30 = vpop.permute.xlu1 %9620  ;;  %5160 = vmatpush1.bf16.msra.mxu1 %v9906_v36  ;;  %v9912_v14 = vld [vmem:[%s12689_s24 + $0xa0] ss:$8 sps:$4 sm:$0xff]  }
 0x523   : > { %v4534_v40 = vsel %vm4517_vm6, %v9617_v54, %v9618_v50  ;;  %v9623_v56 = vunpack.i.h.bf16 %v9621_v30  ;;  %v9622_v12 = vunpack.i.l.bf16 %v9621_v30  ;;  %v4623_v38 = vmax.f32 %v11503_v1, %v9618_v50  ;;  %v9915_v50 = vld [vmem:[%s12689_s24 + $0xb0] ss:$8 sps:$4 sm:$0xff]   ;;  %v9920_v54 = vld [vmem:[%s12689_s24 + $0x4] ss:$8 sps:$4 sm:$0xff]  }
 0x524   : > { %4886 = vmatmul.mubr.bf16.gmra.mrb[76].mxu1 %v4652_v9  ;;  %v4622_v27 = vmax.f32 %v11501_v3, %v4534_v40  ;;  %v9917_v9 = vld [vmem:[%s12689_s24 + $0xb4] ss:$8 sps:$4 sm:$0xff]  }
 0x525   : > { %v4625_v61 = vmax.f32 %v11509_v8, %v9623_v56  ;;  %v4535_v2 = vsel %vm4517_vm6, %v9622_v12, %v9623_v56 }
 0x526   : > { %v4624_v11 = vmax.f32 %v11507_v6, %v4535_v2 }
 0x527   : > { %v4655_v16 = vpack.c.bf16 %v4625_v61, %v4623_v38 }
 0x528   : > { %v9626_v23 = vpop.permute.xlu0 %9625  ;;  %v4654_v33 = vpack.c.bf16 %v4624_v11, %v4622_v27 }
 0x529   : > { %v9628_v46 = vunpack.i.h.bf16 %v9626_v23  ;;  %v9627_v60 = vunpack.i.l.bf16 %v9626_v23  ;;  %8722 = vmatprep.mubr.msk.bf16.mxu1 %vm4757_vm7, %v4655_v16 }
 0x52a   : > { %v9631_v26 = vpop.permute.xlu1 %9630 }
 0x52b   : > { %v4536_v15 = vsel %vm4517_vm6, %v9627_v60, %v9628_v46  ;;  %v9633_v24 = vunpack.i.h.bf16 %v9631_v26  ;;  %v9632_v1 = vunpack.i.l.bf16 %v9631_v26  ;;  %v4627_v8 = vmax.f32 %v11517_v19, %v9628_v46 }
 0x52c   : > { %4894 = vmatmul.mubr.bf16.gmra.mrb[80].mxu1 %v4654_v33  ;;  %v4626_v6 = vmax.f32 %v11515_v63, %v4536_v15 }
 0x52d   : > { %v4629_v28 = vmax.f32 %v11523_v4, %v9633_v24  ;;  %v4537_v3 = vsel %vm4517_vm6, %v9632_v1, %v9633_v24  ;;  %v9918_v24 = vld [vmem:[%s12689_s24] ss:$8 sps:$4 sm:$0xff]  }
 0x52e   : > { %v4628_v39 = vmax.f32 %v11521_v22, %v4537_v3 }
 0x52f   : > { %v4657_v52 = vpack.c.bf16 %v4629_v28, %v4627_v8  ;;  %v9923_v8 = vld [vmem:[%s12689_s24 + $0x14] ss:$8 sps:$4 sm:$0xff]  }
 0x530   : > { %v9636_v59 = vpop.permute.xlu0 %9635  ;;  %v4656_v44 = vpack.c.bf16 %v4628_v39, %v4626_v6 }
 0x531   : > { %v9638_v48 = vunpack.i.h.bf16 %v9636_v59  ;;  %v9637_v5 = vunpack.i.l.bf16 %v9636_v59  ;;  %8723 = vmatprep.mubr.msk.bf16.mxu1 %vm4757_vm7, %v4657_v52  ;;  %v9921_v59 = vld [vmem:[%s12689_s24 + $0x10] ss:$8 sps:$4 sm:$0xff]  }
 0x532   : > { %v9641_v53 = vpop.permute.xlu1 %9640 }
 0x533   : > { %v4538_v43 = vsel %vm4517_vm6, %v9637_v5, %v9638_v48  ;;  %v9643_v29 = vunpack.i.h.bf16 %v9641_v53  ;;  %v9642_v19 = vunpack.i.l.bf16 %v9641_v53  ;;  %v4631_v4 = vmax.f32 %v11531_v17, %v9638_v48 }
 0x534   : > { %4902 = vmatmul.mubr.bf16.gmra.mrb[84].mxu1 %v4656_v44  ;;  %v4630_v22 = vmax.f32 %v11529_v7, %v4538_v43  ;;  %v9926_v44 = vld [vmem:[%s12689_s24 + $0x24] ss:$8 sps:$4 sm:$0xff]  }
 0x535   : > { %v4633_v10 = vmax.f32 %v11537_v55, %v9643_v29  ;;  %v4539_v63 = vsel %vm4517_vm6, %v9642_v19, %v9643_v29  ;;  %v9924_v29 = vld [vmem:[%s12689_s24 + $0x20] ss:$8 sps:$4 sm:$0xff]  }
 0x536   : > { %v4632_v47 = vmax.f32 %v11535_v51, %v4539_v63 }
 0x537   : > { %v4659_v62 = vpack.c.bf16 %v4633_v10, %v4631_v4  ;;  %v9929_v4 = vld [vmem:[%s12689_s24 + $0x34] ss:$8 sps:$4 sm:$0xff]  }
 0x538   : > { %v9646_v57 = vpop.permute.xlu0 %9645  ;;  %v4658_v13 = vpack.c.bf16 %v4632_v47, %v4630_v22 }
 0x539   : > { %v9648_v25 = vunpack.i.h.bf16 %v9646_v57  ;;  %v9647_v35 = vunpack.i.l.bf16 %v9646_v57  ;;  %8724 = vmatprep.mubr.msk.bf16.mxu1 %vm4757_vm7, %v4659_v62  ;;  %v9927_v57 = vld [vmem:[%s12689_s24 + $0x30] ss:$8 sps:$4 sm:$0xff]  }
 0x53a   : > { %v9651_v37 = vpop.permute.xlu1 %9650 }
 0x53b   : > { %v4540_v0 = vsel %vm4517_vm6, %v9647_v35, %v9648_v25  ;;  %v9653_v20 = vunpack.i.h.bf16 %v9651_v37  ;;  %v9652_v17 = vunpack.i.l.bf16 %v9651_v37  ;;  %v4635_v55 = vmax.f32 %v11545_v45, %v9648_v25  ;;  %v9909_v45 = vld [vmem:[%s12689_s24 + $0x90] ss:$8 sps:$4 sm:$0xff]  }
 0x53c   : > { %4910 = vmatmul.mubr.bf16.gmra.mrb[88].mxu1 %v4658_v13  ;;  %v4634_v51 = vmax.f32 %v11543_v42, %v4540_v0  ;;  %v9911_v42 = vld [vmem:[%s12689_s24 + $0x94] ss:$8 sps:$4 sm:$0xff]   ;;  %v9932_v13 = vld [vmem:[%s12689_s24 + $0x44] ss:$8 sps:$4 sm:$0xff]  }
 0x53d   : > { %v4637_v58 = vmax.f32 %v11554_v31, %v9653_v20  ;;  %v4541_v7 = vsel %vm4517_vm6, %v9652_v17, %v9653_v20  ;;  %5161 = vmatprep.subr.bf16.mxu1 %v9911_v42  ;;  %v9914_v31 = vld [vmem:[%s12689_s24 + $0xa4] ss:$8 sps:$4 sm:$0xff]   ;;  %v9930_v20 = vld [vmem:[%s12689_s24 + $0x40] ss:$8 sps:$4 sm:$0xff]  }
 0x53e   : > { %v4636_v34 = vmax.f32 %v11549_v21, %v4541_v7  ;;  %v12690_v21 = vmov 0   ;;  %5162 = vmatpush1.bf16.msra.mxu1 %v9909_v45 }
 0x53f   : > { %v4661_v32 = vpack.c.bf16 %v4637_v58, %v4635_v55  ;;  %5163 = vmatprep.subr.bf16.mxu1 %v9914_v31  ;;  %v9935_v55 = vld [vmem:[%s12689_s24 + $0x54] ss:$8 sps:$4 sm:$0xff]  }
 0x540   : > { %v4660_v18 = vpack.c.bf16 %v4636_v34, %v4634_v51 }
 0x541   : > { %8725 = vmatprep.mubr.msk.bf16.mxu1 %vm4757_vm7, %v4661_v32 }
 0x542   : > { %5164 = vmatpush1.bf16.msra.mxu1 %v9912_v14 }
 0x543   : > { %5165 = vmatprep.subr.bf16.mxu1 %v9917_v9 }
 0x544   : > { %4918 = vmatmul.mubr.bf16.gmra.mrb[92].mxu1 %v4660_v18 }
 0x545   : > { %5187 = vmatprep.mubr.bf16.mxu1 %v12690_v21 }
 0x546   : > { %5166 = vmatpush1.bf16.msra.mxu1 %v9915_v50 }
 0x547   : > { %5392 = vmatprep.subr.bf16.mxu1 %v9920_v54 }
 0x5bf   : > { %v4831_v30 = vpop.f32.mrb[48].mxu1 }
 0x5c0   : > { %v4833_v40 = vpop.f32.mrb[49].mxu1 }
 0x5c1   : > { %v4834_v56 = vpop.f32.mrb[50].mxu1 }
 0x5c2   : > { %v11681_v12 = vpack.c.bf16 %v4834_v56, %v4831_v30  ;;  %v4836_v38 = vpop.f32.mrb[51].mxu1 }
 0x5c4   : > { %v4966_v61 = vshll.u32 %v11681_v12, 16  ;;  %v4964_v46 = vshrl.u32 %v11681_v12, 16 }
 0x5c6   : > { %v4968_v16 = vrot.slane %v4966_v61, 1 }
 0x5c7   : > { %v4839_v2 = vpop.f32.mrb[52].mxu1 }
 0x5c8   : > { %v4841_v27 = vpop.f32.mrb[53].mxu1  ;;  %v4969_v26 = vor.u32 %v4968_v16, %v4964_v46 }
 0x5c9   : > { %v4842_v11 = vpop.f32.mrb[54].mxu1 }
 0x5ca   : > { %v11684_v23 = vpack.c.bf16 %v4842_v11, %v4839_v2  ;;  %v4844_v33 = vpop.f32.mrb[55].mxu1 }
 0x5cc   : > { %v4971_v60 = vshll.u32 %v11684_v23, 16  ;;  %v4975_v48 = vshrl.u32 %v11684_v23, 16 }
 0x5ce   : > { %v4973_v15 = vrot.slane %v4971_v60, 1 }
 0x5cf   : > { %v4847_v1 = vpop.f32.mrb[56].mxu1 }
 0x5d0   : > { %v4849_v28 = vpop.f32.mrb[57].mxu1  ;;  %v4974_v3 = vsel %vm902_vm0, %v4969_v26, %v4973_v15  ;;  %v4977_v53 = vor.u32 %v4975_v48, %v4973_v15 }
 0x5d1   : > { %v4850_v6 = vpop.f32.mrb[58].mxu1  ;;  %8750 = vmatmul.mubr.msk.bf16.vlgmr.msra.gmra.mrb[96].mxu1 %vm5118_vm8, %v4974_v3 }
 0x5d2   : > { %v11696_v39 = vpack.c.bf16 %v4850_v6, %v4847_v1  ;;  %v4852_v52 = vpop.f32.mrb[59].mxu1  ;;  %5197 = vmatprep.mubr.bf16.mxu1 %v12690_v21  ;;  %5393 = vmatpush1.bf16.msra.mxu1 %v9918_v24 }
 0x5d3   : > { %5394 = vmatprep.subr.bf16.mxu1 %v9923_v8  ;;  %v9938_v8 = vld [vmem:[%s12689_s24 + $0xc4] ss:$8 sps:$4 sm:$0xff]  }
 0x5d4   : > { %v4979_v5 = vshll.u32 %v11696_v39, 16  ;;  %v4983_v25 = vshrl.u32 %v11696_v39, 16 }
 0x5d6   : > { %v4981_v43 = vrot.slane %v4979_v5, 1  ;;  %5395 = vmatpush1.bf16.msra.mxu1 %v9921_v59 }
 0x5d7   : > { %v4855_v19 = vpop.f32.mrb[60].mxu1  ;;  %5396 = vmatprep.subr.bf16.mxu1 %v9926_v44 }
 0x5d8   : > { %v4857_v10 = vpop.f32.mrb[61].mxu1  ;;  %v4982_v63 = vsel %vm902_vm0, %v4977_v53, %v4981_v43  ;;  %v4985_v37 = vor.u32 %v4983_v25, %v4981_v43 }
 0x5d9   : > { %v4858_v22 = vpop.f32.mrb[62].mxu1  ;;  %8751 = vmatmul.mubr.msk.bf16.gmra.mrb[100].mxu1 %vm5118_vm8, %v4982_v63 }
 0x5da   : > { %v11715_v47 = vpack.c.bf16 %v4858_v22, %v4855_v19  ;;  %v4860_v62 = vpop.f32.mrb[63].mxu1  ;;  %5207 = vmatprep.mubr.bf16.mxu1 %v12690_v21  ;;  %5397 = vmatpush1.bf16.msra.mxu1 %v9924_v29 }
 0x5db   : > { %5398 = vmatprep.subr.bf16.mxu1 %v9929_v4 }
 0x5dc   : > { %v4987_v35 = vshll.u32 %v11715_v47, 16  ;;  %v4991_v18 = vshrl.u32 %v11715_v47, 16 }
 0x5de   : > { %v4989_v0 = vrot.slane %v4987_v35, 1  ;;  %5399 = vmatpush1.bf16.msra.mxu1 %v9927_v57 }
 0x5df   : > { %v4863_v17 = vpop.f32.mrb[64].mxu1  ;;  %5400 = vmatprep.subr.bf16.mxu1 %v9932_v13 }
 0x5e0   : > { %v4865_v58 = vpop.f32.mrb[65].mxu1  ;;  %v4990_v7 = vsel %vm902_vm0, %v4985_v37, %v4989_v0  ;;  %v4993_v42 = vor.u32 %v4991_v18, %v4989_v0 }
 0x5e1   : > { %v4866_v51 = vpop.f32.mrb[66].mxu1  ;;  %8752 = vmatmul.mubr.msk.bf16.gmra.mrb[104].mxu1 %vm5118_vm8, %v4990_v7 }
 0x5e2   : > { %v11734_v34 = vpack.c.bf16 %v4866_v51, %v4863_v17  ;;  %v4868_v32 = vpop.f32.mrb[67].mxu1  ;;  %5217 = vmatprep.mubr.bf16.mxu1 %v12690_v21  ;;  %5401 = vmatpush1.bf16.msra.mxu1 %v9930_v20 }
 0x5e3   : > { %5402 = vmatprep.subr.bf16.mxu1 %v9935_v55 }
 0x5e4   : > { %v4995_v36 = vshll.u32 %v11734_v34, 16  ;;  %v4999_v40 = vshrl.u32 %v11734_v34, 16 }
 0x5e6   : > { %v4997_v45 = vrot.slane %v4995_v36, 1  ;;  %5403 = vmatpush1.bf16.msra.mxu1 %v9933_v41 }
 0x5e7   : > { %v4871_v31 = vpop.f32.mrb[68].mxu1  ;;  %5689 = vmatprep.subr.bf16.mxu1 %v9938_v8  ;;  %v9939_v8 = vld [vmem:[%s12689_s24 + $0xd0] ss:$8 sps:$4 sm:$0xff]  }
 0x5e8   : > { %v4873_v14 = vpop.f32.mrb[69].mxu1  ;;  %v4998_v9 = vsel %vm902_vm0, %v4993_v42, %v4997_v45  ;;  %v5001_v38 = vor.u32 %v4999_v40, %v4997_v45 }
 0x5e9   : > { %v4874_v50 = vpop.f32.mrb[70].mxu1  ;;  %8753 = vmatmul.mubr.msk.bf16.gmra.mrb[108].mxu1 %vm5118_vm8, %v4998_v9 }
 0x5ea   : > { %v11744_v54 = vpack.c.bf16 %v4874_v50, %v4871_v31  ;;  %v4876_v30 = vpop.f32.mrb[71].mxu1  ;;  %5227 = vmatprep.mubr.bf16.mxu1 %v12690_v21 }
 0x5ec   : > { %v5003_v56 = vshll.u32 %v11744_v54, 16  ;;  %v5007_v60 = vshrl.u32 %v11744_v54, 16 }
 0x5ee   : > { %v5005_v61 = vrot.slane %v5003_v56, 1 }
 0x5ef   : > { %v4879_v2 = vpop.f32.mrb[72].mxu1 }
 0x5f0   : > { %v4881_v27 = vpop.f32.mrb[73].mxu1  ;;  %v5006_v11 = vsel %vm902_vm0, %v5001_v38, %v5005_v61  ;;  %v5009_v15 = vor.u32 %v5007_v60, %v5005_v61 }
 0x5f1   : > { %v4882_v16 = vpop.f32.mrb[74].mxu1  ;;  %8754 = vmatmul.mubr.msk.bf16.gmra.mrb[112].mxu1 %vm5118_vm8, %v5006_v11 }
 0x5f2   : > { %v11751_v33 = vpack.c.bf16 %v4882_v16, %v4879_v2  ;;  %v4884_v46 = vpop.f32.mrb[75].mxu1  ;;  %5237 = vmatprep.mubr.bf16.mxu1 %v12690_v21 }
 0x5f4   : > { %v5011_v26 = vshll.u32 %v11751_v33, 16  ;;  %v5015_v44 = vshrl.u32 %v11751_v33, 16 }
 0x5f6   : > { %v5013_v24 = vrot.slane %v5011_v26, 1 }
 0x5f7   : > { %v4887_v1 = vpop.f32.mrb[76].mxu1 }
 0x5f8   : > { %v4889_v28 = vpop.f32.mrb[77].mxu1  ;;  %v5014_v3 = vsel %vm902_vm0, %v5009_v15, %v5013_v24  ;;  %v5017_v5 = vor.u32 %v5015_v44, %v5013_v24  ;;  %v9936_v24 = vld [vmem:[%s12689_s24 + $0xc0] ss:$8 sps:$4 sm:$0xff]   ;;  %v9950_v44 = vld [vmem:[%s12689_s24 + $0x104] ss:$8 sps:$4 sm:$0xff]  }
 0x5f9   : > { %v4890_v6 = vpop.f32.mrb[78].mxu1  ;;  %8755 = vmatmul.mubr.msk.bf16.gmra.mrb[116].mxu1 %vm5118_vm8, %v5014_v3  ;;  %v9944_v28 = vld [vmem:[%s12689_s24 + $0xe4] ss:$8 sps:$4 sm:$0xff]   ;;  %v9942_v3 = vld [vmem:[%s12689_s24 + $0xe0] ss:$8 sps:$4 sm:$0xff]  }
 0x5fa   : > { %v11761_v52 = vpack.c.bf16 %v4890_v6, %v4887_v1  ;;  %v4892_v59 = vpop.f32.mrb[79].mxu1  ;;  %5247 = vmatprep.mubr.bf16.mxu1 %v12690_v21  ;;  %v9941_v1 = vld [vmem:[%s12689_s24 + $0xd4] ss:$8 sps:$4 sm:$0xff]  }
 0x5fb   : > { %v9947_v6 = vld [vmem:[%s12689_s24 + $0xf4] ss:$8 sps:$4 sm:$0xff]   ;;  %v9945_v59 = vld [vmem:[%s12689_s24 + $0xf0] ss:$8 sps:$4 sm:$0xff]  }
 0x5fc   : > { %v5019_v48 = vshll.u32 %v11761_v52, 16  ;;  %v5023_v22 = vshrl.u32 %v11761_v52, 16 }
 0x5fe   : > { %v5021_v53 = vrot.slane %v5019_v48, 1  ;;  %v9948_v48 = vld [vmem:[%s12689_s24 + $0x100] ss:$8 sps:$4 sm:$0xff]  }
 0x5ff   : > { %v4895_v43 = vpop.f32.mrb[80].mxu1 }
 0x600   : > { %v4897_v29 = vpop.f32.mrb[81].mxu1  ;;  %v5022_v19 = vsel %vm902_vm0, %v5017_v5, %v5021_v53  ;;  %v5025_v57 = vor.u32 %v5023_v22, %v5021_v53  ;;  %v9953_v5 = vld [vmem:[%s12689_s24 + $0x114] ss:$8 sps:$4 sm:$0xff]   ;;  %v9951_v53 = vld [vmem:[%s12689_s24 + $0x110] ss:$8 sps:$4 sm:$0xff]   ;;  %v5575_v22 = vrot.slane %v11715_v47, 1 }
 0x601   : > { %v4898_v4 = vpop.f32.mrb[82].mxu1  ;;  %8756 = vmatmul.mubr.msk.bf16.gmra.mrb[120].mxu1 %vm5118_vm8, %v5022_v19  ;;  %v5570_v29 = vrot.slane %v11681_v12, 1 }
 0x602   : > { %v11768_v10 = vpack.c.bf16 %v4898_v4, %v4895_v43  ;;  %v4900_v63 = vpop.f32.mrb[83].mxu1  ;;  %5257 = vmatprep.mubr.bf16.mxu1 %v12690_v21  ;;  %v5571_v43 = vrot.slane %v11684_v23, 1  ;;  %v5573_v4 = vrot.slane %v11696_v39, 1 }
 0x604   : > { %v5027_v62 = vshll.u32 %v11768_v10, 16  ;;  %v5031_v55 = vshrl.u32 %v11768_v10, 16  ;;  %v5572_v19 = vsel %vm2301_vm3, %v5570_v29, %v5571_v43  ;;  %v5574_v63 = vsel %vm2301_vm3, %v5571_v43, %v5573_v4 }
 0x606   : > { %v5029_v13 = vrot.slane %v5027_v62, 1 }
 0x607   : > { %v4903_v25 = vpop.f32.mrb[84].mxu1 }
 0x608   : > { %v4905_v35 = vpop.f32.mrb[85].mxu1  ;;  %v5030_v37 = vsel %vm902_vm0, %v5025_v57, %v5029_v13  ;;  %v5033_v7 = vor.u32 %v5031_v55, %v5029_v13  ;;  %v5890_v55 = vld [vmem:[%s12631_s7] sm:$0x3] }
 0x609   : > { %v4906_v0 = vpop.f32.mrb[86].mxu1  ;;  %8757 = vmatmul.mubr.msk.bf16.gmra.mrb[124].mxu1 %vm5118_vm8, %v5030_v37 }
 0x60a   : > { %v11775_v20 = vpack.c.bf16 %v4906_v0, %v4903_v25  ;;  %v4908_v17 = vpop.f32.mrb[87].mxu1  ;;  %5267 = vmatprep.mubr.bf16.mxu1 %v12690_v21 }
 0x60c   : > { %v5035_v58 = vshll.u32 %v11775_v20, 16  ;;  %v5039_v31 = vshrl.u32 %v11775_v20, 16 }
 0x60e   : > { %v5037_v51 = vrot.slane %v5035_v58, 1  ;;  %v11924_v58 = vrot.slane %v5890_v55, %v10966_v49 }
 0x60f   : > { %v4911_v32 = vpop.f32.mrb[88].mxu1 }
 0x610   : > { %v4913_v41 = vpop.f32.mrb[89].mxu1  ;;  %v5038_v18 = vsel %vm902_vm0, %v5033_v7, %v5037_v51  ;;  %v5041_v9 = vor.u32 %v5039_v31, %v5037_v51  ;;  %v12691_v7 = vld [vmem:[#allocation2_spill] sm:$0xff] }
 0x611   : > { %v4914_v36 = vpop.f32.mrb[90].mxu1  ;;  %8758 = vmatmul.mubr.msk.bf16.gmra.mrb[128].mxu1 %vm5118_vm8, %v5038_v18  ;;  %v11927_v51 = vrot.slane %v5890_v55, %v12691_v7 }
 0x612   : > { %v11782_v42 = vpack.c.bf16 %v4914_v36, %v4911_v32  ;;  %v4916_v45 = vpop.f32.mrb[91].mxu1  ;;  %5277 = vmatprep.mubr.bf16.mxu1 %v12690_v21 }
 0x614   : > { %v5043_v14 = vshll.u32 %v11782_v42, 16  ;;  %v5047_v27 = vshrl.u32 %v11782_v42, 16 }
 0x616   : > { %v5045_v50 = vrot.slane %v5043_v14, 1 }
 0x617   : > { %v4919_v30 = vpop.f32.mrb[92].mxu1 }
 0x618   : > { %v4921_v40 = vpop.f32.mrb[93].mxu1  ;;  %v5046_v56 = vsel %vm902_vm0, %v5041_v9, %v5045_v50  ;;  %v5049_v16 = vor.u32 %v5047_v27, %v5045_v50 }
 0x619   : > { %v4922_v38 = vpop.f32.mrb[94].mxu1  ;;  %8759 = vmatmul.mubr.msk.bf16.gmra.mrb[132].mxu1 %vm5118_vm8, %v5046_v56 }
 0x61a   : > { %v11789_v61 = vpack.c.bf16 %v4922_v38, %v4919_v30  ;;  %v4924_v2 = vpop.f32.mrb[95].mxu1  ;;  %5287 = vmatprep.mubr.bf16.mxu1 %v12690_v21 }
 0x61c   : > { %v5051_v11 = vshll.u32 %v11789_v61, 16  ;;  %v5055_v26 = vshrl.u32 %v11789_v61, 16 }
 0x61e   : > { %v5053_v46 = vrot.slane %v5051_v11, 1 }
 0x620   : > { %v5054_v60 = vsel %vm902_vm0, %v5049_v16, %v5053_v46  ;;  %v5057_v15 = vor.u32 %v5055_v26, %v5053_v46 }
 0x621   : > { %8760 = vmatmul.mubr.msk.bf16.gmra.mrb[136].mxu1 %vm5118_vm8, %v5054_v60 }
 0x622   : > { %5297 = vmatprep.mubr.bf16.mxu1 %v12690_v21 }
 0x629   : > { %8761 = vmatmul.mubr.msk.bf16.gmra.mrb[140].mxu1 %vm5118_vm8, %v5057_v15 }
 0x62a   : > { %5424 = vmatprep.mubr.bf16.mxu1 %v12690_v21 }
 0x631   : > { %8774 = vmatmul.mubr.msk.bf16.vlgmr.msra.gmra.mrb[96].mxu1 %vm5118_vm8, %v11681_v12  ;;  %v5577_v12 = vrot.slane %v11734_v34, 1 }
 0x632   : > { %5434 = vmatprep.mubr.bf16.mxu1 %v12690_v21  ;;  %5690 = vmatpush1.bf16.msra.mxu1 %v9936_v24 }
 0x633   : > { %5691 = vmatprep.subr.bf16.mxu1 %v9941_v1  ;;  %v5578_v62 = vsel %vm2301_vm3, %v5575_v22, %v5577_v12 }
 0x636   : > { %5692 = vmatpush1.bf16.msra.mxu1 %v9939_v8 }
 0x637   : > { %5693 = vmatprep.subr.bf16.mxu1 %v9944_v28 }
 0x639   : > { %8775 = vmatmul.mubr.msk.bf16.gmra.mrb[100].mxu1 %vm5118_vm8, %v11684_v23  ;;  %v5576_v23 = vsel %vm2301_vm3, %v5573_v4, %v5575_v22 }
 0x63a   : > { %5444 = vmatprep.mubr.bf16.mxu1 %v12690_v21  ;;  %5694 = vmatpush1.bf16.msra.mxu1 %v9942_v3 }
 0x63b   : > { %5695 = vmatprep.subr.bf16.mxu1 %v9947_v6 }
 0x63e   : > { %5696 = vmatpush1.bf16.msra.mxu1 %v9945_v59 }
 0x63f   : > { %5697 = vmatprep.subr.bf16.mxu1 %v9950_v44 }
 0x641   : > { %8776 = vmatmul.mubr.msk.bf16.gmra.mrb[104].mxu1 %vm5118_vm8, %v11696_v39  ;;  %v5579_v39 = vrot.slane %v11744_v54, 1 }
 0x642   : > { %5454 = vmatprep.mubr.bf16.mxu1 %v12690_v21  ;;  %5698 = vmatpush1.bf16.msra.mxu1 %v9948_v48 }
 0x643   : > { %5699 = vmatprep.subr.bf16.mxu1 %v9953_v5  ;;  %v5580_v57 = vsel %vm2301_vm3, %v5577_v12, %v5579_v39 }
 0x646   : > { %5700 = vmatpush1.bf16.msra.mxu1 %v9951_v53 }
 0x647   : > { %6679 = vmatprep.subr.bf16.mxu1 %v12690_v21 }
 0x649   : > { %8777 = vmatmul.mubr.msk.bf16.gmra.mrb[108].mxu1 %vm5118_vm8, %v11715_v47  ;;  %v5581_v47 = vrot.slane %v11751_v33, 1 }
 0x64a   : > { %5464 = vmatprep.mubr.bf16.mxu1 %v12690_v21 }
 0x64b   : > { %v5582_v13 = vsel %vm2301_vm3, %v5579_v39, %v5581_v47 }
 0x651   : > { %8778 = vmatmul.mubr.msk.bf16.gmra.mrb[112].mxu1 %vm5118_vm8, %v11734_v34  ;;  %v5583_v34 = vrot.slane %v11761_v52, 1 }
 0x652   : > { %5474 = vmatprep.mubr.bf16.mxu1 %v12690_v21 }
 0x653   : > { %v5584_v25 = vsel %vm2301_vm3, %v5581_v47, %v5583_v34 }
 0x659   : > { %8779 = vmatmul.mubr.msk.bf16.gmra.mrb[116].mxu1 %vm5118_vm8, %v11744_v54  ;;  %v5585_v54 = vrot.slane %v11768_v10, 1 }
 0x65a   : > { %5484 = vmatprep.mubr.bf16.mxu1 %v12690_v21 }
 0x65b   : > { %v5586_v35 = vsel %vm2301_vm3, %v5583_v34, %v5585_v54 }
 0x661   : > { %8780 = vmatmul.mubr.msk.bf16.gmra.mrb[120].mxu1 %vm5118_vm8, %v11751_v33  ;;  %v5587_v33 = vrot.slane %v11775_v20, 1 }
 0x662   : > { %5494 = vmatprep.mubr.bf16.mxu1 %v12690_v21 }
 0x663   : > { %v5588_v37 = vsel %vm2301_vm3, %v5585_v54, %v5587_v33 }
 0x669   : > { %8781 = vmatmul.mubr.msk.bf16.gmra.mrb[124].mxu1 %vm5118_vm8, %v11761_v52  ;;  %v5589_v52 = vrot.slane %v11782_v42, 1 }
 0x66a   : > { %5504 = vmatprep.mubr.bf16.mxu1 %v12690_v21 }
 0x66b   : > { %v5590_v0 = vsel %vm2301_vm3, %v5587_v33, %v5589_v52 }
 0x671   : > { %8782 = vmatmul.mubr.msk.bf16.gmra.mrb[128].mxu1 %vm5118_vm8, %v11768_v10  ;;  %v5591_v10 = vrot.slane %v11789_v61, 1 }
 0x672   : > { %5514 = vmatprep.mubr.bf16.mxu1 %v12690_v21 }
 0x673   : > { %v5592_v17 = vsel %vm2301_vm3, %v5589_v52, %v5591_v10 }
 0x679   : > { %8783 = vmatmul.mubr.msk.bf16.gmra.mrb[132].mxu1 %vm5118_vm8, %v11775_v20  ;;  %v9956_v20 = vld [vmem:[%s12632_s8 + $0x4] ss:$8 sps:$4 sm:$0xff]  }
 0x67a   : > { %5524 = vmatprep.mubr.bf16.mxu1 %v12690_v21  ;;  %8834 = vmatprep.mubr.msk.bf16.mxu0 %vm6322_vm9, %v9956_v20 }
 0x681   : > { %8784 = vmatmul.mubr.msk.bf16.gmra.mrb[136].mxu1 %vm5118_vm8, %v11782_v42 }
 0x682   : > { %5534 = vmatprep.mubr.bf16.mxu1 %v12690_v21 }
 0x689   : > { %8785 = vmatmul.mubr.msk.bf16.gmra.mrb[140].mxu1 %vm5118_vm8, %v11789_v61 }
 0x68a   : > { %5721 = vmatprep.mubr.bf16.mxu1 %v12690_v21 }
 0x691   : > { %8810 = vmatmul.mubr.msk.bf16.vlgmr.msra.gmra.mrb[96].mxu1 %vm5118_vm8, %v5572_v19 }
 0x692   : > { %5731 = vmatprep.mubr.bf16.mxu1 %v12690_v21 }
 0x699   : > { %8811 = vmatmul.mubr.msk.bf16.gmra.mrb[100].mxu1 %vm5118_vm8, %v5574_v63 }
 0x69a   : > { %5741 = vmatprep.mubr.bf16.mxu1 %v12690_v21 }
 0x6a1   : > { %8812 = vmatmul.mubr.msk.bf16.gmra.mrb[104].mxu1 %vm5118_vm8, %v5576_v23 }
 0x6a2   : > { %5751 = vmatprep.mubr.bf16.mxu1 %v12690_v21 }
 0x6a9   : > { %8813 = vmatmul.mubr.msk.bf16.gmra.mrb[108].mxu1 %vm5118_vm8, %v5578_v62 }
 0x6aa   : > { %5761 = vmatprep.mubr.bf16.mxu1 %v12690_v21 }
 0x6b1   : > { %8814 = vmatmul.mubr.msk.bf16.gmra.mrb[112].mxu1 %vm5118_vm8, %v5580_v57 }
 0x6b2   : > { %5771 = vmatprep.mubr.bf16.mxu1 %v12690_v21 }
 0x6b9   : > { %8815 = vmatmul.mubr.msk.bf16.gmra.mrb[116].mxu1 %vm5118_vm8, %v5582_v13 }
 0x6ba   : > { %5781 = vmatprep.mubr.bf16.mxu1 %v12690_v21 }
 0x6c1   : > { %8816 = vmatmul.mubr.msk.bf16.gmra.mrb[120].mxu1 %vm5118_vm8, %v5584_v25 }
 0x6c2   : > { %5791 = vmatprep.mubr.bf16.mxu1 %v12690_v21 }
 0x6c9   : > { %8817 = vmatmul.mubr.msk.bf16.gmra.mrb[124].mxu1 %vm5118_vm8, %v5586_v35 }
 0x6ca   : > { %5801 = vmatprep.mubr.bf16.mxu1 %v12690_v21 }
 0x6d1   : > { %8818 = vmatmul.mubr.msk.bf16.gmra.mrb[128].mxu1 %vm5118_vm8, %v5588_v37 }
 0x6d2   : > { %5811 = vmatprep.mubr.bf16.mxu1 %v12690_v21 }
 0x6d9   : > { %8819 = vmatmul.mubr.msk.bf16.gmra.mrb[132].mxu1 %vm5118_vm8, %v5590_v0 }
 0x6da   : > { %5821 = vmatprep.mubr.bf16.mxu1 %v12690_v21 }
 0x6e1   : > { %8820 = vmatmul.mubr.msk.bf16.gmra.mrb[136].mxu1 %vm5118_vm8, %v5592_v17 }
 0x6e2   : > { %5831 = vmatprep.mubr.bf16.mxu1 %v12690_v21 }
 0x6e9   : > { %8821 = vmatmul.mubr.msk.bf16.gmra.mrb[140].mxu1 %vm5118_vm8, %v5591_v10 }
 0x764   : > { %v5723_v32 = vpop.f32.mrb[96].mxu1 }
 0x765   : > { %v5902_v41 = vadd.f32 %v11924_v58, %v5723_v32  ;;  %v5725_v18 = vpop.f32.mrb[97].mxu1 }
 0x766   : > { %v5903_v36 = vadd.f32 %v11927_v51, %v5725_v18  ;;  %v5727_v42 = vpop.f32.mrb[98].mxu1 }
 0x767   : > { %v5950_v45 = vmax.f32 %v5902_v41, 0.0  ;;  %v5904_v31 = vadd.f32 %v11924_v58, %v5727_v42  ;;  %v5729_v14 = vpop.f32.mrb[99].mxu1 }
 0x768   : > { %v5951_v9 = vmax.f32 %v5903_v36, 0.0  ;;  %v5905_v50 = vadd.f32 %v11927_v51, %v5729_v14 }
 0x769   : > { %v5952_v30 = vmax.f32 %v5904_v31, 0.0  ;;  %v6046_v56 = vrot.slane %v5950_v45, 1 }
 0x76a   : > { %v5953_v40 = vmax.f32 %v5905_v50, 0.0  ;;  %v6049_v61 = vrot.slane %v5951_v9, 1 }
 0x76b   : > { %v6047_v38 = vrot.slane %v5952_v30, 1 }
 0x76c   : > { %v6050_v2 = vrot.slane %v5953_v40, 1  ;;  %v5733_v27 = vpop.f32.mrb[100].mxu1 }
 0x76d   : > { %v6048_v11 = vsel %vm2301_vm3, %v6046_v56, %v6047_v38  ;;  %v5906_v16 = vadd.f32 %v11924_v58, %v5733_v27  ;;  %v5735_v46 = vpop.f32.mrb[101].mxu1 }
 0x76e   : > { %v6188_v60 = vmax.f32 %v5950_v45, %v6048_v11  ;;  %v5907_v26 = vadd.f32 %v11927_v51, %v5735_v46  ;;  %v5737_v15 = vpop.f32.mrb[102].mxu1  ;;  %v6051_v24 = vsel %vm2301_vm3, %v6049_v61, %v6050_v2 }
 0x76f   : > { %v5954_v1 = vmax.f32 %v5906_v16, 0.0  ;;  %v5908_v8 = vadd.f32 %v11924_v58, %v5737_v15  ;;  %v5739_v28 = vpop.f32.mrb[103].mxu1  ;;  %v6189_v3 = vmax.f32 %v5951_v9, %v6051_v24 }
 0x770   : > { %v5955_v6 = vmax.f32 %v5907_v26, 0.0  ;;  %v5909_v59 = vadd.f32 %v11927_v51, %v5739_v28 }
 0x771   : > { %v6052_v44 = vrot.slane %v5954_v1, 1  ;;  %v5956_v48 = vmax.f32 %v5908_v8, 0.0 }
 0x772   : > { %v6054_v5 = vrot.slane %v5955_v6, 1  ;;  %v5957_v53 = vmax.f32 %v5909_v59, 0.0 }
 0x773   : > { %v6053_v43 = vsel %vm2301_vm3, %v6047_v38, %v6052_v44  ;;  %v6056_v29 = vrot.slane %v5956_v48, 1 }
 0x774   : > { %v6190_v19 = vmax.f32 %v5952_v30, %v6053_v43  ;;  %v6058_v4 = vrot.slane %v5957_v53, 1  ;;  %v5743_v63 = vpop.f32.mrb[104].mxu1  ;;  %v6055_v22 = vsel %vm2301_vm3, %v6050_v2, %v6054_v5 }
 0x775   : > { %v6057_v23 = vsel %vm2301_vm3, %v6052_v44, %v6056_v29  ;;  %v5910_v12 = vadd.f32 %v11924_v58, %v5743_v63  ;;  %v5745_v62 = vpop.f32.mrb[105].mxu1  ;;  %v6191_v39 = vmax.f32 %v5953_v40, %v6055_v22 }
 0x776   : > { %v6192_v57 = vmax.f32 %v5954_v1, %v6057_v23  ;;  %v5911_v47 = vadd.f32 %v11927_v51, %v5745_v62  ;;  %v5747_v13 = vpop.f32.mrb[106].mxu1  ;;  %v6247_v34 = vpack.c.bf16 %v6190_v19, %v6188_v60  ;;  %v6059_v25 = vsel %vm2301_vm3, %v6054_v5, %v6058_v4 }
 0x777   : > { %v5958_v54 = vmax.f32 %v5910_v12, 0.0  ;;  %v5912_v35 = vadd.f32 %v11924_v58, %v5747_v13  ;;  %v5749_v33 = vpop.f32.mrb[107].mxu1  ;;  %v6248_v37 = vpack.c.bf16 %v6191_v39, %v6189_v3  ;;  %v6193_v52 = vmax.f32 %v5955_v6, %v6059_v25 }
 0x778   : > { %v5959_v0 = vmax.f32 %v5911_v47, 0.0  ;;  %v5913_v10 = vadd.f32 %v11927_v51, %v5749_v33 }
 0x779   : > { %v6060_v17 = vrot.slane %v5958_v54, 1  ;;  %v5960_v20 = vmax.f32 %v5912_v35, 0.0  ;;  %6347 = vmatprep.subr.bf16.mxu0 %v6248_v37 }
 0x77a   : > { %v6062_v55 = vrot.slane %v5959_v0, 1  ;;  %v5961_v32 = vmax.f32 %v5913_v10, 0.0  ;;  %6348 = vmatpush1.bf16.msra.mxu0 %v6247_v34 }
 0x77b   : > { %v6061_v41 = vsel %vm2301_vm3, %v6056_v29, %v6060_v17  ;;  %v6064_v18 = vrot.slane %v5960_v20, 1 }
 0x77c   : > { %v6194_v36 = vmax.f32 %v5956_v48, %v6061_v41  ;;  %v6066_v42 = vrot.slane %v5961_v32, 1  ;;  %v5753_v45 = vpop.f32.mrb[108].mxu1  ;;  %v6063_v31 = vsel %vm2301_vm3, %v6058_v4, %v6062_v55 }
 0x77d   : > { %v6065_v14 = vsel %vm2301_vm3, %v6060_v17, %v6064_v18  ;;  %v5914_v9 = vadd.f32 %v11924_v58, %v5753_v45  ;;  %v5755_v50 = vpop.f32.mrb[109].mxu1  ;;  %v6195_v30 = vmax.f32 %v5957_v53, %v6063_v31 }
 0x77e   : > { %v6196_v40 = vmax.f32 %v5958_v54, %v6065_v14  ;;  %v5915_v56 = vadd.f32 %v11927_v51, %v5755_v50  ;;  %v5757_v38 = vpop.f32.mrb[110].mxu1  ;;  %v6249_v61 = vpack.c.bf16 %v6194_v36, %v6192_v57  ;;  %v6067_v2 = vsel %vm2301_vm3, %v6062_v55, %v6066_v42 }
 0x77f   : > { %v5962_v27 = vmax.f32 %v5914_v9, 0.0  ;;  %v5916_v11 = vadd.f32 %v11924_v58, %v5757_v38  ;;  %v5759_v16 = vpop.f32.mrb[111].mxu1  ;;  %v6250_v46 = vpack.c.bf16 %v6195_v30, %v6193_v52  ;;  %v6197_v60 = vmax.f32 %v5959_v0, %v6067_v2 }
 0x780   : > { %v5963_v26 = vmax.f32 %v5915_v56, 0.0  ;;  %v5917_v15 = vadd.f32 %v11927_v51, %v5759_v16 }
 0x781   : > { %v6068_v24 = vrot.slane %v5962_v27, 1  ;;  %v5964_v1 = vmax.f32 %v5916_v11, 0.0  ;;  %6349 = vmatprep.subr.bf16.mxu0 %v6250_v46 }
 0x782   : > { %v6070_v8 = vrot.slane %v5963_v26, 1  ;;  %v5965_v28 = vmax.f32 %v5917_v15, 0.0  ;;  %6350 = vmatpush1.bf16.msra.mxu0 %v6249_v61 }
 0x783   : > { %v6069_v3 = vsel %vm2301_vm3, %v6064_v18, %v6068_v24  ;;  %v6072_v6 = vrot.slane %v5964_v1, 1 }
 0x784   : > { %v6198_v59 = vmax.f32 %v5960_v20, %v6069_v3  ;;  %v6074_v44 = vrot.slane %v5965_v28, 1  ;;  %v5763_v48 = vpop.f32.mrb[112].mxu1  ;;  %v6071_v5 = vsel %vm2301_vm3, %v6066_v42, %v6070_v8 }
 0x785   : > { %v6073_v53 = vsel %vm2301_vm3, %v6068_v24, %v6072_v6  ;;  %v5918_v43 = vadd.f32 %v11924_v58, %v5763_v48  ;;  %v5765_v29 = vpop.f32.mrb[113].mxu1  ;;  %v6199_v19 = vmax.f32 %v5961_v32, %v6071_v5 }
 0x786   : > { %v6200_v4 = vmax.f32 %v5962_v27, %v6073_v53  ;;  %v5919_v63 = vadd.f32 %v11927_v51, %v5765_v29  ;;  %v5767_v22 = vpop.f32.mrb[114].mxu1  ;;  %v6251_v23 = vpack.c.bf16 %v6198_v59, %v6196_v40  ;;  %v6075_v12 = vsel %vm2301_vm3, %v6070_v8, %v6074_v44 }
 0x787   : > { %v5966_v62 = vmax.f32 %v5918_v43, 0.0  ;;  %v5920_v39 = vadd.f32 %v11924_v58, %v5767_v22  ;;  %v5769_v57 = vpop.f32.mrb[115].mxu1  ;;  %v6252_v47 = vpack.c.bf16 %v6199_v19, %v6197_v60  ;;  %v6201_v13 = vmax.f32 %v5963_v26, %v6075_v12 }
 0x788   : > { %v5967_v34 = vmax.f32 %v5919_v63, 0.0  ;;  %v5921_v25 = vadd.f32 %v11927_v51, %v5769_v57 }
 0x789   : > { %v6076_v54 = vrot.slane %v5966_v62, 1  ;;  %v5968_v35 = vmax.f32 %v5920_v39, 0.0  ;;  %6351 = vmatprep.subr.bf16.mxu0 %v6252_v47 }
 0x78a   : > { %v6078_v33 = vrot.slane %v5967_v34, 1  ;;  %v5969_v37 = vmax.f32 %v5921_v25, 0.0  ;;  %6352 = vmatpush1.bf16.msra.mxu0 %v6251_v23 }
 0x78b   : > { %v6077_v52 = vsel %vm2301_vm3, %v6072_v6, %v6076_v54  ;;  %v6080_v0 = vrot.slane %v5968_v35, 1 }
 0x78c   : > { %v6202_v10 = vmax.f32 %v5964_v1, %v6077_v52  ;;  %v6082_v17 = vrot.slane %v5969_v37, 1  ;;  %v5773_v20 = vpop.f32.mrb[116].mxu1  ;;  %v6079_v55 = vsel %vm2301_vm3, %v6074_v44, %v6078_v33 }
 0x78d   : > { %v6081_v32 = vsel %vm2301_vm3, %v6076_v54, %v6080_v0  ;;  %v5922_v41 = vadd.f32 %v11924_v58, %v5773_v20  ;;  %v5775_v18 = vpop.f32.mrb[117].mxu1  ;;  %v6203_v36 = vmax.f32 %v5965_v28, %v6079_v55 }
 0x78e   : > { %v6204_v42 = vmax.f32 %v5966_v62, %v6081_v32  ;;  %v5923_v45 = vadd.f32 %v11927_v51, %v5775_v18  ;;  %v5777_v31 = vpop.f32.mrb[118].mxu1  ;;  %v6253_v14 = vpack.c.bf16 %v6202_v10, %v6200_v4  ;;  %v6083_v9 = vsel %vm2301_vm3, %v6078_v33, %v6082_v17 }
 0x78f   : > { %v5970_v50 = vmax.f32 %v5922_v41, 0.0  ;;  %v5924_v30 = vadd.f32 %v11924_v58, %v5777_v31  ;;  %v5779_v40 = vpop.f32.mrb[119].mxu1  ;;  %v6254_v56 = vpack.c.bf16 %v6203_v36, %v6201_v13  ;;  %v6205_v38 = vmax.f32 %v5967_v34, %v6083_v9 }
 0x790   : > { %v5971_v61 = vmax.f32 %v5923_v45, 0.0  ;;  %v5925_v2 = vadd.f32 %v11927_v51, %v5779_v40 }
 0x791   : > { %v6084_v27 = vrot.slane %v5970_v50, 1  ;;  %v5972_v11 = vmax.f32 %v5924_v30, 0.0  ;;  %6353 = vmatprep.subr.bf16.mxu0 %v6254_v56 }
 0x792   : > { %v6086_v16 = vrot.slane %v5971_v61, 1  ;;  %v5973_v46 = vmax.f32 %v5925_v2, 0.0  ;;  %6354 = vmatpush1.bf16.msra.mxu0 %v6253_v14 }
 0x793   : > { %v6085_v60 = vsel %vm2301_vm3, %v6080_v0, %v6084_v27  ;;  %v6088_v26 = vrot.slane %v5972_v11, 1 }
 0x794   : > { %v6206_v15 = vmax.f32 %v5968_v35, %v6085_v60  ;;  %v6090_v24 = vrot.slane %v5973_v46, 1  ;;  %v5783_v1 = vpop.f32.mrb[120].mxu1  ;;  %v6087_v8 = vsel %vm2301_vm3, %v6082_v17, %v6086_v16 }
 0x795   : > { %v6089_v28 = vsel %vm2301_vm3, %v6084_v27, %v6088_v26  ;;  %v5926_v3 = vadd.f32 %v11924_v58, %v5783_v1  ;;  %v5785_v6 = vpop.f32.mrb[121].mxu1  ;;  %v6207_v59 = vmax.f32 %v5969_v37, %v6087_v8 }
 0x796   : > { %v6208_v44 = vmax.f32 %v5970_v50, %v6089_v28  ;;  %v5927_v48 = vadd.f32 %v11927_v51, %v5785_v6  ;;  %v5787_v5 = vpop.f32.mrb[122].mxu1  ;;  %v6255_v53 = vpack.c.bf16 %v6206_v15, %v6204_v42  ;;  %v6091_v43 = vsel %vm2301_vm3, %v6086_v16, %v6090_v24 }
 0x797   : > { %v5974_v29 = vmax.f32 %v5926_v3, 0.0  ;;  %v5928_v19 = vadd.f32 %v11924_v58, %v5787_v5  ;;  %v5789_v4 = vpop.f32.mrb[123].mxu1  ;;  %v6256_v63 = vpack.c.bf16 %v6207_v59, %v6205_v38  ;;  %v6209_v22 = vmax.f32 %v5971_v61, %v6091_v43 }
 0x798   : > { %v5975_v23 = vmax.f32 %v5927_v48, 0.0  ;;  %v5929_v12 = vadd.f32 %v11927_v51, %v5789_v4 }
 0x799   : > { %v6092_v62 = vrot.slane %v5974_v29, 1  ;;  %v5976_v39 = vmax.f32 %v5928_v19, 0.0  ;;  %6355 = vmatprep.subr.bf16.mxu0 %v6256_v63 }
 0x79a   : > { %v6094_v57 = vrot.slane %v5975_v23, 1  ;;  %v5977_v47 = vmax.f32 %v5929_v12, 0.0  ;;  %6356 = vmatpush1.bf16.msra.mxu0 %v6255_v53 }
 0x79b   : > { %v6093_v13 = vsel %vm2301_vm3, %v6088_v26, %v6092_v62  ;;  %v6096_v34 = vrot.slane %v5976_v39, 1 }
 0x79c   : > { %v6210_v25 = vmax.f32 %v5972_v11, %v6093_v13  ;;  %v6098_v54 = vrot.slane %v5977_v47, 1  ;;  %v5793_v35 = vpop.f32.mrb[124].mxu1  ;;  %v6095_v33 = vsel %vm2301_vm3, %v6090_v24, %v6094_v57 }
 0x79d   : > { %v6097_v37 = vsel %vm2301_vm3, %v6092_v62, %v6096_v34  ;;  %v5930_v52 = vadd.f32 %v11924_v58, %v5793_v35  ;;  %v5795_v0 = vpop.f32.mrb[125].mxu1  ;;  %v6211_v10 = vmax.f32 %v5973_v46, %v6095_v33 }
 0x79e   : > { %v6212_v17 = vmax.f32 %v5974_v29, %v6097_v37  ;;  %v5931_v20 = vadd.f32 %v11927_v51, %v5795_v0  ;;  %v5797_v55 = vpop.f32.mrb[126].mxu1  ;;  %v6257_v32 = vpack.c.bf16 %v6210_v25, %v6208_v44  ;;  %v6099_v41 = vsel %vm2301_vm3, %v6094_v57, %v6098_v54 }
 0x79f   : > { %v5978_v18 = vmax.f32 %v5930_v52, 0.0  ;;  %v5932_v36 = vadd.f32 %v11924_v58, %v5797_v55  ;;  %v5799_v42 = vpop.f32.mrb[127].mxu1  ;;  %v6258_v45 = vpack.c.bf16 %v6211_v10, %v6209_v22  ;;  %v6213_v31 = vmax.f32 %v5975_v23, %v6099_v41 }
 0x7a0   : > { %v5979_v14 = vmax.f32 %v5931_v20, 0.0  ;;  %v5933_v9 = vadd.f32 %v11927_v51, %v5799_v42 }
 0x7a1   : > { %v6100_v50 = vrot.slane %v5978_v18, 1  ;;  %v5980_v30 = vmax.f32 %v5932_v36, 0.0  ;;  %6357 = vmatprep.subr.bf16.mxu0 %v6258_v45 }
 0x7a2   : > { %v6102_v40 = vrot.slane %v5979_v14, 1  ;;  %v5981_v56 = vmax.f32 %v5933_v9, 0.0  ;;  %6358 = vmatpush1.bf16.msra.mxu0 %v6257_v32 }
 0x7a3   : > { %v6101_v38 = vsel %vm2301_vm3, %v6096_v34, %v6100_v50  ;;  %v6104_v61 = vrot.slane %v5980_v30, 1 }
 0x7a4   : > { %v6214_v2 = vmax.f32 %v5976_v39, %v6101_v38  ;;  %v6106_v27 = vrot.slane %v5981_v56, 1  ;;  %v5803_v11 = vpop.f32.mrb[128].mxu1  ;;  %v6103_v16 = vsel %vm2301_vm3, %v6098_v54, %v6102_v40 }
 0x7a5   : > { %v6105_v46 = vsel %vm2301_vm3, %v6100_v50, %v6104_v61  ;;  %v5934_v60 = vadd.f32 %v11924_v58, %v5803_v11  ;;  %v5805_v26 = vpop.f32.mrb[129].mxu1  ;;  %v6215_v15 = vmax.f32 %v5977_v47, %v6103_v16 }
 0x7a6   : > { %v6216_v24 = vmax.f32 %v5978_v18, %v6105_v46  ;;  %v5935_v1 = vadd.f32 %v11927_v51, %v5805_v26  ;;  %v5807_v8 = vpop.f32.mrb[130].mxu1  ;;  %v6259_v28 = vpack.c.bf16 %v6214_v2, %v6212_v17  ;;  %v6107_v3 = vsel %vm2301_vm3, %v6102_v40, %v6106_v27 }
 0x7a7   : > { %v5982_v6 = vmax.f32 %v5934_v60, 0.0  ;;  %v5936_v59 = vadd.f32 %v11924_v58, %v5807_v8  ;;  %v5809_v44 = vpop.f32.mrb[131].mxu1  ;;  %v6260_v48 = vpack.c.bf16 %v6215_v15, %v6213_v31  ;;  %v6217_v5 = vmax.f32 %v5979_v14, %v6107_v3 }
 0x7a8   : > { %v5983_v53 = vmax.f32 %v5935_v1, 0.0  ;;  %v5937_v43 = vadd.f32 %v11927_v51, %v5809_v44 }
 0x7a9   : > { %v6108_v29 = vrot.slane %v5982_v6, 1  ;;  %v5984_v19 = vmax.f32 %v5936_v59, 0.0  ;;  %6359 = vmatprep.subr.bf16.mxu0 %v6260_v48 }
 0x7aa   : > { %v6110_v4 = vrot.slane %v5983_v53, 1  ;;  %v5985_v63 = vmax.f32 %v5937_v43, 0.0  ;;  %6360 = vmatpush1.bf16.msra.mxu0 %v6259_v28 }
 0x7ab   : > { %v6109_v22 = vsel %vm2301_vm3, %v6104_v61, %v6108_v29  ;;  %v6112_v23 = vrot.slane %v5984_v19, 1 }
 0x7ac   : > { %v6218_v12 = vmax.f32 %v5980_v30, %v6109_v22  ;;  %v6114_v62 = vrot.slane %v5985_v63, 1  ;;  %v5813_v39 = vpop.f32.mrb[132].mxu1  ;;  %v6111_v57 = vsel %vm2301_vm3, %v6106_v27, %v6110_v4 }
 0x7ad   : > { %v6113_v47 = vsel %vm2301_vm3, %v6108_v29, %v6112_v23  ;;  %v5938_v13 = vadd.f32 %v11924_v58, %v5813_v39  ;;  %v5815_v34 = vpop.f32.mrb[133].mxu1  ;;  %v6219_v25 = vmax.f32 %v5981_v56, %v6111_v57 }
 0x7ae   : > { %v6220_v54 = vmax.f32 %v5982_v6, %v6113_v47  ;;  %v5939_v35 = vadd.f32 %v11927_v51, %v5815_v34  ;;  %v5817_v33 = vpop.f32.mrb[134].mxu1  ;;  %v6261_v37 = vpack.c.bf16 %v6218_v12, %v6216_v24  ;;  %v6115_v52 = vsel %vm2301_vm3, %v6110_v4, %v6114_v62 }
 0x7af   : > { %v5986_v0 = vmax.f32 %v5938_v13, 0.0  ;;  %v5940_v10 = vadd.f32 %v11924_v58, %v5817_v33  ;;  %v5819_v17 = vpop.f32.mrb[135].mxu1  ;;  %v6262_v20 = vpack.c.bf16 %v6219_v25, %v6217_v5  ;;  %v6221_v55 = vmax.f32 %v5983_v53, %v6115_v52 }
 0x7b0   : > { %v5987_v32 = vmax.f32 %v5939_v35, 0.0  ;;  %v5941_v41 = vadd.f32 %v11927_v51, %v5819_v17 }
 0x7b1   : > { %v6116_v18 = vrot.slane %v5986_v0, 1  ;;  %v5988_v36 = vmax.f32 %v5940_v10, 0.0  ;;  %6361 = vmatprep.subr.bf16.mxu0 %v6262_v20 }
 0x7b2   : > { %v6118_v42 = vrot.slane %v5987_v32, 1  ;;  %v5989_v45 = vmax.f32 %v5941_v41, 0.0  ;;  %6362 = vmatpush1.bf16.msra.mxu0 %v6261_v37 }
 0x7b3   : > { %v6117_v31 = vsel %vm2301_vm3, %v6112_v23, %v6116_v18  ;;  %v6120_v14 = vrot.slane %v5988_v36, 1 }
 0x7b4   : > { %v6222_v9 = vmax.f32 %v5984_v19, %v6117_v31  ;;  %v6122_v50 = vrot.slane %v5989_v45, 1  ;;  %v5823_v30 = vpop.f32.mrb[136].mxu1  ;;  %v6119_v40 = vsel %vm2301_vm3, %v6114_v62, %v6118_v42 }
 0x7b5   : > { %v6121_v56 = vsel %vm2301_vm3, %v6116_v18, %v6120_v14  ;;  %v5942_v38 = vadd.f32 %v11924_v58, %v5823_v30  ;;  %v5825_v61 = vpop.f32.mrb[137].mxu1  ;;  %v6223_v2 = vmax.f32 %v5985_v63, %v6119_v40 }
 0x7b6   : > { %v6224_v27 = vmax.f32 %v5986_v0, %v6121_v56  ;;  %v5943_v11 = vadd.f32 %v11927_v51, %v5825_v61  ;;  %v5827_v16 = vpop.f32.mrb[138].mxu1  ;;  %v6263_v46 = vpack.c.bf16 %v6222_v9, %v6220_v54  ;;  %v6123_v60 = vsel %vm2301_vm3, %v6118_v42, %v6122_v50 }
 0x7b7   : > { %v5990_v26 = vmax.f32 %v5942_v38, 0.0  ;;  %v5944_v15 = vadd.f32 %v11924_v58, %v5827_v16  ;;  %v5829_v24 = vpop.f32.mrb[139].mxu1  ;;  %v6264_v1 = vpack.c.bf16 %v6223_v2, %v6221_v55  ;;  %v6225_v8 = vmax.f32 %v5987_v32, %v6123_v60  ;;  %v12692_v38 = vld [vmem:[#allocation3_spill] sm:$0xff]  ;;  %v9959_v16 = vld [vmem:[%s12632_s8 + $0x10] ss:$8 sps:$4 sm:$0xff]  }
 0x7b8   : > { %v5991_v28 = vmax.f32 %v5943_v11, 0.0  ;;  %v5945_v3 = vadd.f32 %v11927_v51, %v5829_v24  ;;  %v9957_v11 = vld [vmem:[%s12632_s8 + $0x14] ss:$8 sps:$4 sm:$0xff]   ;;  %v9962_v60 = vld [vmem:[%s12632_s8 + $0x20] ss:$8 sps:$4 sm:$0xff]  }
 0x7b9   : > { %v6124_v6 = vrot.slane %v5990_v26, 1  ;;  %v5992_v59 = vmax.f32 %v5944_v15, 0.0  ;;  %6363 = vmatprep.subr.bf16.mxu0 %v6264_v1  ;;  %v9965_v15 = vld [vmem:[%s12632_s8 + $0x30] ss:$8 sps:$4 sm:$0xff]   ;;  %v9966_v24 = vld [vmem:[%s12632_s8 + $0x44] ss:$8 sps:$4 sm:$0xff]  }
 0x7ba   : > { %v6126_v44 = vrot.slane %v5991_v28, 1  ;;  %v5993_v48 = vmax.f32 %v5945_v3, 0.0  ;;  %6364 = vmatpush1.bf16.msra.mxu0 %v6263_v46  ;;  %v9960_v46 = vld [vmem:[%s12632_s8 + $0x24] ss:$8 sps:$4 sm:$0xff]   ;;  %v6246_v1 = vld [vmem:[%s12632_s8 + $0x50] sm:$0xff] }
 0x7bb   : > { %v6125_v5 = vsel %vm2301_vm3, %v6120_v14, %v6124_v6  ;;  %v6128_v53 = vrot.slane %v5992_v59, 1  ;;  %v8832_v3 = vcombine.low %v6246_v1, %v6246_v1 }
 0x7bc   : > { %v6226_v43 = vmax.f32 %v5988_v36, %v6125_v5  ;;  %v6130_v29 = vrot.slane %v5993_v48, 1  ;;  %v5833_v19 = vpop.f32.mrb[140].mxu1  ;;  %v6127_v4 = vsel %vm2301_vm3, %v6122_v50, %v6126_v44  ;;  %v9975_v5 = vld [vmem:[%s12633_s9 + $0x20] sm:$0xff]  }
 0x7bd   : > { %v6129_v63 = vsel %vm2301_vm3, %v6124_v6, %v6128_v53  ;;  %v5946_v22 = vadd.f32 %v11924_v58, %v5833_v19  ;;  %v5835_v23 = vpop.f32.mrb[141].mxu1  ;;  %v6227_v12 = vmax.f32 %v5989_v45, %v6127_v4  ;;  %v9971_v6 = vld [vmem:[%s12633_s9] sm:$0xff]   ;;  %v9980_v4 = vld [vmem:[%s12633_s9 + $0x48] sm:$0xff]  }
 0x7be   : > { %v6228_v62 = vmax.f32 %v5990_v26, %v6129_v63  ;;  %v5947_v39 = vadd.f32 %v11927_v51, %v5835_v23  ;;  %v5837_v57 = vpop.f32.mrb[142].mxu1  ;;  %v6265_v47 = vpack.c.bf16 %v6226_v43, %v6224_v27  ;;  %v6131_v13 = vsel %vm2301_vm3, %v6126_v44, %v6130_v29  ;;  %v9954_v27 = vld [vmem:[%s12632_s8] ss:$8 sps:$4 sm:$0xff]   ;;  %v9963_v26 = vld [vmem:[%s12632_s8 + $0x34] ss:$8 sps:$4 sm:$0xff]   ;;  %6680 = vmatpush1.bf16.msra.mxu1 %v9971_v6 }
 0x7bf   : > { %v5994_v34 = vmax.f32 %v5946_v22, 0.0  ;;  %v5948_v25 = vadd.f32 %v11924_v58, %v5837_v57  ;;  %v5839_v54 = vpop.f32.mrb[143].mxu1  ;;  %v6266_v35 = vpack.c.bf16 %v6227_v12, %v6225_v8  ;;  %v6229_v33 = vmax.f32 %v5991_v28, %v6131_v13  ;;  %v9968_v8 = vld [vmem:[%s12632_s8 + $0x40] ss:$8 sps:$4 sm:$0xff]   ;;  %6681 = vmatprep.subr.bf16.mxu1 %v12690_v21  ;;  %v9973_v44 = vld [vmem:[%s12633_s9 + $0x10] sm:$0xff]  }
 0x7c0   : > { %v5995_v37 = vmax.f32 %v5947_v39, 0.0  ;;  %v5949_v52 = vadd.f32 %v11927_v51, %v5839_v54  ;;  %v8833_v28 = vcombine.high %v6246_v1, %v6246_v1  ;;  %v9977_v43 = vld [vmem:[%s12633_s9 + $0x30] sm:$0xff]   ;;  %v9979_v19 = vld [vmem:[%s12633_s9 + $0x40] sm:$0xff]  }
 0x7c1   : > { %v6132_v0 = vrot.slane %v5994_v34, 1  ;;  %v5996_v10 = vmax.f32 %v5948_v25, 0.0  ;;  %6365 = vmatprep.subr.bf16.mxu0 %v6266_v35  ;;  %v9981_v63 = vld [vmem:[%s12633_s9 + $0x50] ss:$0 sps:$4 sm:$0xff]  }
 0x7c2   : > { %v6134_v17 = vrot.slane %v5995_v37, 1  ;;  %v5997_v20 = vmax.f32 %v5949_v52, 0.0  ;;  %6366 = vmatpush1.bf16.msra.mxu0 %v6265_v47  ;;  %v6677_v22 = vsel %vm6675_vm10, %v9981_v63, 0 }
 0x7c3   : > { %v6133_v55 = vsel %vm2301_vm3, %v6128_v53, %v6132_v0  ;;  %v6136_v32 = vrot.slane %v5996_v10, 1  ;;  %v9976_v53 = vld [vmem:[%s12633_s9 + $0x28] sm:$0xff]  }
 0x7c4   : > { %v6230_v41 = vmax.f32 %v5992_v59, %v6133_v55  ;;  %v6138_v18 = vrot.slane %v5997_v20, 1  ;;  %v6135_v36 = vsel %vm2301_vm3, %v6130_v29, %v6134_v17  ;;  %v9972_v59 = vld [vmem:[%s12633_s9 + $0x8] sm:$0xff]   ;;  %v9978_v29 = vld [vmem:[%s12633_s9 + $0x38] sm:$0xff]  }
 0x7c5   : > { %v6137_v58 = vsel %vm2301_vm3, %v6132_v0, %v6136_v32  ;;  %v6234_v42 = vmax.f32 %v5996_v10, %v6136_v32  ;;  %v6231_v45 = vmax.f32 %v5993_v48, %v6135_v36  ;;  %6682 = vmatpush1.bf16.msra.mxu1 %v9972_v59  ;;  %v9974_v48 = vld [vmem:[%s12633_s9 + $0x18] sm:$0xff]  }
 0x7c6   : > { %v6232_v31 = vmax.f32 %v5994_v34, %v6137_v58  ;;  %v6139_v51 = vsel %vm2301_vm3, %v6134_v17, %v6138_v18  ;;  %v6235_v14 = vmax.f32 %v5997_v20, %v6138_v18  ;;  %v6267_v9 = vpack.c.bf16 %v6230_v41, %v6228_v62  ;;  %6683 = vmatprep.subr.bf16.mxu1 %v12690_v21 }
 0x7c7   : > { %v6233_v50 = vmax.f32 %v5995_v37, %v6139_v51  ;;  %v6268_v30 = vpack.c.bf16 %v6231_v45, %v6229_v33 }
 0x7c8   : > { %v6269_v40 = vpack.c.bf16 %v6234_v42, %v6232_v31 }
 0x7c9   : > { %v6270_v56 = vpack.c.bf16 %v6235_v14, %v6233_v50  ;;  %6367 = vmatprep.subr.bf16.mxu0 %v6268_v30  ;;  %6684 = vmatpush1.bf16.msra.mxu1 %v9973_v44  ;;  %v9982_v30 = vld [vmem:[%s12634_s10 + $0x58] ss:$8 sps:$4 sm:$0xff]  }
 0x7ca   : > { %6368 = vmatpush1.bf16.msra.mxu0 %v6267_v9  ;;  %v6342_v2 = vand.u32 %v6269_v40, %v12692_v38  ;;  %6685 = vmatprep.subr.bf16.mxu1 %v12690_v21  ;;  %v9984_v40 = vld [vmem:[%s12634_s10 + $0x5c] ss:$8 sps:$4 sm:$0xff]  }
 0x7cb   : > { %v6345_v61 = vand.u32 %v6270_v56, %v12692_v38 }
 0x7cd   : > { %6369 = vmatprep.subr.bf16.mxu0 %v6345_v61  ;;  %6686 = vmatpush1.bf16.msra.mxu1 %v9974_v48  ;;  %v9987_v61 = vld [vmem:[%s12634_s10 + $0x6c] ss:$8 sps:$4 sm:$0xff]  }
 0x7ce   : > { %6370 = vmatpush1.bf16.msra.mxu0 %v6342_v2  ;;  %6687 = vmatprep.subr.bf16.mxu1 %v12690_v21 }
 0x7cf   : > { %6915 = vmatprep.subr.bf16.mxu0 %v9984_v40 }
 0x7d1   : > { %6380 = vmatmul.mubr.bf16.vlgmr.msra.gmra.mrb[100].mxu0 %v9954_v27  ;;  %6688 = vmatpush1.bf16.msra.mxu1 %v9975_v5 }
 0x7d2   : > { %8835 = vmatprep.mubr.msk.bf16.mxu0 %vm6322_vm9, %v9957_v11  ;;  %6689 = vmatprep.subr.bf16.mxu1 %v12690_v21 }
 0x7d3   : > { %6916 = vmatpush1.bf16.msra.mxu0 %v9982_v30 }
 0x7d4   : > { %6917 = vmatprep.subr.bf16.mxu0 %v9987_v61 }
 0x7d5   : > { %6690 = vmatpush1.bf16.msra.mxu1 %v9976_v53 }
 0x7d6   : > { %6691 = vmatprep.subr.bf16.mxu1 %v12690_v21 }
 0x7d9   : > { %6390 = vmatmul.mubr.bf16.gmra.mrb[104].mxu0 %v9959_v16  ;;  %6692 = vmatpush1.bf16.msra.mxu1 %v9977_v43  ;;  %v9985_v16 = vld [vmem:[%s12634_s10 + $0x68] ss:$8 sps:$4 sm:$0xff]  }
 0x7da   : > { %8836 = vmatprep.mubr.msk.bf16.mxu0 %vm6322_vm9, %v9960_v46  ;;  %6693 = vmatprep.subr.bf16.mxu1 %v12690_v21 }
 0x7db   : > { %6918 = vmatpush1.bf16.msra.mxu0 %v9985_v16 }
 0x7dd   : > { %6694 = vmatpush1.bf16.msra.mxu1 %v9978_v29 }
 0x7de   : > { %6695 = vmatprep.subr.bf16.mxu1 %v12690_v21 }
 0x7e1   : > { %6400 = vmatmul.mubr.bf16.gmra.mrb[108].mxu0 %v9962_v60  ;;  %6696 = vmatpush1.bf16.msra.mxu1 %v9979_v19 }
 0x7e2   : > { %8837 = vmatprep.mubr.msk.bf16.mxu0 %vm6322_vm9, %v9963_v26  ;;  %6697 = vmatprep.subr.bf16.mxu1 %v12690_v21 }
 0x7e5   : > { %6698 = vmatpush1.bf16.msra.mxu1 %v9980_v4 }
 0x7e6   : > { %6699 = vmatprep.subr.bf16.mxu1 %v12690_v21 }
 0x7e9   : > { %6410 = vmatmul.mubr.bf16.gmra.mrb[112].mxu0 %v9965_v15  ;;  %6700 = vmatpush1.bf16.msra.mxu1 %v6677_v22 }
 0x7ea   : > { %8838 = vmatprep.mubr.msk.bf16.mxu0 %vm6322_vm9, %v9966_v24 }
 0x7f1   : > { %6420 = vmatmul.mubr.bf16.gmra.mrb[116].mxu0 %v9968_v8 }
 0x7f2   : > { %8839 = vmatprep.mubr.msk.bf16.mxu0 %vm6322_vm9, %v8833_v28 }
 0x7f9   : > { %6430 = vmatmul.mubr.bf16.gmra.mrb[120].mxu0 %v8832_v3 }
 0x7fa   : > { %6947 = vmatprep.mubr.bf16.mxu0 %v12690_v21 }
 0x8a4   : > { %v12105_v23 = vpop.f32.mrb[100].mxu0 }
 0x8a5   : > { %v6383_v12 = vpop.f32.mrb[101].mxu0 }
 0x8a6   : > { %v9654_v62 = vpack.i.bf16 %v6383_v12, %v12105_v23  ;;  %v12108_v39 = vpop.f32.mrb[102].mxu0 }
 0x8a7   : > { %v6387_v57 = vpop.f32.mrb[103].mxu0 }
 0x8a8   : > { %v9659_v47 = vpack.i.bf16 %v6387_v57, %v12108_v39  ;;  %9655 = vrot.lane.b32.xlu0 %v9654_v62, %s10078_s23 }
 0x8aa   : > { %9660 = vrot.lane.b32.xlu1 %v9659_v47, %s10078_s23 }
 0x8ac   : > { %v12113_v13 = vpop.f32.mrb[104].mxu0 }
 0x8ad   : > { %v12115_v34 = vpop.f32.mrb[105].mxu0 }
 0x8ae   : > { %v9664_v25 = vpack.i.bf16 %v12115_v34, %v12113_v13  ;;  %v12119_v54 = vpop.f32.mrb[106].mxu0 }
 0x8af   : > { %v12121_v35 = vpop.f32.mrb[107].mxu0 }
 0x8b0   : > { %v9669_v33 = vpack.i.bf16 %v12121_v35, %v12119_v54  ;;  %9665 = vrot.lane.b32.xlu0 %v9664_v25, %s10078_s23 }
 0x8b2   : > { %9670 = vrot.lane.b32.xlu1 %v9669_v33, %s10078_s23 }
 0x8b4   : > { %v12127_v37 = vpop.f32.mrb[108].mxu0 }
 0x8b5   : > { %v12129_v52 = vpop.f32.mrb[109].mxu0 }
 0x8b6   : > { %v9674_v0 = vpack.i.bf16 %v12129_v52, %v12127_v37  ;;  %v12133_v10 = vpop.f32.mrb[110].mxu0 }
 0x8b7   : > { %v12135_v17 = vpop.f32.mrb[111].mxu0 }
 0x8b8   : > { %v9679_v20 = vpack.i.bf16 %v12135_v17, %v12133_v10  ;;  %9675 = vrot.lane.b32.xlu0 %v9674_v0, %s10078_s23 }
 0x8ba   : > { %9680 = vrot.lane.b32.xlu1 %v9679_v20, %s10078_s23 }
 0x8bc   : > { %v12141_v55 = vpop.f32.mrb[112].mxu0 }
 0x8bd   : > { %v12143_v32 = vpop.f32.mrb[113].mxu0 }
 0x8be   : > { %v9684_v41 = vpack.i.bf16 %v12143_v32, %v12141_v55  ;;  %v12147_v18 = vpop.f32.mrb[114].mxu0 }
 0x8bf   : > { %v12149_v36 = vpop.f32.mrb[115].mxu0 }
 0x8c0   : > { %v9689_v58 = vpack.i.bf16 %v12149_v36, %v12147_v18  ;;  %9685 = vrot.lane.b32.xlu0 %v9684_v41, %s10078_s23 }
 0x8c2   : > { %9690 = vrot.lane.b32.xlu1 %v9689_v58, %s10078_s23 }
 0x8c4   : > { %v12155_v42 = vpop.f32.mrb[116].mxu0 }
 0x8c5   : > { %v12157_v45 = vpop.f32.mrb[117].mxu0 }
 0x8c6   : > { %v9694_v31 = vpack.i.bf16 %v12157_v45, %v12155_v42  ;;  %v12161_v51 = vpop.f32.mrb[118].mxu0 }
 0x8c7   : > { %v12163_v14 = vpop.f32.mrb[119].mxu0 }
 0x8c8   : > { %v9699_v9 = vpack.i.bf16 %v12163_v14, %v12161_v51  ;;  %9695 = vrot.lane.b32.xlu0 %v9694_v31, %s10078_s23 }
 0x8ca   : > { %9700 = vrot.lane.b32.xlu1 %v9699_v9, %s10078_s23 }
 0x8cc   : > { %v12169_v50 = vpop.f32.mrb[120].mxu0 }
 0x8cd   : > { %v12177_v56 = vpop.f32.mrb[121].mxu0 }
 0x8ce   : > { %v9704_v2 = vpack.i.bf16 %v12177_v56, %v12169_v50  ;;  %v6435_v27 = vpop.f32.mrb[122].mxu0 }
 0x8cf   : > { %v6436_v11 = vpop.f32.mrb[123].mxu0 }
 0x8d0   : > { %9705 = vrot.lane.b32.xlu0 %v9704_v2, %s10078_s23 }
 0x91a   : > { %v9656_v46 = vpop.permute.xlu0 %9655 }
 0x91b   : > { %v9658_v60 = vunpack.i.h.bf16 %v9656_v46  ;;  %v9657_v26 = vunpack.i.l.bf16 %v9656_v46 }
 0x91c   : > { %v9661_v15 = vpop.permute.xlu1 %9660 }
 0x91d   : > { %v6505_v24 = vsel %vm6504_vm11, %v9657_v26, %v9658_v60  ;;  %v9663_v1 = vunpack.i.h.bf16 %v9661_v15  ;;  %v9662_v8 = vunpack.i.l.bf16 %v9661_v15  ;;  %v6539_v28 = vmax.f32 %v6383_v12, %v9658_v60 }
 0x91e   : > { %v6538_v59 = vmax.f32 %v12105_v23, %v6505_v24 }
 0x91f   : > { %v6541_v3 = vmax.f32 %v6387_v57, %v9663_v1  ;;  %v6506_v6 = vsel %vm6504_vm11, %v9662_v8, %v9663_v1 }
 0x920   : > { %v6540_v44 = vmax.f32 %v12108_v39, %v6506_v6 }
 0x921   : > { %v6561_v48 = vpack.c.bf16 %v6541_v3, %v6539_v28 }
 0x922   : > { %v6560_v5 = vpack.c.bf16 %v6540_v44, %v6538_v59  ;;  %v9666_v53 = vpop.permute.xlu0 %9665 }
 0x923   : > { %v9668_v43 = vunpack.i.h.bf16 %v9666_v53  ;;  %v9667_v29 = vunpack.i.l.bf16 %v9666_v53  ;;  %8851 = vmatprep.mubr.msk.bf16.mxu1 %vm6656_vm12, %v6561_v48 }
 0x924   : > { %6712 = vmatmul.mubr.bf16.vlgmr.msra.gmra.mrb[144].mxu1 %v6560_v5  ;;  %v9671_v19 = vpop.permute.xlu1 %9670 }
 0x925   : > { %v6507_v4 = vsel %vm6504_vm11, %v9667_v29, %v9668_v43  ;;  %v9673_v63 = vunpack.i.h.bf16 %v9671_v19  ;;  %v9672_v22 = vunpack.i.l.bf16 %v9671_v19  ;;  %v6543_v12 = vmax.f32 %v12115_v34, %v9668_v43 }
 0x926   : > { %v6542_v39 = vmax.f32 %v12113_v13, %v6507_v4 }
 0x927   : > { %v6545_v23 = vmax.f32 %v12121_v35, %v9673_v63  ;;  %v6508_v62 = vsel %vm6504_vm11, %v9672_v22, %v9673_v63 }
 0x928   : > { %v6544_v57 = vmax.f32 %v12119_v54, %v6508_v62  ;;  %v9994_v62 = vld [vmem:[%s12634_s10 + $0x98] ss:$8 sps:$4 sm:$0xff]  }
 0x929   : > { %v6563_v47 = vpack.c.bf16 %v6545_v23, %v6543_v12  ;;  %v9988_v12 = vld [vmem:[%s12634_s10 + $0x78] ss:$8 sps:$4 sm:$0xff]   ;;  %v9996_v23 = vld [vmem:[%s12634_s10 + $0x9c] ss:$8 sps:$4 sm:$0xff]  }
 0x92a   : > { %v9676_v25 = vpop.permute.xlu0 %9675  ;;  %v6562_v33 = vpack.c.bf16 %v6544_v57, %v6542_v39  ;;  %v8867_v39 = vld [vmem:[%s12634_s10 + $0xa8] sm:$0xff] }
 0x92b   : > { %v9678_v0 = vunpack.i.h.bf16 %v9676_v25  ;;  %v9677_v20 = vunpack.i.l.bf16 %v9676_v25  ;;  %8852 = vmatprep.mubr.msk.bf16.mxu1 %vm6656_vm12, %v6563_v47  ;;  %v8879_v57 = vcombine.high %v8867_v39, %v8867_v39  ;;  %v8878_v47 = vcombine.low %v8867_v39, %v8867_v39 }
 0x92c   : > { %6720 = vmatmul.mubr.bf16.gmra.mrb[148].mxu1 %v6562_v33  ;;  %v9681_v41 = vpop.permute.xlu1 %9680  ;;  %v10001_v33 = vld [vmem:[%s12634_s10 + $0x4] ss:$8 sps:$4 sm:$0xff]  }
 0x92d   : > { %v6509_v58 = vsel %vm6504_vm11, %v9677_v20, %v9678_v0  ;;  %v9683_v34 = vunpack.i.h.bf16 %v9681_v41  ;;  %v9682_v31 = vunpack.i.l.bf16 %v9681_v41  ;;  %v6547_v35 = vmax.f32 %v12129_v52, %v9678_v0 }
 0x92e   : > { %v6546_v54 = vmax.f32 %v12127_v37, %v6509_v58  ;;  %v6910_v25 = vsel %vm6675_vm10, %v8878_v47, 0 }
 0x92f   : > { %v6549_v9 = vmax.f32 %v12135_v17, %v9683_v34  ;;  %v6510_v13 = vsel %vm6504_vm11, %v9682_v31, %v9683_v34 }
 0x930   : > { %v6548_v30 = vmax.f32 %v12133_v10, %v6510_v13 }
 0x931   : > { %v6565_v40 = vpack.c.bf16 %v6549_v9, %v6547_v35 }
 0x932   : > { %v9686_v61 = vpop.permute.xlu0 %9685  ;;  %v6564_v2 = vpack.c.bf16 %v6548_v30, %v6546_v54 }
 0x933   : > { %v9688_v27 = vunpack.i.h.bf16 %v9686_v61  ;;  %v9687_v11 = vunpack.i.l.bf16 %v9686_v61  ;;  %8853 = vmatprep.mubr.msk.bf16.mxu1 %vm6656_vm12, %v6565_v40 }
 0x934   : > { %6728 = vmatmul.mubr.bf16.gmra.mrb[152].mxu1 %v6564_v2  ;;  %v9691_v16 = vpop.permute.xlu1 %9690 }
 0x935   : > { %v6511_v46 = vsel %vm6504_vm11, %v9687_v11, %v9688_v27  ;;  %v9693_v52 = vunpack.i.h.bf16 %v9691_v16  ;;  %v9692_v60 = vunpack.i.l.bf16 %v9691_v16  ;;  %v6551_v17 = vmax.f32 %v12143_v32, %v9688_v27 }
 0x936   : > { %v6550_v10 = vmax.f32 %v12141_v55, %v6511_v46 }
 0x937   : > { %v6553_v26 = vmax.f32 %v12149_v36, %v9693_v52  ;;  %v6512_v37 = vsel %vm6504_vm11, %v9692_v60, %v9693_v52  ;;  %v9999_v52 = vld [vmem:[%s12634_s10] ss:$8 sps:$4 sm:$0xff]  }
 0x938   : > { %v6552_v15 = vmax.f32 %v12147_v18, %v6512_v37 }
 0x939   : > { %v6567_v24 = vpack.c.bf16 %v6553_v26, %v6551_v17  ;;  %v10004_v26 = vld [vmem:[%s12634_s10 + $0x14] ss:$8 sps:$4 sm:$0xff]  }
 0x93a   : > { %v9696_v1 = vpop.permute.xlu0 %9695  ;;  %v6566_v8 = vpack.c.bf16 %v6552_v15, %v6550_v10 }
 0x93b   : > { %v9698_v28 = vunpack.i.h.bf16 %v9696_v1  ;;  %v9697_v3 = vunpack.i.l.bf16 %v9696_v1  ;;  %8854 = vmatprep.mubr.msk.bf16.mxu1 %vm6656_vm12, %v6567_v24 }
 0x93c   : > { %6736 = vmatmul.mubr.bf16.gmra.mrb[156].mxu1 %v6566_v8  ;;  %v9701_v6 = vpop.permute.xlu1 %9700  ;;  %v10002_v8 = vld [vmem:[%s12634_s10 + $0x10] ss:$8 sps:$4 sm:$0xff]  }
 0x93d   : > { %v6513_v59 = vsel %vm6504_vm11, %v9697_v3, %v9698_v28  ;;  %v9703_v32 = vunpack.i.h.bf16 %v9701_v6  ;;  %v9702_v44 = vunpack.i.l.bf16 %v9701_v6  ;;  %v6555_v36 = vmax.f32 %v12157_v45, %v9698_v28  ;;  %v10007_v28 = vld [vmem:[%s12634_s10 + $0x24] ss:$8 sps:$4 sm:$0xff]  }
 0x93e   : > { %v6554_v18 = vmax.f32 %v12155_v42, %v6513_v59 }
 0x93f   : > { %v6557_v48 = vmax.f32 %v12163_v14, %v9703_v32  ;;  %v6514_v55 = vsel %vm6504_vm11, %v9702_v44, %v9703_v32 }
 0x940   : > { %v6556_v5 = vmax.f32 %v12161_v51, %v6514_v55  ;;  %v9990_v51 = vld [vmem:[%s12634_s10 + $0x7c] ss:$8 sps:$4 sm:$0xff]  }
 0x941   : > { %v6569_v53 = vpack.c.bf16 %v6557_v48, %v6555_v36  ;;  %6919 = vmatprep.subr.bf16.mxu0 %v9990_v51  ;;  %v10005_v36 = vld [vmem:[%s12634_s10 + $0x20] ss:$8 sps:$4 sm:$0xff]  }
 0x942   : > { %v9706_v43 = vpop.permute.xlu0 %9705  ;;  %v6568_v29 = vpack.c.bf16 %v6556_v5, %v6554_v18  ;;  %6920 = vmatpush1.bf16.msra.mxu0 %v9988_v12  ;;  %v10010_v18 = vld [vmem:[%s12634_s10 + $0x34] ss:$8 sps:$4 sm:$0xff]  }
 0x943   : > { %v9708_v19 = vunpack.i.h.bf16 %v9706_v43  ;;  %v9707_v4 = vunpack.i.l.bf16 %v9706_v43  ;;  %8855 = vmatprep.mubr.msk.bf16.mxu1 %vm6656_vm12, %v6569_v53 }
 0x944   : > { %6744 = vmatmul.mubr.bf16.gmra.mrb[160].mxu1 %v6568_v29 }
 0x945   : > { %v6559_v63 = vmax.f32 %v12177_v56, %v9708_v19  ;;  %v6515_v45 = vsel %vm6504_vm11, %v9707_v4, %v9708_v19  ;;  %v9991_v56 = vld [vmem:[%s12634_s10 + $0x88] ss:$8 sps:$4 sm:$0xff]  }
 0x946   : > { %v6558_v14 = vmax.f32 %v12169_v50, %v6515_v45  ;;  %v9993_v50 = vld [vmem:[%s12634_s10 + $0x8c] ss:$8 sps:$4 sm:$0xff]   ;;  %v10008_v4 = vld [vmem:[%s12634_s10 + $0x30] ss:$8 sps:$4 sm:$0xff]  }
 0x947   : > { %v6571_v22 = vpack.c.bf16 %v6559_v63, %v6559_v63  ;;  %6921 = vmatprep.subr.bf16.mxu0 %v9993_v50  ;;  %v10013_v63 = vld [vmem:[%s12634_s10 + $0x44] ss:$8 sps:$4 sm:$0xff]   ;;  %v10011_v50 = vld [vmem:[%s12634_s10 + $0x40] ss:$8 sps:$4 sm:$0xff]  }
 0x948   : > { %v6570_v42 = vpack.c.bf16 %v6558_v14, %v6558_v14  ;;  %6922 = vmatpush1.bf16.msra.mxu0 %v9991_v56 }
 0x949   : > { %8856 = vmatprep.mubr.msk.bf16.mxu1 %vm6656_vm12, %v6571_v22  ;;  %6923 = vmatprep.subr.bf16.mxu0 %v9996_v23  ;;  %v6775_v22 = vld [vmem:[%s12634_s10 + $0x50] sm:$0xff] }
 0x94a   : > { %v8897_v39 = vcombine.low %v6775_v22, %v6775_v22 }
 0x94c   : > { %6752 = vmatmul.mubr.bf16.gmra.mrb[164].mxu1 %v6570_v42  ;;  %6924 = vmatpush1.bf16.msra.mxu0 %v9994_v62  ;;  %v8898_v62 = vcombine.high %v6775_v22, %v6775_v22 }
 0x94d   : > { %7629 = vmatprep.mubr.bf16.mxu1 %v12690_v21  ;;  %8880 = vmatprep.subr.msk.bf16.mxu0 %vm6675_vm10, %v8879_v57 }
 0x950   : > { %6926 = vmatpush1.bf16.msra.mxu0 %v6910_v25 }
 0x951   : > { %7079 = vmatprep.subr.bf16.mxu0 %v10001_v33 }
 0x9f7   : > { %v6713_v0 = vpop.f32.mrb[144].mxu1 }
 0x9f8   : > { %v6715_v20 = vpop.f32.mrb[145].mxu1 }
 0x9f9   : > { %v6716_v41 = vpop.f32.mrb[146].mxu1  ;;  %v7074_v20 = vsel %vm6675_vm10, %v8897_v39, 0 }
 0x9fa   : > { %v12252_v58 = vpack.c.bf16 %v6716_v41, %v6713_v0  ;;  %v6718_v34 = vpop.f32.mrb[147].mxu1  ;;  %v10018_v41 = vld [vmem:[%s12634_s10 + $0xb4] ss:$8 sps:$4 sm:$0xff]  }
 0x9fc   : > { %v6791_v31 = vshll.u32 %v12252_v58, 16  ;;  %v6789_v61 = vshrl.u32 %v12252_v58, 16  ;;  %v7188_v2 = vrot.slane %v12252_v58, 1 }
 0x9fe   : > { %v6793_v54 = vrot.slane %v6791_v31, 1 }
 0x9ff   : > { %v6721_v35 = vpop.f32.mrb[148].mxu1 }
 0xa00   : > { %v6723_v9 = vpop.f32.mrb[149].mxu1  ;;  %v6794_v16 = vor.u32 %v6793_v54, %v6789_v61 }
 0xa01   : > { %v6724_v13 = vpop.f32.mrb[150].mxu1 }
 0xa02   : > { %v12255_v30 = vpack.c.bf16 %v6724_v13, %v6721_v35  ;;  %v6726_v40 = vpop.f32.mrb[151].mxu1 }
 0xa04   : > { %v6796_v27 = vshll.u32 %v12255_v30, 16  ;;  %v7189_v11 = vrot.slane %v12255_v30, 1  ;;  %v6800_v3 = vshrl.u32 %v12255_v30, 16 }
 0xa06   : > { %v6798_v46 = vrot.slane %v6796_v27, 1  ;;  %v12265_v60 = vsel %vm2301_vm3, %v7188_v2, %v7189_v11 }
 0xa07   : > { %v6729_v17 = vpop.f32.mrb[152].mxu1 }
 0xa08   : > { %v6731_v37 = vpop.f32.mrb[153].mxu1  ;;  %v6799_v10 = vsel %vm902_vm0, %v6794_v16, %v6798_v46  ;;  %v6802_v32 = vor.u32 %v6800_v3, %v6798_v46  ;;  %v10021_v3 = vld [vmem:[%s12634_s10 + $0xc4] ss:$8 sps:$4 sm:$0xff]  }
 0xa09   : > { %v6732_v15 = vpop.f32.mrb[154].mxu1  ;;  %8881 = vmatmul.mubr.msk.bf16.vlgmr.msra.gmra.mrb[124].mxu0 %vm6890_vm13, %v6799_v10 }
 0xa0a   : > { %v12272_v24 = vpack.c.bf16 %v6732_v15, %v6729_v17  ;;  %v6734_v1 = vpop.f32.mrb[155].mxu1  ;;  %6957 = vmatprep.mubr.bf16.mxu0 %v12690_v21  ;;  %7080 = vmatpush1.bf16.msra.mxu0 %v9999_v52 }
 0xa0b   : > { %7081 = vmatprep.subr.bf16.mxu0 %v10004_v26 }
 0xa0c   : > { %v6804_v6 = vshll.u32 %v12272_v24, 16  ;;  %v7191_v59 = vrot.slane %v12272_v24, 1  ;;  %v6808_v45 = vshrl.u32 %v12272_v24, 16 }
 0xa0e   : > { %v6806_v44 = vrot.slane %v6804_v6, 1  ;;  %7082 = vmatpush1.bf16.msra.mxu0 %v10002_v8  ;;  %v12288_v48 = vsel %vm2301_vm3, %v7189_v11, %v7191_v59  ;;  %v10019_v6 = vld [vmem:[%s12634_s10 + $0xc0] ss:$8 sps:$4 sm:$0xff]  }
 0xa0f   : > { %v6737_v55 = vpop.f32.mrb[156].mxu1  ;;  %7083 = vmatprep.subr.bf16.mxu0 %v10007_v28  ;;  %v10016_v28 = vld [vmem:[%s12634_s10 + $0xb0] ss:$8 sps:$4 sm:$0xff]  }
 0xa10   : > { %v6739_v5 = vpop.f32.mrb[157].mxu1  ;;  %v6807_v53 = vsel %vm902_vm0, %v6802_v32, %v6806_v44  ;;  %v6810_v51 = vor.u32 %v6808_v45, %v6806_v44  ;;  %v10022_v32 = vld [vmem:[%s12634_s10 + $0xd0] ss:$8 sps:$4 sm:$0xff]   ;;  %v10025_v44 = vld [vmem:[%s12634_s10 + $0xe0] ss:$8 sps:$4 sm:$0xff]  }
 0xa11   : > { %v6740_v43 = vpop.f32.mrb[158].mxu1  ;;  %8882 = vmatmul.mubr.msk.bf16.gmra.mrb[128].mxu0 %vm6890_vm13, %v6807_v53 }
 0xa12   : > { %v12295_v29 = vpack.c.bf16 %v6740_v43, %v6737_v55  ;;  %v6742_v19 = vpop.f32.mrb[159].mxu1  ;;  %6967 = vmatprep.mubr.bf16.mxu0 %v12690_v21  ;;  %7084 = vmatpush1.bf16.msra.mxu0 %v10005_v36  ;;  %v10030_v36 = vld [vmem:[%s12634_s10 + $0xf4] ss:$8 sps:$4 sm:$0xff]   ;;  %v8916_v55 = vld [vmem:[%s12634_s10 + $0x100] sm:$0xff] }
 0xa13   : > { %7085 = vmatprep.subr.bf16.mxu0 %v10010_v18  ;;  %v8928_v18 = vcombine.high %v8916_v55, %v8916_v55  ;;  %v8927_v5 = vcombine.low %v8916_v55, %v8916_v55 }
 0xa14   : > { %v6812_v14 = vshll.u32 %v12295_v29, 16  ;;  %v7193_v42 = vrot.slane %v12295_v29, 1  ;;  %v6816_v34 = vshrl.u32 %v12295_v29, 16 }
 0xa15   : > { %v7273_v53 = vsel %vm6675_vm10, %v8927_v5, 0 }
 0xa16   : > { %v6814_v12 = vrot.slane %v6812_v14, 1  ;;  %7086 = vmatpush1.bf16.msra.mxu0 %v10008_v4  ;;  %v12314_v56 = vsel %vm2301_vm3, %v7191_v59, %v7193_v42  ;;  %v10024_v59 = vld [vmem:[%s12634_s10 + $0xd4] ss:$8 sps:$4 sm:$0xff]   ;;  %v7391_v14 = vld [vmem:[%s12635_s11] sm:$0x3] }
 0xa17   : > { %v6745_v23 = vpop.f32.mrb[160].mxu1  ;;  %7087 = vmatprep.subr.bf16.mxu0 %v10013_v63 }
 0xa18   : > { %v6747_v57 = vpop.f32.mrb[161].mxu1  ;;  %v6815_v47 = vsel %vm902_vm0, %v6810_v51, %v6814_v12  ;;  %v6818_v9 = vor.u32 %v6816_v34, %v6814_v12  ;;  %v12423_v51 = vrot.slane %v7391_v14, %v12691_v7 }
 0xa19   : > { %v6748_v25 = vpop.f32.mrb[162].mxu1  ;;  %8883 = vmatmul.mubr.msk.bf16.gmra.mrb[132].mxu0 %vm6890_vm13, %v6815_v47 }
 0xa1a   : > { %v12318_v33 = vpack.c.bf16 %v6748_v25, %v6745_v23  ;;  %v6750_v0 = vpop.f32.mrb[163].mxu1  ;;  %6977 = vmatprep.mubr.bf16.mxu0 %v12690_v21  ;;  %7088 = vmatpush1.bf16.msra.mxu0 %v10011_v50 }
 0xa1b   : > { %8899 = vmatprep.subr.msk.bf16.mxu0 %vm6675_vm10, %v8898_v62 }
 0xa1c   : > { %v6820_v31 = vshll.u32 %v12318_v33, 16  ;;  %v7195_v35 = vrot.slane %v12318_v33, 1  ;;  %v6824_v16 = vshrl.u32 %v12318_v33, 16 }
 0xa1e   : > { %v6822_v13 = vrot.slane %v6820_v31, 1  ;;  %7090 = vmatpush1.bf16.msra.mxu0 %v7074_v20  ;;  %v12330_v54 = vsel %vm2301_vm3, %v7193_v42, %v7195_v35  ;;  %v12420_v42 = vrot.slane %v7391_v14, %v10966_v49 }
 0xa1f   : > { %v6753_v40 = vpop.f32.mrb[164].mxu1  ;;  %7278 = vmatprep.subr.bf16.mxu0 %v10018_v41 }
 0xa20   : > { %v12332_v61 = vpack.c.bf16 %v6753_v40, %v6753_v40  ;;  %v6755_v2 = vpop.f32.mrb[165].mxu1  ;;  %v6823_v27 = vsel %vm902_vm0, %v6818_v9, %v6822_v13  ;;  %v6826_v26 = vor.u32 %v6824_v16, %v6822_v13 }
 0xa21   : > { %v6756_v11 = vpop.f32.mrb[166].mxu1  ;;  %8884 = vmatmul.mubr.msk.bf16.gmra.mrb[136].mxu0 %vm6890_vm13, %v6823_v27 }
 0xa22   : > { %v6757_v46 = vpop.f32.mrb[167].mxu1  ;;  %6987 = vmatprep.mubr.bf16.mxu0 %v12690_v21  ;;  %v6828_v52 = vshll.u32 %v12332_v61, 16  ;;  %v7197_v17 = vrot.slane %v12332_v61, 1  ;;  %v6832_v1 = vshrl.u32 %v12332_v61, 16 }
 0xa24   : > { %v6830_v37 = vrot.slane %v6828_v52, 1  ;;  %v7198_v10 = vsel %vm2301_vm3, %v7195_v35, %v7197_v17 }
 0xa26   : > { %v6831_v15 = vsel %vm902_vm0, %v6826_v26, %v6830_v37  ;;  %v6834_v8 = vor.u32 %v6832_v1, %v6830_v37 }
 0xa29   : > { %8885 = vmatmul.mubr.msk.bf16.gmra.mrb[140].mxu0 %vm6890_vm13, %v6831_v15 }
 0xa2a   : > { %6997 = vmatprep.mubr.bf16.mxu0 %v12690_v21 }
 0xa31   : > { %8886 = vmatmul.mubr.msk.bf16.gmra.mrb[144].mxu0 %vm6890_vm13, %v6834_v8 }
 0xa32   : > { %7111 = vmatprep.mubr.bf16.mxu0 %v12690_v21 }
 0xa39   : > { %8900 = vmatmul.mubr.msk.bf16.vlgmr.msra.gmra.mrb[124].mxu0 %vm6890_vm13, %v12252_v58  ;;  %v10027_v58 = vld [vmem:[%s12634_s10 + $0xe4] ss:$8 sps:$4 sm:$0xff]  }
 0xa3a   : > { %7121 = vmatprep.mubr.bf16.mxu0 %v12690_v21  ;;  %7279 = vmatpush1.bf16.msra.mxu0 %v10016_v28 }
 0xa3b   : > { %7280 = vmatprep.subr.bf16.mxu0 %v10021_v3 }
 0xa3e   : > { %7281 = vmatpush1.bf16.msra.mxu0 %v10019_v6 }
 0xa3f   : > { %7282 = vmatprep.subr.bf16.mxu0 %v10024_v59 }
 0xa41   : > { %8901 = vmatmul.mubr.msk.bf16.gmra.mrb[128].mxu0 %vm6890_vm13, %v12255_v30  ;;  %v10028_v30 = vld [vmem:[%s12634_s10 + $0xf0] ss:$8 sps:$4 sm:$0xff]  }
 0xa42   : > { %7131 = vmatprep.mubr.bf16.mxu0 %v12690_v21  ;;  %7283 = vmatpush1.bf16.msra.mxu0 %v10022_v32 }
 0xa43   : > { %7284 = vmatprep.subr.bf16.mxu0 %v10027_v58 }
 0xa46   : > { %7285 = vmatpush1.bf16.msra.mxu0 %v10025_v44 }
 0xa47   : > { %7286 = vmatprep.subr.bf16.mxu0 %v10030_v36 }
 0xa49   : > { %8902 = vmatmul.mubr.msk.bf16.gmra.mrb[132].mxu0 %vm6890_vm13, %v12272_v24 }
 0xa4a   : > { %7141 = vmatprep.mubr.bf16.mxu0 %v12690_v21  ;;  %7287 = vmatpush1.bf16.msra.mxu0 %v10028_v30 }
 0xa4b   : > { %8929 = vmatprep.subr.msk.bf16.mxu0 %vm6675_vm10, %v8928_v18 }
 0xa4e   : > { %7289 = vmatpush1.bf16.msra.mxu0 %v7273_v53 }
 0xa51   : > { %8903 = vmatmul.mubr.msk.bf16.gmra.mrb[136].mxu0 %vm6890_vm13, %v12295_v29 }
 0xa52   : > { %7151 = vmatprep.mubr.bf16.mxu0 %v12690_v21 }
 0xa59   : > { %8904 = vmatmul.mubr.msk.bf16.gmra.mrb[140].mxu0 %vm6890_vm13, %v12318_v33 }
 0xa5a   : > { %7161 = vmatprep.mubr.bf16.mxu0 %v12690_v21 }
 0xa61   : > { %8905 = vmatmul.mubr.msk.bf16.gmra.mrb[148].mxu0 %vm6890_vm13, %v12332_v61 }
 0xa62   : > { %7310 = vmatprep.mubr.bf16.mxu0 %v12690_v21 }
 0xa69   : > { %8930 = vmatmul.mubr.msk.bf16.vlgmr.msra.gmra.mrb[124].mxu0 %vm6890_vm13, %v12265_v60 }
 0xa6a   : > { %7320 = vmatprep.mubr.bf16.mxu0 %v12690_v21 }
 0xa71   : > { %8931 = vmatmul.mubr.msk.bf16.gmra.mrb[128].mxu0 %vm6890_vm13, %v12288_v48 }
 0xa72   : > { %7330 = vmatprep.mubr.bf16.mxu0 %v12690_v21 }
 0xa79   : > { %8932 = vmatmul.mubr.msk.bf16.gmra.mrb[132].mxu0 %vm6890_vm13, %v12314_v56 }
 0xa7a   : > { %7340 = vmatprep.mubr.bf16.mxu0 %v12690_v21 }
 0xa81   : > { %8933 = vmatmul.mubr.msk.bf16.gmra.mrb[136].mxu0 %vm6890_vm13, %v12330_v54 }
 0xa82   : > { %7350 = vmatprep.mubr.bf16.mxu0 %v12690_v21 }
 0xa89   : > { %8934 = vmatmul.mubr.msk.bf16.gmra.mrb[140].mxu0 %vm6890_vm13, %v7198_v10 }
 0xa8a   : > { %7360 = vmatprep.mubr.bf16.mxu0 %v12690_v21 }
 0xa91   : > { %8935 = vmatmul.mubr.msk.bf16.gmra.mrb[152].mxu0 %vm6890_vm13, %v7197_v17 }
 0xb04   : > { %v6999_v60 = vpop.f32.mrb[144].mxu0 }
 0xb05   : > { %v7001_v24 = vpop.f32.mrb[145].mxu0 }
 0xb06   : > { %v7003_v48 = vpop.f32.mrb[146].mxu0 }
 0xb07   : > { %v7004_v43 = vpop.f32.mrb[147].mxu0 }
 0xb34   : > { %v7163_v29 = vpop.f32.mrb[148].mxu0 }
 0xb35   : > { %v12412_v19 = vadd.f32 %v7163_v29, %v6999_v60  ;;  %v7165_v4 = vpop.f32.mrb[149].mxu0 }
 0xb36   : > { %v12414_v63 = vadd.f32 %v7165_v4, %v7001_v24  ;;  %v7167_v45 = vpop.f32.mrb[150].mxu0 }
 0xb37   : > { %v7168_v22 = vpop.f32.mrb[151].mxu0 }
 0xb3c   : > { %v7312_v12 = vpop.f32.mrb[124].mxu0 }
 0xb3d   : > { %v7403_v50 = vadd.f32 %v12420_v42, %v7312_v12  ;;  %v7314_v56 = vpop.f32.mrb[125].mxu0 }
 0xb3e   : > { %v7404_v23 = vadd.f32 %v12423_v51, %v7314_v56  ;;  %v7316_v62 = vpop.f32.mrb[126].mxu0 }
 0xb3f   : > { %v7425_v39 = vmax.f32 %v7403_v50, 0.0  ;;  %v7405_v57 = vadd.f32 %v12420_v42, %v7316_v62  ;;  %v7318_v47 = vpop.f32.mrb[127].mxu0 }
 0xb40   : > { %v7426_v25 = vmax.f32 %v7404_v23, 0.0  ;;  %v7406_v33 = vadd.f32 %v12423_v51, %v7318_v47 }
 0xb41   : > { %v7427_v0 = vmax.f32 %v7405_v57, 0.0  ;;  %v7469_v20 = vrot.slane %v7425_v39, 1 }
 0xb42   : > { %v7428_v49 = vmax.f32 %v7406_v33, 0.0  ;;  %v7472_v7 = vrot.slane %v7426_v25, 1 }
 0xb43   : > { %v7470_v41 = vrot.slane %v7427_v0, 1 }
 0xb44   : > { %v7473_v34 = vrot.slane %v7428_v49, 1  ;;  %v7322_v31 = vpop.f32.mrb[128].mxu0 }
 0xb45   : > { %v7471_v35 = vsel %vm2301_vm3, %v7469_v20, %v7470_v41  ;;  %v7407_v9 = vadd.f32 %v12420_v42, %v7322_v31  ;;  %v7324_v13 = vpop.f32.mrb[129].mxu0 }
 0xb46   : > { %v7533_v54 = vmax.f32 %v7425_v39, %v7471_v35  ;;  %v7408_v40 = vadd.f32 %v12423_v51, %v7324_v13  ;;  %v7326_v61 = vpop.f32.mrb[130].mxu0  ;;  %v7474_v2 = vsel %vm2301_vm3, %v7472_v7, %v7473_v34 }
 0xb47   : > { %v7429_v27 = vmax.f32 %v7407_v9, 0.0  ;;  %v7409_v11 = vadd.f32 %v12420_v42, %v7326_v61  ;;  %v7328_v16 = vpop.f32.mrb[131].mxu0  ;;  %v7534_v46 = vmax.f32 %v7426_v25, %v7474_v2 }
 0xb48   : > { %v7430_v52 = vmax.f32 %v7408_v40, 0.0  ;;  %v7410_v17 = vadd.f32 %v12423_v51, %v7328_v16 }
 0xb49   : > { %v7475_v26 = vrot.slane %v7429_v27, 1  ;;  %v7431_v37 = vmax.f32 %v7409_v11, 0.0 }
 0xb4a   : > { %v7477_v10 = vrot.slane %v7430_v52, 1  ;;  %v7432_v15 = vmax.f32 %v7410_v17, 0.0 }
 0xb4b   : > { %v7476_v1 = vsel %vm2301_vm3, %v7470_v41, %v7475_v26  ;;  %v7479_v8 = vrot.slane %v7431_v37, 1 }
 0xb4c   : > { %v7535_v28 = vmax.f32 %v7427_v0, %v7476_v1  ;;  %v7481_v3 = vrot.slane %v7432_v15, 1  ;;  %v7332_v6 = vpop.f32.mrb[132].mxu0  ;;  %v7478_v59 = vsel %vm2301_vm3, %v7473_v34, %v7477_v10 }
 0xb4d   : > { %v7480_v32 = vsel %vm2301_vm3, %v7475_v26, %v7479_v8  ;;  %v7411_v58 = vadd.f32 %v12420_v42, %v7332_v6  ;;  %v7334_v44 = vpop.f32.mrb[133].mxu0  ;;  %v7536_v36 = vmax.f32 %v7428_v49, %v7478_v59 }
 0xb4e   : > { %v7537_v55 = vmax.f32 %v7429_v27, %v7480_v32  ;;  %v7412_v30 = vadd.f32 %v12423_v51, %v7334_v44  ;;  %v7336_v18 = vpop.f32.mrb[134].mxu0  ;;  %v7559_v5 = vpack.c.bf16 %v7535_v28, %v7533_v54  ;;  %v7482_v53 = vsel %vm2301_vm3, %v7477_v10, %v7481_v3 }
 0xb4f   : > { %v7433_v60 = vmax.f32 %v7411_v58, 0.0  ;;  %v7413_v24 = vadd.f32 %v12420_v42, %v7336_v18  ;;  %v7338_v48 = vpop.f32.mrb[135].mxu0  ;;  %v7560_v43 = vpack.c.bf16 %v7536_v36, %v7534_v46  ;;  %v7538_v29 = vmax.f32 %v7430_v52, %v7482_v53 }
 0xb50   : > { %v7434_v4 = vmax.f32 %v7412_v30, 0.0  ;;  %v7414_v45 = vadd.f32 %v12423_v51, %v7338_v48 }
 0xb51   : > { %v7483_v14 = vrot.slane %v7433_v60, 1  ;;  %v7435_v22 = vmax.f32 %v7413_v24, 0.0  ;;  %7597 = vmatprep.subr.bf16.mxu1 %v7560_v43 }
 0xb52   : > { %v7485_v12 = vrot.slane %v7434_v4, 1  ;;  %v7436_v50 = vmax.f32 %v7414_v45, 0.0  ;;  %7598 = vmatpush1.bf16.msra.mxu1 %v7559_v5 }
 0xb53   : > { %v7484_v56 = vsel %vm2301_vm3, %v7479_v8, %v7483_v14  ;;  %v7487_v23 = vrot.slane %v7435_v22, 1 }
 0xb54   : > { %v7539_v62 = vmax.f32 %v7431_v37, %v7484_v56  ;;  %v7489_v39 = vrot.slane %v7436_v50, 1  ;;  %v7342_v57 = vpop.f32.mrb[136].mxu0  ;;  %v7486_v47 = vsel %vm2301_vm3, %v7481_v3, %v7485_v12 }
 0xb55   : > { %v7488_v25 = vsel %vm2301_vm3, %v7483_v14, %v7487_v23  ;;  %v7415_v33 = vadd.f32 %v12420_v42, %v7342_v57  ;;  %v7344_v0 = vpop.f32.mrb[137].mxu0  ;;  %v7540_v49 = vmax.f32 %v7432_v15, %v7486_v47 }
 0xb56   : > { %v7541_v20 = vmax.f32 %v7433_v60, %v7488_v25  ;;  %v7416_v41 = vadd.f32 %v12423_v51, %v7344_v0  ;;  %v7346_v7 = vpop.f32.mrb[138].mxu0  ;;  %v7561_v34 = vpack.c.bf16 %v7539_v62, %v7537_v55  ;;  %v7490_v31 = vsel %vm2301_vm3, %v7485_v12, %v7489_v39 }
 0xb57   : > { %v7437_v35 = vmax.f32 %v7415_v33, 0.0  ;;  %v7417_v9 = vadd.f32 %v12420_v42, %v7346_v7  ;;  %v7348_v13 = vpop.f32.mrb[139].mxu0  ;;  %v7562_v54 = vpack.c.bf16 %v7540_v49, %v7538_v29  ;;  %v7542_v40 = vmax.f32 %v7434_v4, %v7490_v31 }
 0xb58   : > { %v7438_v61 = vmax.f32 %v7416_v41, 0.0  ;;  %v7418_v2 = vadd.f32 %v12423_v51, %v7348_v13  ;;  %v12693_v13 = vmov 65535  }
 0xb59   : > { %v7491_v27 = vrot.slane %v7437_v35, 1  ;;  %v7439_v11 = vmax.f32 %v7417_v9, 0.0  ;;  %7599 = vmatprep.subr.bf16.mxu1 %v7562_v54 }
 0xb5a   : > { %v7493_v16 = vrot.slane %v7438_v61, 1  ;;  %v7440_v46 = vmax.f32 %v7418_v2, 0.0  ;;  %7600 = vmatpush1.bf16.msra.mxu1 %v7561_v34 }
 0xb5b   : > { %v7492_v52 = vsel %vm2301_vm3, %v7487_v23, %v7491_v27  ;;  %v7495_v17 = vrot.slane %v7439_v11, 1 }
 0xb5c   : > { %v7543_v26 = vmax.f32 %v7435_v22, %v7492_v52  ;;  %v7497_v37 = vrot.slane %v7440_v46, 1  ;;  %v7352_v10 = vpop.f32.mrb[140].mxu0  ;;  %v7494_v15 = vsel %vm2301_vm3, %v7489_v39, %v7493_v16 }
 0xb5d   : > { %v7496_v1 = vsel %vm2301_vm3, %v7491_v27, %v7495_v17  ;;  %v7419_v8 = vadd.f32 %v12420_v42, %v7352_v10  ;;  %v7354_v28 = vpop.f32.mrb[141].mxu0  ;;  %v7544_v3 = vmax.f32 %v7436_v50, %v7494_v15  ;;  %v10034_v10 = vld [vmem:[%s12636_s12 + $0x8] sm:$0xff]   ;;  %v10035_v15 = vld [vmem:[%s12637_s13] sm:$0xff]  }
 0xb5e   : > { %v7545_v6 = vmax.f32 %v7437_v35, %v7496_v1  ;;  %v7420_v59 = vadd.f32 %v12423_v51, %v7354_v28  ;;  %v7356_v32 = vpop.f32.mrb[142].mxu0  ;;  %v7563_v58 = vpack.c.bf16 %v7543_v26, %v7541_v20  ;;  %v7498_v44 = vsel %vm2301_vm3, %v7493_v16, %v7497_v37  ;;  %v10036_v1 = vld [vmem:[%s12637_s13 + $0x8] sm:$0xff]   ;;  %v10039_v28 = vld [vmem:[%s12637_s13 + $0x20] sm:$0xff]  }
 0xb5f   : > { %v7441_v36 = vmax.f32 %v7419_v8, 0.0  ;;  %v7421_v55 = vadd.f32 %v12420_v42, %v7356_v32  ;;  %v7358_v30 = vpop.f32.mrb[143].mxu0  ;;  %v7564_v18 = vpack.c.bf16 %v7544_v3, %v7542_v40  ;;  %v7546_v5 = vmax.f32 %v7438_v61, %v7498_v44  ;;  %v10038_v8 = vld [vmem:[%s12637_s13 + $0x18] sm:$0xff]   ;;  %v10040_v3 = vld [vmem:[%s12637_s13 + $0x28] sm:$0xff]  }
 0xb60   : > { %v7442_v53 = vmax.f32 %v7420_v59, 0.0  ;;  %v7422_v60 = vadd.f32 %v12423_v51, %v7358_v30 }
 0xb61   : > { %v7499_v24 = vrot.slane %v7441_v36, 1  ;;  %v7443_v48 = vmax.f32 %v7421_v55, 0.0  ;;  %7601 = vmatprep.subr.bf16.mxu1 %v7564_v18 }
 0xb62   : > { %v7501_v43 = vrot.slane %v7442_v53, 1  ;;  %v7444_v29 = vmax.f32 %v7422_v60, 0.0  ;;  %7602 = vmatpush1.bf16.msra.mxu1 %v7563_v58 }
 0xb63   : > { %v7500_v4 = vsel %vm2301_vm3, %v7495_v17, %v7499_v24  ;;  %v7503_v45 = vrot.slane %v7443_v48, 1 }
 0xb64   : > { %v7547_v14 = vmax.f32 %v7439_v11, %v7500_v4  ;;  %v7505_v22 = vrot.slane %v7444_v29, 1  ;;  %v7362_v12 = vpop.f32.mrb[152].mxu0  ;;  %v7502_v50 = vsel %vm2301_vm3, %v7497_v37, %v7501_v43  ;;  %v10033_v37 = vld [vmem:[%s12636_s12] sm:$0xff]  }
 0xb65   : > { %v7504_v56 = vsel %vm2301_vm3, %v7499_v24, %v7503_v45  ;;  %v7389_v23 = vadd.f32 %v7362_v12, %v12412_v19  ;;  %v7364_v62 = vpop.f32.mrb[153].mxu0  ;;  %v7548_v39 = vmax.f32 %v7440_v46, %v7502_v50 }
 0xb66   : > { %v7549_v57 = vmax.f32 %v7441_v36, %v7504_v56  ;;  %v7390_v47 = vadd.f32 %v7364_v62, %v12414_v63  ;;  %v7366_v25 = vpop.f32.mrb[154].mxu0  ;;  %v7565_v33 = vpack.c.bf16 %v7547_v14, %v7545_v6  ;;  %v7506_v0 = vsel %vm2301_vm3, %v7501_v43, %v7505_v22  ;;  %v10041_v6 = vld [vmem:[%s12637_s13 + $0x30] sm:$0xff]   ;;  %v10042_v36 = vld [vmem:[%s12637_s13 + $0x38] sm:$0xff]  }
 0xb67   : > { %v7423_v49 = vadd.f32 %v12420_v42, %v7389_v23  ;;  %v7367_v20 = vpop.f32.mrb[155].mxu0  ;;  %v7566_v41 = vpack.c.bf16 %v7548_v39, %v7546_v5  ;;  %v7550_v7 = vmax.f32 %v7442_v53, %v7506_v0  ;;  %v7589_v63 = vsel %vm7588_vm14, 4294967295, %v12693_v13  ;;  %v10043_v5 = vld [vmem:[%s12638_s14 + $0x20] sm:$0xff]  }
 0xb68   : > { %v7424_v34 = vadd.f32 %v12423_v51, %v7390_v47  ;;  %v7590_v11 = vsel %vm1497_vm2, %v7589_v63, 0  ;;  %v10047_v13 = vld [vmem:[%s12638_s14] sm:$0xff]   ;;  %vm7860_vm2 = vcmask 523264  }
 0xb69   : > { %v7445_v31 = vmax.f32 %v7423_v49, 0.0  ;;  %7603 = vmatprep.subr.bf16.mxu1 %v7566_v41 }
 0xb6a   : > { %v7446_v19 = vmax.f32 %v7424_v34, 0.0  ;;  %7604 = vmatpush1.bf16.msra.mxu1 %v7565_v33 }
 0xb6b   : > { %v7507_v35 = vrot.slane %v7445_v31, 1 }
 0xb6c   : > { %v7509_v9 = vrot.slane %v7446_v19, 1 }
 0xb6d   : > { %v7508_v54 = vsel %vm2301_vm3, %v7503_v45, %v7507_v35  ;;  %v7553_v40 = vmax.f32 %v7445_v31, %v7507_v35  ;;  %v10045_v35 = vld [vmem:[%s12638_s14 + $0x30] sm:$0xff]  }
 0xb6e   : > { %v7554_v61 = vmax.f32 %v7446_v19, %v7509_v9  ;;  %v7510_v42 = vsel %vm2301_vm3, %v7505_v22, %v7509_v9  ;;  %v7551_v2 = vmax.f32 %v7443_v48, %v7508_v54  ;;  %v10044_v19 = vld [vmem:[%s12638_s14 + $0x28] sm:$0xff]   ;;  %v10046_v9 = vld [vmem:[%s12638_s14 + $0x38] sm:$0xff]  }
 0xb6f   : > { %v7552_v27 = vmax.f32 %v7444_v29, %v7510_v42  ;;  %v7569_v52 = vpack.c.bf16 %v7553_v40, %v7553_v40 }
 0xb70   : > { %v7570_v51 = vpack.c.bf16 %v7554_v61, %v7554_v61  ;;  %v7567_v16 = vpack.c.bf16 %v7551_v2, %v7549_v57 }
 0xb71   : > { %v7568_v46 = vpack.c.bf16 %v7552_v27, %v7550_v7  ;;  %v7592_v26 = vand.u32 %v7590_v11, %v7569_v52 }
 0xb72   : > { %v7595_v17 = vand.u32 %v7590_v11, %v7570_v51 }
 0xb73   : > { %7605 = vmatprep.subr.bf16.mxu1 %v7568_v46 }
 0xb74   : > { %7606 = vmatpush1.bf16.msra.mxu1 %v7567_v16 }
 0xb75   : > { %7607 = vmatprep.subr.bf16.mxu1 %v7595_v17 }
 0xb78   : > { %7608 = vmatpush1.bf16.msra.mxu1 %v7592_v26 }
 0xb79   : > { %9038 = vmatprep.subr.bf16.mxu1 %v10035_v15 }
 0xb7b   : > { %8938 = vmatmul.mubr.msk.bf16.vlgmr.msra.gmra.mrb[168].mxu1 %vm7581_vm15, %v10033_v37 }
 0xb7c   : > { %7639 = vmatprep.mubr.bf16.mxu1 %v12690_v21  ;;  %9039 = vmatpush3.bf16.msra.mxu1 %v10035_v15  ;;  %v10037_v21 = vld [vmem:[%s12637_s13 + $0x10] sm:$0xff]  }
 0xb7d   : > { %9040 = vmatprep.subr.bf16.mxu1 %v10036_v1 }
 0xb80   : > { %9041 = vmatpush3.bf16.msra.mxu1 %v10036_v1 }
 0xb81   : > { %9042 = vmatprep.subr.bf16.mxu1 %v10037_v21 }
 0xb83   : > { %8939 = vmatmul.mubr.msk.bf16.gmra.mrb[172].mxu1 %vm7581_vm15, %v10034_v10 }
 0xb84   : > { %9043 = vmatpush3.bf16.msra.mxu1 %v10037_v21  ;;  %v10048_v21 = vld [vmem:[%s12638_s14 + $0x8] sm:$0xff]  }
 0xb85   : > { %9044 = vmatprep.subr.bf16.mxu1 %v10038_v8 }
 0xb88   : > { %9045 = vmatpush3.bf16.msra.mxu1 %v10038_v8  ;;  %v10049_v8 = vld [vmem:[%s12638_s14 + $0x10] sm:$0xff]  }
 0xb89   : > { %9046 = vmatprep.subr.bf16.mxu1 %v10039_v28 }
 0xb8c   : > { %9047 = vmatpush3.bf16.msra.mxu1 %v10039_v28  ;;  %v10050_v28 = vld [vmem:[%s12638_s14 + $0x18] sm:$0xff]  }
 0xb8d   : > { %9048 = vmatprep.subr.bf16.mxu1 %v10040_v3 }
 0xb90   : > { %9049 = vmatpush3.bf16.msra.mxu1 %v10040_v3  ;;  %v10051_v3 = vld [vmem:[%s12638_s14 + $0x40] sm:$0xff]  }
 0xb91   : > { %9050 = vmatprep.subr.bf16.mxu1 %v10041_v6 }
 0xb94   : > { %9051 = vmatpush3.bf16.msra.mxu1 %v10041_v6  ;;  %v10052_v6 = vld [vmem:[%s12638_s14 + $0x48] sm:$0xff]  }
 0xb95   : > { %9052 = vmatprep.subr.bf16.mxu1 %v10042_v36 }
 0xb98   : > { %9053 = vmatpush3.bf16.msra.mxu1 %v10042_v36 }
 0xb99   : > { %9058 = vmatprep.subr.bf16.mxu1 %v10043_v5 }
 0xc4e   : > { %v7631_v59 = vpop.f32.mrb[168].mxu1 }
 0xc4f   : > { %v7633_v32 = vpop.f32.mrb[169].mxu1 }
 0xc50   : > { %v9709_v58 = vpack.i.bf16 %v7633_v32, %v7631_v59  ;;  %v7635_v44 = vpop.f32.mrb[170].mxu1  ;;  %v10054_v32 = vld [vmem:[%s12638_s14 + $0x58] sm:$0xff]  }
 0xc51   : > { %v7637_v55 = vpop.f32.mrb[171].mxu1 }
 0xc52   : > { %v9714_v30 = vpack.i.bf16 %v7637_v55, %v7635_v44  ;;  %9710 = vrot.lane.b32.xlu1 %v9709_v58, %s10079_s27  ;;  %v10080_v58 = vmov 0.0  }
 0xc54   : > { %9715 = vrot.lane.b32.xlu0 %v9714_v30, %s10079_s27 }
 0xc56   : > { %v7641_v18 = vpop.f32.mrb[172].mxu1 }
 0xc57   : > { %v7643_v53 = vpop.f32.mrb[173].mxu1 }
 0xc58   : > { %v9719_v60 = vpack.i.bf16 %v7643_v53, %v7641_v18  ;;  %v7645_v24 = vpop.f32.mrb[174].mxu1 }
 0xc59   : > { %v7647_v48 = vpop.f32.mrb[175].mxu1 }
 0xc5a   : > { %v9724_v43 = vpack.i.bf16 %v7647_v48, %v7645_v24  ;;  %9720 = vrot.lane.b32.xlu1 %v9719_v60, %s10079_s27 }
 0xc5c   : > { %9725 = vrot.lane.b32.xlu0 %v9724_v43, %s10079_s27 }
 0xcc4   : > { %v9711_v29 = vpop.permute.xlu1 %9710 }
 0xcc5   : > { %v9713_v4 = vunpack.i.h.bf16 %v9711_v29  ;;  %v9712_v45 = vunpack.i.l.bf16 %v9711_v29 }
 0xcc6   : > { %v9716_v14 = vpop.permute.xlu0 %9715 }
 0xcc7   : > { %v7675_v22 = vsel %vm7674_vm1, %v9712_v45, %v9713_v4  ;;  %v9718_v12 = vunpack.i.h.bf16 %v9716_v14  ;;  %v9717_v50 = vunpack.i.l.bf16 %v9716_v14 }
 0xcc8   : > { %v7683_v23 = vmax.f32 %v7631_v59, %v7675_v22  ;;  %v10053_v59 = vld [vmem:[%s12638_s14 + $0x50] sm:$0xff]  }
 0xcc9   : > { %v7676_v56 = vsel %vm7674_vm1, %v9717_v50, %v9718_v12 }
 0xcca   : > { %v7684_v62 = vmax.f32 %v7635_v44, %v7676_v56  ;;  %v8982_v44 = vld [vmem:[%s12639_s15] ss:$0 sm:$0xff] }
 0xccc   : > { %v9721_v39 = vpop.permute.xlu1 %9720  ;;  %v7687_v57 = vpack.c.bf16 %v7684_v62, %v7683_v23 }
 0xccd   : > { %v9723_v47 = vunpack.i.h.bf16 %v9721_v39  ;;  %v9722_v25 = vunpack.i.l.bf16 %v9721_v39 }
 0xcce   : > { %9054 = vmatprep.mubr.bf16.mxu1 %v7687_v57  ;;  %v9726_v33 = vpop.permute.xlu0 %9725 }
 0xccf   : > { %v7677_v0 = vsel %vm7674_vm1, %v9722_v25, %v9723_v47  ;;  %v9728_v49 = vunpack.i.h.bf16 %v9726_v33  ;;  %v9727_v20 = vunpack.i.l.bf16 %v9726_v33 }
 0xcd0   : > { %v7685_v7 = vmax.f32 %v7641_v18, %v7677_v0 }
 0xcd1   : > { %v7678_v41 = vsel %vm7674_vm1, %v9727_v20, %v9728_v49  ;;  %v8124_v49 = vld [vmem:[%s12640_s16] sm:$0xf] }
 0xcd2   : > { %v7686_v34 = vmax.f32 %v7645_v24, %v7678_v41  ;;  %v10055_v20 = vld [vmem:[%s12641_s17] sm:$0xff]  }
 0xcd4   : > { %v7688_v31 = vpack.c.bf16 %v7686_v34, %v7685_v7 }
 0xcd6   : > { %9055 = vmatmul.mubr.bf16.vlgmr.msra.gmra.mrb[176].mxu1 %v7688_v31 }
 0xcd7   : > { %9059 = vmatpush3.bf16.msra.mxu1 %v10043_v5 }
 0xcd8   : > { %9060 = vmatprep.subr.bf16.mxu1 %v10044_v19 }
 0xcdb   : > { %9061 = vmatpush3.bf16.msra.mxu1 %v10044_v19 }
 0xcdc   : > { %9062 = vmatprep.subr.bf16.mxu1 %v10045_v35 }
 0xcdf   : > { %9063 = vmatpush3.bf16.msra.mxu1 %v10045_v35 }
 0xce0   : > { %9064 = vmatprep.subr.bf16.mxu1 %v10046_v9 }
 0xce3   : > { %9065 = vmatpush3.bf16.msra.mxu1 %v10046_v9  ;;  %v10057_v9 = vld [vmem:[%s12642_s18] sm:$0xff]  }
 0xce4   : > { %9070 = vmatprep.subr.bf16.mxu1 %v10047_v13 }
 0xda9   : > { %v9056_v63 = vpop.f32.mrb[176].mxu1 }
 0xdaa   : > { %v7787_v54 = vpop.f32.mrb[177].mxu1 }
 0xdab   : > { %v9057_v40 = vpop.f32.mrb[178].mxu1 }
 0xdac   : > { %v7803_v61 = vpack.c.bf16 %v9057_v40, %v9056_v63  ;;  %v7790_v42 = vpop.f32.mrb[179].mxu1  ;;  %v10058_v63 = vld [vmem:[%s12642_s18 + $0x8] sm:$0xff]  }
 0xdad   : > { %v7802_v2 = vpack.c.bf16 %v7790_v42, %v7787_v54 }
 0xdae   : > { %v7829_v27 = vshll.u32 %v7803_v61, 16  ;;  %v8005_v11 = vrot.slane %v7803_v61, 1  ;;  %v7833_v37 = vshrl.u32 %v7803_v61, 16 }
 0xdaf   : > { %v7824_v51 = vshll.u32 %v7802_v2, 16  ;;  %v8004_v16 = vrot.slane %v7802_v2, 1  ;;  %v7822_v46 = vshrl.u32 %v7802_v2, 16 }
 0xdb0   : > { %v7831_v17 = vrot.slane %v7829_v27, 1  ;;  %v10059_v27 = vld [vmem:[%s12644_s20] sm:$0xff]  }
 0xdb1   : > { %v7826_v52 = vrot.slane %v7824_v51, 1  ;;  %v8006_v26 = vsel %vm2301_vm3, %v8004_v16, %v8005_v11  ;;  %v8987_v51 = vld [vmem:[%s12643_s19] ss:$0 sm:$0xff] }
 0xdb2   : > { %v7835_v1 = vor.u32 %v7833_v37, %v7831_v17 }
 0xdb3   : > { %v7827_v10 = vor.u32 %v7826_v52, %v7822_v46 }
 0xdb5   : > { %v7832_v15 = vsel %vm902_vm0, %v7827_v10, %v7831_v17  ;;  %vm10081_vm0 = vmmov 0   ;;  %v8308_v17 = vld [vmem:[%s699_s29] sm:$0xff] }
 0xdb6   : > { %9066 = vmatprep.mubr.msk.bf16.mxu1 %vm7860_vm2, %v7832_v15 }
 0xdb7   : > { %9067 = vmatmul.mubr.msk.bf16.vlgmr.msra.gmra.mrb[180].mxu1 %vm7860_vm2, %v7835_v1 }
 0xdb8   : > { %9071 = vmatpush3.bf16.msra.mxu1 %v10047_v13  ;;  %9078 = vmatprep.mubr.msk.bf16.mxu1 %vm7860_vm2, %v7802_v2 }
 0xdb9   : > { %9072 = vmatprep.subr.bf16.mxu1 %v10048_v21 }
 0xdbc   : > { %9073 = vmatpush3.bf16.msra.mxu1 %v10048_v21  ;;  %v8991_v21 = vld [vmem:[%s12645_s21] ss:$0 sm:$0xff] }
 0xdbd   : > { %9074 = vmatprep.subr.bf16.mxu1 %v10049_v8 }
 0xdc0   : > { %9075 = vmatpush3.bf16.msra.mxu1 %v10049_v8 }
 0xdc1   : > { %9076 = vmatprep.subr.bf16.mxu1 %v10050_v28 }
 0xdc4   : > { %9077 = vmatpush3.bf16.msra.mxu1 %v10050_v28 }
 0xdc5   : > { %9082 = vmatprep.subr.bf16.mxu1 %v10051_v3 }
 0xdc7   : > { %9079 = vmatmul.mubr.msk.bf16.vlgmr.msra.gmra.mrb[180].mxu1 %vm7860_vm2, %v7803_v61 }
 0xdc8   : > { %9083 = vmatpush3.bf16.msra.mxu1 %v10051_v3  ;;  %9090 = vmatprep.mubr.msk.bf16.mxu1 %vm7860_vm2, %v8006_v26 }
 0xdc9   : > { %9084 = vmatprep.subr.bf16.mxu1 %v10052_v6 }
 0xdcc   : > { %9085 = vmatpush3.bf16.msra.mxu1 %v10052_v6 }
 0xdcd   : > { %9086 = vmatprep.subr.bf16.mxu1 %v10053_v59 }
 0xdd0   : > { %9087 = vmatpush3.bf16.msra.mxu1 %v10053_v59 }
 0xdd1   : > { %9088 = vmatprep.subr.bf16.mxu1 %v10054_v32 }
 0xdd4   : > { %9089 = vmatpush3.bf16.msra.mxu1 %v10054_v32 }
 0xdd5   : > { %9094 = vmatprep.subr.bf16.mxu1 %v10080_v58 }
 0xdd7   : > { %9091 = vmatmul.mubr.msk.bf16.vlgmr.msra.gmra.mrb[180].mxu1 %vm7860_vm2, %v8005_v11  ;;  %v10060_v11 = vld [vmem:[%s12644_s20 + $0x8] sm:$0xff]  }
 0xdd8   : > { %9098 = vmatprep.mubr.msk.bf16.mxu1 %vm10081_vm0, %v10080_v58 }
 0xeaa   : > { %v9092_v36 = vpop.f32.mrb[180].mxu1 }
 0xeab   : > { %v8099_v55 = vadd.f32 %v9092_v36, %v8982_v44  ;;  %v8071_v30 = vpop.f32.mrb[181].mxu1 }
 0xeac   : > { %v8097_v18 = vadd.f32 %v8982_v44, %v8071_v30  ;;  %v9093_v5 = vpop.f32.mrb[182].mxu1 }
 0xead   : > { %v8103_v53 = vmax.f32 %v8099_v55, 0.0  ;;  %v8100_v60 = vadd.f32 %v9093_v5, %v8982_v44  ;;  %v8074_v24 = vpop.f32.mrb[183].mxu1 }
 0xeae   : > { %v8101_v48 = vmax.f32 %v8097_v18, 0.0  ;;  %v8098_v43 = vadd.f32 %v8982_v44, %v8074_v24 }
 0xeaf   : > { %v8104_v29 = vmax.f32 %v8100_v60, 0.0  ;;  %v8112_v45 = vrot.slane %v8103_v53, 1 }
 0xeb0   : > { %v8102_v4 = vmax.f32 %v8098_v43, 0.0  ;;  %v8109_v22 = vrot.slane %v8101_v48, 1 }
 0xeb1   : > { %v8114_v14 = vrot.slane %v8104_v29, 1 }
 0xeb2   : > { %v8110_v12 = vrot.slane %v8102_v4, 1 }
 0xeb3   : > { %v8115_v50 = vsel %vm2301_vm3, %v8112_v45, %v8114_v14  ;;  %v8123_v56 = vmax.f32 %v8104_v29, %v8114_v14 }
 0xeb4   : > { %v8122_v23 = vmax.f32 %v8103_v53, %v8115_v50  ;;  %v8111_v62 = vsel %vm2301_vm3, %v8109_v22, %v8110_v12  ;;  %v8113_v39 = vsel %vm2301_vm3, %v8110_v12, %v8112_v45  ;;  %vm8196_vm3 = vcmask 261120  }
 0xeb5   : > { %v8120_v57 = vmax.f32 %v8101_v48, %v8111_v62  ;;  %v8121_v47 = vmax.f32 %v8102_v4, %v8113_v39 }
 0xeb6   : > { %v8126_v25 = vpack.c.bf16 %v8123_v56, %v8122_v23 }
 0xeb7   : > { %v8125_v33 = vpack.c.bf16 %v8121_v47, %v8120_v57 }
 0xeb8   : > { %v8132_v0 = vand.u32 %v8126_v25, %v12692_v38  ;;  %v10056_v38 = vld [vmem:[%s12641_s17 + $0x8] sm:$0xff]  }
 0xeb9   : > { %9095 = vmatpush3.bf16.msra.mxu1 %v8125_v33 }
 0xeba   : > { %9096 = vmatprep.subr.bf16.mxu1 %v10080_v58 }
 0xebd   : > { %9097 = vmatpush3.bf16.msra.mxu1 %v8132_v0 }
 0xebe   : > { %9102 = vmatprep.subr.bf16.mxu1 %v10080_v58 }
 0xec0   : > { %9099 = vmatmul.mubr.msk.bf16.vlgmr.msra.gmra.mrb[184].mxu1 %vm8127_vm4, %v8124_v49 }
 0xec1   : > { %9106 = vmatprep.mubr.msk.bf16.mxu1 %vm10081_vm0, %v10080_v58  ;;  %9103 = vmatpush3.bf16.msra.mxu1 %v10055_v20 }
 0xec2   : > { %9104 = vmatprep.subr.bf16.mxu1 %v10080_v58 }
 0xec5   : > { %9105 = vmatpush3.bf16.msra.mxu1 %v10056_v38 }
 0xec6   : > { %9110 = vmatprep.subr.bf16.mxu1 %v10080_v58 }
 0xf93   : > { %v8168_v41 = vpop.f32.mrb[184].mxu1 }
 0xf94   : > { %8175 = vrot.lane.b32.xlu1 %v8168_v41, %s10082_s5  ;;  %v9100_v7 = vpop.f32.mrb[185].mxu1 }
 0xf95   : > { %v8171_v34 = vpop.f32.mrb[186].mxu1 }
 0xf96   : > { %v9101_v31 = vpop.f32.mrb[187].mxu1 }
0x1006   : > { %v8176_v19 = vpop.permute.xlu1 %8175 }
0x1007   : > { %v8178_v35 = vmax.f32 %v8168_v41, %v8176_v19 }
0x1009   : > { %v8179_v13 = vpack.c.bf16 %v8178_v35, %v8178_v35 }
0x100b   : > { %9107 = vmatmul.mubr.msk.bf16.vlgmr.msra.gmra.mrb[188].mxu1 %vm8196_vm3, %v8179_v13 }
0x100c   : > { %9111 = vmatpush3.bf16.msra.mxu1 %v10057_v9  ;;  %9114 = vmatprep.mubr.msk.bf16.mxu1 %vm10081_vm0, %v10080_v58 }
0x100d   : > { %9112 = vmatprep.subr.bf16.mxu1 %v10080_v58 }
0x1010   : > { %9113 = vmatpush3.bf16.msra.mxu1 %v10058_v63 }
0x1011   : > { %9118 = vmatprep.subr.bf16.mxu1 %v10080_v58 }
0x10de   : > { %v8234_v54 = vpop.f32.mrb[188].mxu1 }
0x10df   : > { %v8240_v40 = vpack.c.bf16 %v8234_v54, %v8234_v54  ;;  %v9108_v61 = vpop.f32.mrb[189].mxu1 }
0x10e0   : > { %v8237_v42 = vpop.f32.mrb[190].mxu1 }
0x10e1   : > { %v9109_v2 = vpop.f32.mrb[191].mxu1  ;;  %9115 = vmatmul.mubr.msk.bf16.vlgmr.msra.gmra.mrb[192].mxu1 %vm8196_vm3, %v8240_v40 }
0x10e2   : > { %9122 = vmatprep.mubr.msk.bf16.mxu1 %vm10081_vm0, %v10080_v58  ;;  %9119 = vmatpush3.bf16.msra.mxu1 %v10059_v27 }
0x10e3   : > { %9120 = vmatprep.subr.bf16.mxu1 %v10080_v58 }
0x10e6   : > { %9121 = vmatpush3.bf16.msra.mxu1 %v10060_v11 }
0x11b4   : > { %v8301_v16 = vpop.f32.mrb[192].mxu1 }
0x11b5   : > { %v8302_v46 = vadd.f32 %v8987_v51, %v8301_v16  ;;  %v9116_v52 = vpop.f32.mrb[193].mxu1 }
0x11b6   : > { %v8304_v26 = vpop.f32.mrb[194].mxu1 }
0x11b7   : > { %v8307_v37 = vmax.f32 %v8302_v46, 0.0  ;;  %v9117_v10 = vpop.f32.mrb[195].mxu1 }
0x11b9   : > { %v8309_v15 = vmul.f32 %v8308_v17, %v8307_v37 }
0x11bb   : > { %v8310_v1 = vpack.c.bf16 %v8309_v15, %v8309_v15 }
0x11bd   : > { %9123 = vmatmul.mubr.msk.bf16.vlgmr.msra.gmra.mrb[196].mxu1 %vm8196_vm3, %v8310_v1 }
0x1290   : > { %v8371_v8 = vpop.f32.mrb[196].mxu1 }
0x1291   : > { %v8372_v28 = vadd.f32 %v8991_v21, %v8371_v8  ;;  %v9124_v3 = vpop.f32.mrb[197].mxu1 }
0x1292   : > { %v8374_v6 = vpop.f32.mrb[198].mxu1 }
0x1293   : > { %v9125_v59 = vpop.f32.mrb[199].mxu1  ;;  %v8378_v32 = vsel %vm8377_vm5, %v8372_v28, -inf }
0x1294   : > { %8379 = vmax.xlane.f32.xlu0 %v8378_v32 }
0x1321   : > { %v8380_v58 = vpop.xlane.xlu0 %8379 }
0x1322   : > { %v8381_v44 = vsub.f32 %v8372_v28, %v8380_v58 }
0x1324   : > { %v8382_v36 = vmul.f32 1.442695, %v8381_v44 }
0x1326   : > { %10061 = vpow2.f32 %v8382_v36 }
0x1330   : > { %v10062_v55 = vpop.eup %10061 }
0x1331   : > { %v8384_v30 = vsel %vm8377_vm5, %v10062_v55, 0.0 }
0x1332   : > { %8385 = vadd.xlane.f32.xlu1 %v8384_v30 }
0x13bf   : > { %v8386_v18 = vpop.xlane.xlu1 %8385 }
0x13c0   : > { %10063 = vlog2.f32 %v8386_v18 }
0x13ca   : > { %v10064_v5 = vpop.eup %10063 }
0x13cb   : > { %v8388_v53 = vmul.f32 0.6931472, %v10064_v5 }
0x13cd   : > { %v8389_v60 = vadd.f32 %v8388_v53, %v8380_v58 }
0x13cf   : > { %v8390_v24 = vsub.f32 %v8372_v28, %v8389_v60 }
0x13d1   : > { %8391 = vst.msk [vmem:[%s703_s6] sm:$0xff] %vm8377_vm5, %v8390_v24 }
0x13d2 PF: > { %s32_s3 = sadd.s32 1, %s10073_s3  }
0x13d3   : > { %p29_p5 = scmp.ge.s32.totalorder %s32_s3, 4  }
0x13d5   :  { %31 = sbr.rel (!%p29_p5) target bundleno = 8 (0x8), region = 149 }

</bundles_post_ra>
